<compile_context>
chip_gen: v7x
topology: tpu7x:2x2x1
jax: 0.10.0
libtpu: 0.0.40
codegen_flags: <defaults>
</compile_context>

<pallas_src>
import functools

import jax
import jax.numpy as jnp
from jax.experimental import pallas as pl
from jax.experimental.pallas import tpu as pltpu

F32 = jnp.float32
BF16 = jnp.bfloat16          # MXU operand / activation-storage dtype
H = 128                      # LSTM hidden size (fixed by the module)
_BN_EPS = 1e-5


# ----------------------------------------------------------------------------
# VMEM budgeting
# ----------------------------------------------------------------------------
@functools.lru_cache(maxsize=None)
def _vmem_limit_bytes():
    """Scoped-VMEM ceiling: ~70% of per-core VMEM, capped at 96 MiB.

    v5e/v6e (128 MiB physical) -> ~90-96 MiB; v7x (64 MiB per TC) -> ~45 MiB.
    Falls back to a generation-safe 48 MiB if the query is unavailable.
    """
    try:
        cap = int(pltpu.get_tpu_info().vmem_capacity_bytes)
        return min(int(0.70 * cap), 96 * 1024 * 1024)
    except Exception:
        return 48 * 1024 * 1024


def _pick_divisor_tile(total, db_bytes, once_bytes, fixed_bytes, vmem_limit,
                       cap=None):
    """Largest divisor `t` of `total` whose VMEM footprint fits the budget.

    Footprint model: double-buffered pipeline blocks (2 * t * db_bytes) plus
    single-buffered in-kernel temporaries (t * once_bytes) plus fixed bytes
    (weights, stats, scratch), kept under ~60% of the scoped VMEM limit.
    """
    budget = int(0.6 * vmem_limit) - int(fixed_bytes)
    start = min(total, cap) if cap is not None else total
    for t in range(start, 0, -1):
        if total % t:
            continue
        if t * (2 * db_bytes + once_bytes) <= budget:
            return t
    return 1   # smallest correct tile; weights are small for this model


def _full_spec(shape):
    nd = len(shape)
    return pl.BlockSpec(shape, lambda *_: (0,) * nd)


def _compiler(sem, vmem_limit):
    return pltpu.CompilerParams(dimension_semantics=sem,
                                vmem_limit_bytes=vmem_limit)


# ----------------------------------------------------------------------------
# In-kernel helpers
# ----------------------------------------------------------------------------
def _conv3_same(x_bf16, wflat_ref, b_ref):
    """k=3 'same' conv along axis 1: (TB, L, Cin) bf16 -> (TB*L, Cout) f32.

    Weights come flattened as (3*Cin, Cout): when Cin is lane-aligned the
    three taps fold into one K=3*Cin MXU matmul (accumulation stays inside the
    MXU); the tiny first layer keeps 3 shifted matmuls.
    """
    TB, L, cin = x_bf16.shape
    cout = wflat_ref.shape[1]
    zero = jnp.zeros((TB, 1, cin), BF16)
    xp = jnp.concatenate([zero, x_bf16, zero], axis=1)   # in-kernel 'same' pad
    taps = [xp[:, k:k + L, :] for k in range(3)]
    if cin % 128 == 0:
        xi = jnp.concatenate(taps, axis=-1).reshape(TB * L, 3 * cin)
        return jnp.dot(xi, wflat_ref[...],
                       preferred_element_type=F32) + b_ref[...]
    w = wflat_ref[...]
    acc = jnp.zeros((TB * L, cout), F32)
    for k in range(3):
        acc = acc + jnp.dot(taps[k].reshape(TB * L, cin),
                            w[k * cin:(k + 1) * cin],
                            preferred_element_type=F32)
    return acc + b_ref[...]


def _partial_stats(y2d):
    """Per-tile partial sum / sum^2 over rows: (R, C) f32 -> (2, C) f32."""
    s1 = jnp.sum(y2d, axis=0, keepdims=True)
    s2 = jnp.sum(y2d * y2d, axis=0, keepdims=True)
    return jnp.concatenate([s1, s2], axis=0)


def _bn_scale_shift(stats_ref, gamma_ref, beta_ref, count):
    """Reduce per-tile partial stats -> per-channel scale/shift, each (1, C)."""
    st = jnp.sum(stats_ref[...], axis=0)                 # (2, C) totals
    inv = 1.0 / count
    mean = st[0:1] * inv
    # Training-mode (biased) variance.  E[x^2]-E[x]^2 can cancel for data with
    # large per-channel means; clamp at 0 so rsqrt stays finite.
    var = jnp.maximum(st[1:2] * inv - mean * mean, 0.0)
    scale = gamma_ref[...] * jax.lax.rsqrt(var + _BN_EPS)
    shift = beta_ref[...] - mean * scale
    return scale, shift


# ----------------------------------------------------------------------------
# Kernel 1: first conv + bias, emitting bf16 y and per-tile partial BN stats
# ----------------------------------------------------------------------------
def _conv_stats_kernel(x_ref, wf_ref, b_ref, y_ref, st_ref):
    TB, L, _ = x_ref.shape
    cout = wf_ref.shape[1]
    y = _conv3_same(x_ref[...].astype(BF16), wf_ref, b_ref)   # (TB*L, Cout) f32
    st_ref[...] = _partial_stats(y).reshape(1, 2, cout)
    y_ref[...] = y.reshape(TB, L, cout).astype(BF16)


def conv_stats_call(x, wflat, b, vl):
    B, L, cin = x.shape
    cout = wflat.shape[1]
    db = L * cin * x.dtype.itemsize + L * cout * 2
    once = L * 3 * cin * 2 + L * cout * 4
    fixed = wflat.size * 2 + (b.size + 4 * cout) * 4
    tb = _pick_divisor_tile(B, db, once, fixed, vl)
    nb = B // tb
    return pl.pallas_call(
        _conv_stats_kernel,
        grid=(nb,),
        in_specs=[
            pl.BlockSpec((tb, L, cin), lambda i: (i, 0, 0)),
            _full_spec(wflat.shape),
            _full_spec(b.shape),
        ],
        out_specs=(
            pl.BlockSpec((tb, L, cout), lambda i: (i, 0, 0)),
            pl.BlockSpec((1, 2, cout), lambda i: (i, 0, 0)),
        ),
        out_shape=(jax.ShapeDtypeStruct((B, L, cout), BF16),
                   jax.ShapeDtypeStruct((nb, 2, cout), F32)),
        compiler_params=_compiler(("parallel",), vl),
    )(x, wflat, b)


# ----------------------------------------------------------------------------
# Kernel 2: BN(previous layer, from partial stats) fused with next conv+stats
# ----------------------------------------------------------------------------
def _bn_conv_stats_kernel(y_ref, st_in_ref, g_ref, be_ref, wf_ref, cb_ref,
                          yo_ref, st_out_ref, *, count):
    TB, L, cin = y_ref.shape
    cout = wf_ref.shape[1]
    scale, shift = _bn_scale_shift(st_in_ref, g_ref, be_ref, count)
    h = (y_ref[...].astype(F32) * scale.reshape(1, 1, cin)
         + shift.reshape(1, 1, cin))
    y = _conv3_same(h.astype(BF16), wf_ref, cb_ref)
    st_out_ref[...] = _partial_stats(y).reshape(1, 2, cout)
    yo_ref[...] = y.reshape(TB, L, cout).astype(BF16)


def bn_conv_stats_call(y, stats, gamma, beta, wflat, cb, count, vl):
    B, L, cin = y.shape
    cout = wflat.shape[1]
    db = L * cin * 2 + L * cout * 2
    once = L * cin * 4 + L * 3 * cin * 2 + L * cout * 4
    fixed = wflat.size * 2 + (stats.size * 2 + cb.size + gamma.size
                              + beta.size + 4 * cout) * 4
    tb = _pick_divisor_tile(B, db, once, fixed, vl)
    nb = B // tb
    kern = functools.partial(_bn_conv_stats_kernel, count=count)
    return pl.pallas_call(
        kern,
        grid=(nb,),
        in_specs=[
            pl.BlockSpec((tb, L, cin), lambda i: (i, 0, 0)),
            _full_spec(stats.shape),
            _full_spec(gamma.shape),
            _full_spec(beta.shape),
            _full_spec(wflat.shape),
            _full_spec(cb.shape),
        ],
        out_specs=(
            pl.BlockSpec((tb, L, cout), lambda i: (i, 0, 0)),
            pl.BlockSpec((1, 2, cout), lambda i: (i, 0, 0)),
        ),
        out_shape=(jax.ShapeDtypeStruct((B, L, cout), BF16),
                   jax.ShapeDtypeStruct((nb, 2, cout), F32)),
        compiler_params=_compiler(("parallel",), vl),
    )(y, stats, gamma, beta, wflat, cb)


# ----------------------------------------------------------------------------
# Kernel 3: final BN fused with the hoisted LSTM input projection (both dirs).
# Emits separate bf16 gate slabs gxf / gxb (gate order i, f, g, o).
# ----------------------------------------------------------------------------
def _bn_proj_kernel(y_ref, st_ref, g_ref, be_ref, wih_ref, bih_ref,
                    gxf_ref, gxb_ref, *, count):
    TB, L, cin = y_ref.shape
    scale, shift = _bn_scale_shift(st_ref, g_ref, be_ref, count)
    h = (y_ref[...].astype(F32) * scale.reshape(1, 1, cin)
         + shift.reshape(1, 1, cin))
    h2 = h.reshape(TB * L, cin).astype(BF16)
    gx = jnp.dot(h2, wih_ref[...], preferred_element_type=F32) + bih_ref[...]
    g4 = 4 * H
    gxf_ref[...] = gx[:, :g4].reshape(TB, L, g4).astype(BF16)
    gxb_ref[...] = gx[:, g4:].reshape(TB, L, g4).astype(BF16)


def bn_proj_call(y, stats, gamma, beta, wih_all, b_all, count, vl):
    B, L, cin = y.shape
    g4 = 4 * H
    db = L * cin * 2 + 2 * L * g4 * 2
    once = L * cin * 4 + 2 * L * g4 * 4
    fixed = wih_all.size * 2 + (stats.size * 2 + b_all.size + gamma.size
                                + beta.size) * 4
    tb = _pick_divisor_tile(B, db, once, fixed, vl)
    nb = B // tb
    kern = functools.partial(_bn_proj_kernel, count=count)
    return pl.pallas_call(
        kern,
        grid=(nb,),
        in_specs=[
            pl.BlockSpec((tb, L, cin), lambda i: (i, 0, 0)),
            _full_spec(stats.shape),
            _full_spec(gamma.shape),
            _full_spec(beta.shape),
            _full_spec(wih_all.shape),
            _full_spec(b_all.shape),
        ],
        out_specs=(
            pl.BlockSpec((tb, L, g4), lambda i: (i, 0, 0)),
            pl.BlockSpec((tb, L, g4), lambda i: (i, 0, 0)),
        ),
        out_shape=(jax.ShapeDtypeStruct((B, L, g4), BF16),
                   jax.ShapeDtypeStruct((B, L, g4), BF16)),
        compiler_params=_compiler(("parallel",), vl),
    )(y, stats, gamma, beta, wih_all, b_all)


# ----------------------------------------------------------------------------
# Kernel 4: bidirectional LSTM recurrence with the L-pool fused in.
# Grid = (time-block,), sequential.  Both directions run interleaved in one
# body (hides each chain's matmul/EUP latency); the backward direction is
# driven purely by index-map time reversal; only per-step means over L are
# written out (the full (B, L, 256) LSTM output never touches HBM).
# ----------------------------------------------------------------------------
def _bilstm_pool_kernel(gxf_ref, gxb_ref, whh_ref, pf_ref, pb_ref,
                        hf_ref, cf_ref, hb_ref, cb_ref):
    U, L, _ = gxf_ref.shape

    @pl.when(pl.program_id(0) == 0)
    def _():
        hf_ref[...] = jnp.zeros_like(hf_ref)
        cf_ref[...] = jnp.zeros_like(cf_ref)
        hb_ref[...] = jnp.zeros_like(hb_ref)
        cb_ref[...] = jnp.zeros_like(cb_ref)

    whh_f = whh_ref[0]                     # (H, 4H) bf16
    whh_b = whh_ref[1]

    # Carry h/c as SSA values across the unrolled block: one scratch read and
    # one scratch write per block instead of per step.
    hf, cf = hf_ref[...], cf_ref[...]
    hb, cb = hb_ref[...], cb_ref[...]

    def cell(gx_row, hprev, cprev, whh):
        gates = gx_row.astype(F32) + jnp.dot(hprev.astype(BF16), whh,
                                             preferred_element_type=F32)
        i_g = jax.nn.sigmoid(gates[:, 0 * H:1 * H])
        f_g = jax.nn.sigmoid(gates[:, 1 * H:2 * H])
        g_g = jnp.tanh(gates[:, 2 * H:3 * H])
        o_g = jax.nn.sigmoid(gates[:, 3 * H:4 * H])
        c = f_g * cprev + i_g * g_g
        h = o_g * jnp.tanh(c)
        return h, c

    inv_l = 1.0 / L
    pf_rows = [None] * U
    pb_rows = [None] * U
    for s in range(U):                     # static unroll; all indices static
        sb = U - 1 - s                     # bwd walks its block in reverse
        hf, cf = cell(gxf_ref[s], hf, cf, whh_f)
        hb, cb = cell(gxb_ref[sb], hb, cb, whh_b)
        pf_rows[s] = jnp.sum(hf, axis=0, keepdims=True) * inv_l   # mean over L
        pb_rows[sb] = jnp.sum(hb, axis=0, keepdims=True) * inv_l

    hf_ref[...], cf_ref[...] = hf, cf
    hb_ref[...], cb_ref[...] = hb, cb
    pf_ref[...] = jnp.concatenate(pf_rows, axis=0).reshape(U, 1, H)
    pb_ref[...] = jnp.concatenate(pb_rows, axis=0).reshape(U, 1, H)


def bilstm_pool_call(gxf, gxb, whh_stack, vl):
    T, L, g4 = gxf.shape
    db = 2 * L * g4 * 2 + 2 * H * 4
    once = 2 * L * g4 * 4                  # two f32 gate temporaries per step
    fixed = whh_stack.size * 2 + 4 * L * H * 4
    u = _pick_divisor_tile(T, db, once, fixed, vl, cap=16)
    nt = T // u
    return pl.pallas_call(
        _bilstm_pool_kernel,
        grid=(nt,),
        in_specs=[
            pl.BlockSpec((u, L, g4), lambda t: (t, 0, 0)),            # fwd
            pl.BlockSpec((u, L, g4), lambda t: (nt - 1 - t, 0, 0)),   # bwd
            _full_spec(whh_stack.shape),
        ],
        out_specs=(
            pl.BlockSpec((u, 1, H), lambda t: (t, 0, 0)),
            pl.BlockSpec((u, 1, H), lambda t: (nt - 1 - t, 0, 0)),
        ),
        out_shape=(jax.ShapeDtypeStruct((T, 1, H), F32),
                   jax.ShapeDtypeStruct((T, 1, H), F32)),
        scratch_shapes=[pltpu.VMEM((L, H), F32)] * 4,
        compiler_params=_compiler(("arbitrary",), vl),
    )(gxf, gxb, whh_stack)


# ----------------------------------------------------------------------------
# Kernel 5: decoder MLP on the pooled (B, 256) features (lane-dense output).
# ----------------------------------------------------------------------------
def _pool_decoder_kernel(pf_ref, pb_ref, w1f_ref, w1b_ref, b1_ref,
                         w2_ref, b2_ref, w3_ref, b3_ref, o_ref):
    tb = pf_ref.shape[0]
    pf = pf_ref[...].reshape(tb, H).astype(BF16)
    pb = pb_ref[...].reshape(tb, H).astype(BF16)
    h1 = (jnp.dot(pf, w1f_ref[...], preferred_element_type=F32)
          + jnp.dot(pb, w1b_ref[...], preferred_element_type=F32)
          + b1_ref[...])
    h1 = jnp.maximum(h1, 0.0)
    h2 = jnp.dot(h1.astype(BF16), w2_ref[...],
                 preferred_element_type=F32) + b2_ref[...]
    h2 = jnp.maximum(h2, 0.0)
    out = jnp.dot(h2.astype(BF16), w3_ref[...],
                  preferred_element_type=F32) + b3_ref[...]
    o_ref[...] = out.reshape(tb, 1, -1)


def pool_decoder_call(pf, pb, w1f, w1b, b1, w2, b2, w3, b3, vl):
    B = pf.shape[0]
    out_pad = w3.shape[1]
    db = 2 * H * 4 + out_pad * 4
    once = (256 + 512) * 4
    fixed = (w1f.size + w1b.size + w2.size + w3.size) * 2 \
        + (b1.size + b2.size + b3.size) * 4
    tb = _pick_divisor_tile(B, db, once, fixed, vl)
    nb = B // tb
    return pl.pallas_call(
        _pool_decoder_kernel,
        grid=(nb,),
        in_specs=[
            pl.BlockSpec((tb, 1, H), lambda i: (i, 0, 0)),
            pl.BlockSpec((tb, 1, H), lambda i: (i, 0, 0)),
            _full_spec(w1f.shape), _full_spec(w1b.shape), _full_spec(b1.shape),
            _full_spec(w2.shape), _full_spec(b2.shape),
            _full_spec(w3.shape), _full_spec(b3.shape),
        ],
        out_specs=pl.BlockSpec((tb, 1, out_pad), lambda i: (i, 0, 0)),
        out_shape=jax.ShapeDtypeStruct((B, 1, out_pad), F32),
        compiler_params=_compiler(("parallel",), vl),
    )(pf, pb, w1f, w1b, b1, w2, b2, w3, b3)


# ----------------------------------------------------------------------------
# Full forward pass (takes "prepared" params: packed / padded / bf16 weights)
# ----------------------------------------------------------------------------
@functools.partial(jax.jit, static_argnames=("out_size",))
def ts_prediction_forward(x, kp, *, out_size):
    B, L, _ = x.shape
    count = float(B * L)
    vl = _vmem_limit_bytes()

    # Conv stack with training-mode BN (stats over the full (B, L) extent).
    y, st = conv_stats_call(x, kp["conv0_w"], kp["conv0_b"], vl)
    for i in (1, 2):
        y, st = bn_conv_stats_call(y, st, kp[f"bn{i-1}_g"], kp[f"bn{i-1}_b"],
                                   kp[f"conv{i}_w"], kp[f"conv{i}_b"],
                                   count, vl)
    # Last BN fused with the hoisted bidirectional LSTM input projection.
    gxf, gxb = bn_proj_call(y, st, kp["bn2_g"], kp["bn2_b"],
                            kp["lstm_wih_all"], kp["lstm_b_all"], count, vl)
    # Bidirectional recurrence (B scanned as time, L as LSTM batch — same
    # semantics as the PyTorch batch_first=False call) with the pool over L
    # fused in; only (B, 2H) pooled means reach HBM.
    pf, pb = bilstm_pool_call(gxf, gxb, kp["lstm_whh_stack"], vl)
    # Decoder MLP (lane-dense padded output, sliced back to out_size here).
    out = pool_decoder_call(pf, pb,
                            kp["dec0_wf"], kp["dec0_wb"], kp["dec0_b"],
                            kp["dec1_w"], kp["dec1_b"],
                            kp["dec2_w"], kp["dec2_b"], vl)
    return out[:, 0, :out_size]


def prepare_params(p):
    """Pack / pad / cast the raw (PyTorch-style) f32 params for the kernels."""
    q = {}
    for i in range(3):
        w = p[f"conv{i}_w"]                                       # (3, cin, cout)
        q[f"conv{i}_w"] = w.reshape(-1, w.shape[2]).astype(BF16)  # (3*cin, cout)
        q[f"conv{i}_b"] = p[f"conv{i}_b"]
        q[f"bn{i}_g"] = p[f"bn{i}_g"]
        q[f"bn{i}_b"] = p[f"bn{i}_b"]
    # NOTE: lstm_*_b must already be b_ih + b_hh when converting real weights.
    q["lstm_wih_all"] = jnp.concatenate(
        [p["lstm_fwd_wih"], p["lstm_bwd_wih"]], axis=1).astype(BF16)   # (H, 8H)
    q["lstm_b_all"] = jnp.concatenate(
        [p["lstm_fwd_b"], p["lstm_bwd_b"]], axis=1)                     # (1, 8H)
    q["lstm_whh_stack"] = jnp.stack(
        [p["lstm_fwd_whh"], p["lstm_bwd_whh"]], axis=0).astype(BF16)    # (2,H,4H)
    q["dec0_wf"] = p["dec0_w"][:H].astype(BF16)
    q["dec0_wb"] = p["dec0_w"][H:].astype(BF16)
    q["dec0_b"] = p["dec0_b"]
    q["dec1_w"] = p["dec1_w"].astype(BF16)
    q["dec1_b"] = p["dec1_b"]
    out_size = p["dec2_w"].shape[1]
    out_pad = ((out_size + 127) // 128) * 128
    q["dec2_w"] = jnp.pad(p["dec2_w"],
                          ((0, 0), (0, out_pad - out_size))).astype(BF16)
    q["dec2_b"] = jnp.pad(p["dec2_b"], ((0, 0), (0, out_pad - out_size)))
    return q


# ----------------------------------------------------------------------------
# Pure-JAX f32 reference (PyTorch-faithful math) for a numerical sanity check
# ----------------------------------------------------------------------------
def reference_forward(x, p):
    h = x
    for i in range(3):
        B, L, _ = h.shape
        hpad = jnp.pad(h, ((0, 0), (1, 1), (0, 0)))
        w = p[f"conv{i}_w"]
        y = sum(jnp.einsum("blc,cd->bld", hpad[:, k:k + L, :], w[k])
                for k in range(3)) + p[f"conv{i}_b"]
        mean = jnp.mean(y, axis=(0, 1), keepdims=True)
        var = jnp.mean((y - mean) ** 2, axis=(0, 1), keepdims=True)
        h = (y - mean) * jax.lax.rsqrt(var + _BN_EPS) * p[f"bn{i}_g"] + p[f"bn{i}_b"]

    def lstm_dir(xx, wih, whh, bias):
        T, L, Hh = xx.shape
        hh = jnp.zeros((L, Hh), F32)
        cc = jnp.zeros((L, Hh), F32)
        outs = []
        for t in range(T):
            gates = xx[t] @ wih + hh @ whh + bias
            i_g = jax.nn.sigmoid(gates[:, :Hh])
            f_g = jax.nn.sigmoid(gates[:, Hh:2 * Hh])
            g_g = jnp.tanh(gates[:, 2 * Hh:3 * Hh])
            o_g = jax.nn.sigmoid(gates[:, 3 * Hh:])
            cc = f_g * cc + i_g * g_g
            hh = o_g * jnp.tanh(cc)
            outs.append(hh)
        return jnp.stack(outs, axis=0)

    hf = lstm_dir(h, p["lstm_fwd_wih"], p["lstm_fwd_whh"], p["lstm_fwd_b"])
    hb = jnp.flip(lstm_dir(jnp.flip(h, axis=0), p["lstm_bwd_wih"],
                           p["lstm_bwd_whh"], p["lstm_bwd_b"]), axis=0)
    out = jnp.concatenate([hf, hb], axis=-1)
    pooled = jnp.mean(out, axis=1)
    h1 = jnp.maximum(pooled @ p["dec0_w"] + p["dec0_b"], 0.0)
    h2 = jnp.maximum(h1 @ p["dec1_w"] + p["dec1_b"], 0.0)
    return h2 @ p["dec2_w"] + p["dec2_b"]


# ----------------------------------------------------------------------------
# Deterministic synthetic parameters (matching the module's shapes)
# ----------------------------------------------------------------------------
def init_params(key, out_size):
    p = {}
    conv_dims = [(out_size, 512), (512, 256), (256, 128)]
    for i, (cin, cout) in enumerate(conv_dims):
        key, k1, k2, k3, k4 = jax.random.split(key, 5)
        p[f"conv{i}_w"] = 0.05 * jax.random.normal(k1, (3, cin, cout), F32)
        p[f"conv{i}_b"] = 0.05 * jax.random.normal(k2, (1, cout), F32)
        p[f"bn{i}_g"] = 1.0 + 0.1 * jax.random.normal(k3, (1, cout), F32)
        p[f"bn{i}_b"] = 0.1 * jax.random.normal(k4, (1, cout), F32)
    for d in ("fwd", "bwd"):
        key, k1, k2, k3 = jax.random.split(key, 4)
        p[f"lstm_{d}_wih"] = 0.05 * jax.random.normal(k1, (H, 4 * H), F32)
        p[f"lstm_{d}_whh"] = 0.05 * jax.random.normal(k2, (H, 4 * H), F32)
        p[f"lstm_{d}_b"] = 0.05 * jax.random.normal(k3, (1, 4 * H), F32)  # b_ih+b_hh
    dec_dims = [(256, 256), (256, 512), (512, out_size)]
    for i, (din, dout) in enumerate(dec_dims):
        key, k1, k2 = jax.random.split(key, 3)
        p[f"dec{i}_w"] = 0.05 * jax.random.normal(k1, (din, dout), F32)
        p[f"dec{i}_b"] = 0.05 * jax.random.normal(k2, (1, dout), F32)
    return p


if __name__ == "__main__":
    out_size, B, L = 4, 2, 8
    key = jax.random.PRNGKey(0)
    key, kx = jax.random.split(key)
    params = init_params(key, out_size)
    x = jax.random.normal(kx, (B, L, out_size), dtype=F32)

    kparams = prepare_params(params)
    out = ts_prediction_forward(x, kparams, out_size=out_size)
    out = jax.block_until_ready(out)
    assert out.shape == (B, out_size), out.shape

    ref = reference_forward(x, params)
    # Kernels use bf16 MXU operands and bf16 inter-kernel activation storage
    # (f32 accumulation / state), hence the looser tolerance vs the pure-f32
    # reference.
    if not bool(jnp.allclose(out, ref, rtol=3e-2, atol=3e-2)):
        raise AssertionError(f"mismatch:\npallas={out}\nref={ref}")
    print("KERNEL_OK")
</pallas_src>

<mosaic_0001>
module attributes {stable_mosaic.version = 11 : i64} {
  func.func @_conv_stats_kernel(%arg0: i32, %arg1: memref<2x8x4xf32, #tpu.memory_space<vmem>>, %arg2: memref<12x512xbf16, #tpu.memory_space<vmem>>, %arg3: memref<1x512xf32, #tpu.memory_space<vmem>>, %arg4: memref<2x8x512xbf16, #tpu.memory_space<vmem>>, %arg5: memref<1x2x512xf32, #tpu.memory_space<vmem>>) attributes {dimension_semantics = [#tpu.dimension_semantics<parallel>], iteration_bounds = array<i64: 1>, scalar_prefetch = 0 : i64, scratch_operands = 0 : i64, tpu.core_type = #tpu.core_type<tc>, window_params = [{transform_indices = @transform_0, window_bounds = array<i64: 2, 8, 4>}, {pipeline_mode = #tpu.pipeline_mode<synchronous>, transform_indices = @transform_1, window_bounds = array<i64: 12, 512>}, {pipeline_mode = #tpu.pipeline_mode<synchronous>, transform_indices = @transform_2, window_bounds = array<i64: 1, 512>}, {transform_indices = @transform_3, window_bounds = array<i64: 2, 8, 512>}, {transform_indices = @transform_4, window_bounds = array<i64: 1, 2, 512>}]} {
    %c0 = arith.constant 0 : index
    %c0_0 = arith.constant 0 : index
    %c0_1 = arith.constant 0 : index
    %0 = vector.load %arg1[%c0, %c0_0, %c0_1] : memref<2x8x4xf32, #tpu.memory_space<vmem>>, vector<2x8x4xf32>
    %1 = arith.truncf %0 : vector<2x8x4xf32> to vector<2x8x4xbf16>
    %cst = arith.constant 0.000000e+00 : bf16
    %2 = vector.broadcast %cst : bf16 to vector<2x1x4xbf16>
    %3 = tpu.concatenate %2, %1, %2 in 1 : vector<2x1x4xbf16>, vector<2x8x4xbf16>, vector<2x1x4xbf16> -> vector<2x10x4xbf16>
    %4 = vector.extract_strided_slice %3 {offsets = [0, 0, 0], sizes = [2, 8, 4], strides = [1, 1, 1]} : vector<2x10x4xbf16> to vector<2x8x4xbf16>
    %5 = vector.extract_strided_slice %3 {offsets = [0, 1, 0], sizes = [2, 8, 4], strides = [1, 1, 1]} : vector<2x10x4xbf16> to vector<2x8x4xbf16>
    %6 = vector.extract_strided_slice %3 {offsets = [0, 2, 0], sizes = [2, 8, 4], strides = [1, 1, 1]} : vector<2x10x4xbf16> to vector<2x8x4xbf16>
    %c0_2 = arith.constant 0 : index
    %c0_3 = arith.constant 0 : index
    %7 = vector.load %arg2[%c0_2, %c0_3] : memref<12x512xbf16, #tpu.memory_space<vmem>>, vector<12x512xbf16>
    %cst_4 = arith.constant 0.000000e+00 : f32
    %8 = vector.broadcast %cst_4 : f32 to vector<16x512xf32>
    %9 = vector.shape_cast %4 : vector<2x8x4xbf16> to vector<16x4xbf16>
    %10 = vector.extract_strided_slice %7 {offsets = [0, 0], sizes = [4, 512], strides = [1, 1]} : vector<12x512xbf16> to vector<4x512xbf16>
    %cst_5 = arith.constant dense<0.000000e+00> : vector<16x512xf32>
    %11 = tpu.matmul %9, %10, %cst_5 {dimension_numbers = #tpu.dot_dimension_numbers<[1], [0], [0], [1], [0, 0, 1, 1], [], []>} : vector<16x4xbf16>, vector<4x512xbf16>, vector<16x512xf32> -> vector<16x512xf32>
    %12 = arith.addf %8, %11 : vector<16x512xf32>
    %13 = vector.shape_cast %5 : vector<2x8x4xbf16> to vector<16x4xbf16>
    %14 = vector.extract_strided_slice %7 {offsets = [4, 0], sizes = [4, 512], strides = [1, 1]} : vector<12x512xbf16> to vector<4x512xbf16>
    %cst_6 = arith.constant dense<0.000000e+00> : vector<16x512xf32>
    %15 = tpu.matmul %13, %14, %cst_6 {dimension_numbers = #tpu.dot_dimension_numbers<[1], [0], [0], [1], [0, 0, 1, 1], [], []>} : vector<16x4xbf16>, vector<4x512xbf16>, vector<16x512xf32> -> vector<16x512xf32>
    %16 = arith.addf %12, %15 : vector<16x512xf32>
    %17 = vector.shape_cast %6 : vector<2x8x4xbf16> to vector<16x4xbf16>
    %18 = vector.extract_strided_slice %7 {offsets = [8, 0], sizes = [4, 512], strides = [1, 1]} : vector<12x512xbf16> to vector<4x512xbf16>
    %cst_7 = arith.constant dense<0.000000e+00> : vector<16x512xf32>
    %19 = tpu.matmul %17, %18, %cst_7 {dimension_numbers = #tpu.dot_dimension_numbers<[1], [0], [0], [1], [0, 0, 1, 1], [], []>} : vector<16x4xbf16>, vector<4x512xbf16>, vector<16x512xf32> -> vector<16x512xf32>
    %20 = arith.addf %16, %19 : vector<16x512xf32>
    %c0_8 = arith.constant 0 : index
    %c0_9 = arith.constant 0 : index
    %21 = vector.load %arg3[%c0_8, %c0_9] : memref<1x512xf32, #tpu.memory_space<vmem>>, vector<1x512xf32>
    %22 = vector.broadcast %21 : vector<1x512xf32> to vector<16x512xf32>
    %23 = arith.addf %20, %22 : vector<16x512xf32>
    %cst_10 = arith.constant dense<0.000000e+00> : vector<512xf32>
    %24 = vector.multi_reduction <add>, %23, %cst_10 [0] : vector<16x512xf32> to vector<512xf32>
    %25 = vector.shape_cast %24 : vector<512xf32> to vector<1x512xf32>
    %26 = arith.mulf %23, %23 : vector<16x512xf32>
    %cst_11 = arith.constant dense<0.000000e+00> : vector<512xf32>
    %27 = vector.multi_reduction <add>, %26, %cst_11 [0] : vector<16x512xf32> to vector<512xf32>
    %28 = vector.shape_cast %27 : vector<512xf32> to vector<1x512xf32>
    %29 = tpu.concatenate %25, %28 in 0 : vector<1x512xf32>, vector<1x512xf32> -> vector<2x512xf32>
    %30 = vector.shape_cast %29 : vector<2x512xf32> to vector<1x2x512xf32>
    %c0_12 = arith.constant 0 : index
    %c0_13 = arith.constant 0 : index
    %c0_14 = arith.constant 0 : index
    %31 = vector.load %arg5[%c0_12, %c0_13, %c0_14] : memref<1x2x512xf32, #tpu.memory_space<vmem>>, vector<1x2x512xf32>
    tpu.vector_store %arg5[%c0_12, %c0_13, %c0_14], %30 {strides = array<i32>} : memref<1x2x512xf32, #tpu.memory_space<vmem>>, vector<1x2x512xf32>,
    %32 = vector.shape_cast %23 : vector<16x512xf32> to vector<2x8x512xf32>
    %33 = arith.truncf %32 : vector<2x8x512xf32> to vector<2x8x512xbf16>
    %c0_15 = arith.constant 0 : index
    %c0_16 = arith.constant 0 : index
    %c0_17 = arith.constant 0 : index
    %34 = vector.load %arg4[%c0_15, %c0_16, %c0_17] : memref<2x8x512xbf16, #tpu.memory_space<vmem>>, vector<2x8x512xbf16>
    tpu.vector_store %arg4[%c0_15, %c0_16, %c0_17], %33 {strides = array<i32>} : memref<2x8x512xbf16, #tpu.memory_space<vmem>>, vector<2x8x512xbf16>,
    return
  }
  func.func @transform_0(%arg0: i32) -> (i32, i32, i32) {
    %c0_i32 = arith.constant 0 : i32
    %c0_i32_0 = arith.constant 0 : i32
    %c0_i32_1 = arith.constant 0 : i32
    return %arg0, %c0_i32, %c0_i32_0 : i32, i32, i32
  }
  func.func @transform_1(%arg0: i32) -> (i32, i32) {
    %c0_i32 = arith.constant 0 : i32
    %c0_i32_0 = arith.constant 0 : i32
    %c0_i32_1 = arith.constant 0 : i32
    return %c0_i32, %c0_i32_0 : i32, i32
  }
  func.func @transform_2(%arg0: i32) -> (i32, i32) {
    %c0_i32 = arith.constant 0 : i32
    %c0_i32_0 = arith.constant 0 : i32
    %c0_i32_1 = arith.constant 0 : i32
    return %c0_i32, %c0_i32_0 : i32, i32
  }
  func.func @transform_3(%arg0: i32) -> (i32, i32, i32) {
    %c0_i32 = arith.constant 0 : i32
    %c0_i32_0 = arith.constant 0 : i32
    %c0_i32_1 = arith.constant 0 : i32
    return %arg0, %c0_i32, %c0_i32_0 : i32, i32, i32
  }
  func.func @transform_4(%arg0: i32) -> (i32, i32, i32) {
    %c0_i32 = arith.constant 0 : i32
    %c0_i32_0 = arith.constant 0 : i32
    %c0_i32_1 = arith.constant 0 : i32
    return %arg0, %c0_i32, %c0_i32_0 : i32, i32, i32
  }
}

module attributes {stable_mosaic.version = 11 : i64} {
  func.func @_bn_conv_stats_kernel(%arg0: i32, %arg1: memref<2x8x256xbf16, #tpu.memory_space<vmem>>, %arg2: memref<1x2x256xf32, #tpu.memory_space<vmem>>, %arg3: memref<1x256xf32, #tpu.memory_space<vmem>>, %arg4: memref<1x256xf32, #tpu.memory_space<vmem>>, %arg5: memref<768x128xbf16, #tpu.memory_space<vmem>>, %arg6: memref<1x128xf32, #tpu.memory_space<vmem>>, %arg7: memref<2x8x128xbf16, #tpu.memory_space<vmem>>, %arg8: memref<1x2x128xf32, #tpu.memory_space<vmem>>) attributes {dimension_semantics = [#tpu.dimension_semantics<parallel>], iteration_bounds = array<i64: 1>, scalar_prefetch = 0 : i64, scratch_operands = 0 : i64, tpu.core_type = #tpu.core_type<tc>, window_params = [{transform_indices = @transform_0, window_bounds = array<i64: 2, 8, 256>}, {pipeline_mode = #tpu.pipeline_mode<synchronous>, transform_indices = @transform_1, window_bounds = array<i64: 1, 2, 256>}, {pipeline_mode = #tpu.pipeline_mode<synchronous>, transform_indices = @transform_2, window_bounds = array<i64: 1, 256>}, {pipeline_mode = #tpu.pipeline_mode<synchronous>, transform_indices = @transform_3, window_bounds = array<i64: 1, 256>}, {pipeline_mode = #tpu.pipeline_mode<synchronous>, transform_indices = @transform_4, window_bounds = array<i64: 768, 128>}, {pipeline_mode = #tpu.pipeline_mode<synchronous>, transform_indices = @transform_5, window_bounds = array<i64: 1, 128>}, {transform_indices = @transform_6, window_bounds = array<i64: 2, 8, 128>}, {transform_indices = @transform_7, window_bounds = array<i64: 1, 2, 128>}]} {
    %c0 = arith.constant 0 : index
    %c0_0 = arith.constant 0 : index
    %c0_1 = arith.constant 0 : index
    %0 = vector.load %arg2[%c0, %c0_0, %c0_1] : memref<1x2x256xf32, #tpu.memory_space<vmem>>, vector<1x2x256xf32>
    %cst = arith.constant dense<0.000000e+00> : vector<2x256xf32>
    %1 = vector.multi_reduction <add>, %0, %cst [0] : vector<1x2x256xf32> to vector<2x256xf32>
    %2 = vector.extract_strided_slice %1 {offsets = [0, 0], sizes = [1, 256], strides = [1, 1]} : vector<2x256xf32> to vector<1x256xf32>
    %cst_2 = arith.constant 6.250000e-02 : f32
    %3 = vector.broadcast %cst_2 : f32 to vector<1x256xf32>
    %4 = arith.mulf %2, %3 : vector<1x256xf32>
    %5 = vector.extract_strided_slice %1 {offsets = [1, 0], sizes = [1, 256], strides = [1, 1]} : vector<2x256xf32> to vector<1x256xf32>
    %cst_3 = arith.constant 6.250000e-02 : f32
    %6 = vector.broadcast %cst_3 : f32 to vector<1x256xf32>
    %7 = arith.mulf %5, %6 : vector<1x256xf32>
    %8 = arith.mulf %4, %4 : vector<1x256xf32>
    %9 = arith.subf %7, %8 : vector<1x256xf32>
    %cst_4 = arith.constant 0.000000e+00 : f32
    %10 = vector.broadcast %cst_4 : f32 to vector<1x256xf32>
    %11 = arith.maximumf %9, %10 : vector<1x256xf32>
    %c0_5 = arith.constant 0 : index
    %c0_6 = arith.constant 0 : index
    %12 = vector.load %arg3[%c0_5, %c0_6] : memref<1x256xf32, #tpu.memory_space<vmem>>, vector<1x256xf32>
    %cst_7 = arith.constant 9.99999974E-6 : f32
    %13 = vector.broadcast %cst_7 : f32 to vector<1x256xf32>
    %14 = arith.addf %11, %13 : vector<1x256xf32>
    %15 = math.rsqrt %14 : vector<1x256xf32>
    %16 = arith.mulf %12, %15 : vector<1x256xf32>
    %c0_8 = arith.constant 0 : index
    %c0_9 = arith.constant 0 : index
    %17 = vector.load %arg4[%c0_8, %c0_9] : memref<1x256xf32, #tpu.memory_space<vmem>>, vector<1x256xf32>
    %18 = arith.mulf %4, %16 : vector<1x256xf32>
    %19 = arith.subf %17, %18 : vector<1x256xf32>
    %c0_10 = arith.constant 0 : index
    %c0_11 = arith.constant 0 : index
    %c0_12 = arith.constant 0 : index
    %20 = vector.load %arg1[%c0_10, %c0_11, %c0_12] : memref<2x8x256xbf16, #tpu.memory_space<vmem>>, vector<2x8x256xbf16>
    %21 = arith.extf %20 : vector<2x8x256xbf16> to vector<2x8x256xf32>
    %22 = vector.shape_cast %16 : vector<1x256xf32> to vector<1x1x256xf32>
    %23 = vector.broadcast %22 : vector<1x1x256xf32> to vector<2x8x256xf32>
    %24 = arith.mulf %21, %23 : vector<2x8x256xf32>
    %25 = vector.shape_cast %19 : vector<1x256xf32> to vector<1x1x256xf32>
    %26 = vector.broadcast %25 : vector<1x1x256xf32> to vector<2x8x256xf32>
    %27 = arith.addf %24, %26 : vector<2x8x256xf32>
    %28 = arith.truncf %27 : vector<2x8x256xf32> to vector<2x8x256xbf16>
    %cst_13 = arith.constant 0.000000e+00 : bf16
    %29 = vector.broadcast %cst_13 : bf16 to vector<2x1x256xbf16>
    %30 = tpu.concatenate %29, %28, %29 in 1 : vector<2x1x256xbf16>, vector<2x8x256xbf16>, vector<2x1x256xbf16> -> vector<2x10x256xbf16>
    %31 = vector.extract_strided_slice %30 {offsets = [0, 0, 0], sizes = [2, 8, 256], strides = [1, 1, 1]} : vector<2x10x256xbf16> to vector<2x8x256xbf16>
    %32 = vector.extract_strided_slice %30 {offsets = [0, 1, 0], sizes = [2, 8, 256], strides = [1, 1, 1]} : vector<2x10x256xbf16> to vector<2x8x256xbf16>
    %33 = vector.extract_strided_slice %30 {offsets = [0, 2, 0], sizes = [2, 8, 256], strides = [1, 1, 1]} : vector<2x10x256xbf16> to vector<2x8x256xbf16>
    %34 = tpu.concatenate %31, %32, %33 in 2 : vector<2x8x256xbf16>, vector<2x8x256xbf16>, vector<2x8x256xbf16> -> vector<2x8x768xbf16>
    %35 = vector.shape_cast %34 : vector<2x8x768xbf16> to vector<16x768xbf16>
    %c0_14 = arith.constant 0 : index
    %c0_15 = arith.constant 0 : index
    %36 = vector.load %arg5[%c0_14, %c0_15] : memref<768x128xbf16, #tpu.memory_space<vmem>>, vector<768x128xbf16>
    %cst_16 = arith.constant dense<0.000000e+00> : vector<16x128xf32>
    %37 = tpu.matmul %35, %36, %cst_16 {dimension_numbers = #tpu.dot_dimension_numbers<[1], [0], [0], [1], [0, 0, 1, 1], [], []>} : vector<16x768xbf16>, vector<768x128xbf16>, vector<16x128xf32> -> vector<16x128xf32>
    %c0_17 = arith.constant 0 : index
    %c0_18 = arith.constant 0 : index
    %38 = vector.load %arg6[%c0_17, %c0_18] : memref<1x128xf32, #tpu.memory_space<vmem>>, vector<1x128xf32>
    %39 = vector.broadcast %38 : vector<1x128xf32> to vector<16x128xf32>
    %40 = arith.addf %37, %39 : vector<16x128xf32>
    %cst_19 = arith.constant dense<0.000000e+00> : vector<128xf32>
    %41 = vector.multi_reduction <add>, %40, %cst_19 [0] : vector<16x128xf32> to vector<128xf32>
    %42 = vector.shape_cast %41 : vector<128xf32> to vector<1x128xf32>
    %43 = arith.mulf %40, %40 : vector<16x128xf32>
    %cst_20 = arith.constant dense<0.000000e+00> : vector<128xf32>
    %44 = vector.multi_reduction <add>, %43, %cst_20 [0] : vector<16x128xf32> to vector<128xf32>
    %45 = vector.shape_cast %44 : vector<128xf32> to vector<1x128xf32>
    %46 = tpu.concatenate %42, %45 in 0 : vector<1x128xf32>, vector<1x128xf32> -> vector<2x128xf32>
    %47 = vector.shape_cast %46 : vector<2x128xf32> to vector<1x2x128xf32>
    %c0_21 = arith.constant 0 : index
    %c0_22 = arith.constant 0 : index
    %c0_23 = arith.constant 0 : index
    %48 = vector.load %arg8[%c0_21, %c0_22, %c0_23] : memref<1x2x128xf32, #tpu.memory_space<vmem>>, vector<1x2x128xf32>
    tpu.vector_store %arg8[%c0_21, %c0_22, %c0_23], %47 {strides = array<i32>} : memref<1x2x128xf32, #tpu.memory_space<vmem>>, vector<1x2x128xf32>,
    %49 = vector.shape_cast %40 : vector<16x128xf32> to vector<2x8x128xf32>
    %50 = arith.truncf %49 : vector<2x8x128xf32> to vector<2x8x128xbf16>
    %c0_24 = arith.constant 0 : index
    %c0_25 = arith.constant 0 : index
    %c0_26 = arith.constant 0 : index
    %51 = vector.load %arg7[%c0_24, %c0_25, %c0_26] : memref<2x8x128xbf16, #tpu.memory_space<vmem>>, vector<2x8x128xbf16>
    tpu.vector_store %arg7[%c0_24, %c0_25, %c0_26], %50 {strides = array<i32>} : memref<2x8x128xbf16, #tpu.memory_space<vmem>>, vector<2x8x128xbf16>,
    return
  }
  func.func @transform_0(%arg0: i32) -> (i32, i32, i32) {
    %c0_i32 = arith.constant 0 : i32
    %c0_i32_0 = arith.constant 0 : i32
    %c0_i32_1 = arith.constant 0 : i32
    return %arg0, %c0_i32, %c0_i32_0 : i32, i32, i32
  }
  func.func @transform_1(%arg0: i32) -> (i32, i32, i32) {
    %c0_i32 = arith.constant 0 : i32
    %c0_i32_0 = arith.constant 0 : i32
    %c0_i32_1 = arith.constant 0 : i32
    %c0_i32_2 = arith.constant 0 : i32
    return %c0_i32, %c0_i32_0, %c0_i32_1 : i32, i32, i32
  }
  func.func @transform_2(%arg0: i32) -> (i32, i32) {
    %c0_i32 = arith.constant 0 : i32
    %c0_i32_0 = arith.constant 0 : i32
    %c0_i32_1 = arith.constant 0 : i32
    return %c0_i32, %c0_i32_0 : i32, i32
  }
  func.func @transform_3(%arg0: i32) -> (i32, i32) {
    %c0_i32 = arith.constant 0 : i32
    %c0_i32_0 = arith.constant 0 : i32
    %c0_i32_1 = arith.constant 0 : i32
    return %c0_i32, %c0_i32_0 : i32, i32
  }
  func.func @transform_4(%arg0: i32) -> (i32, i32) {
    %c0_i32 = arith.constant 0 : i32
    %c0_i32_0 = arith.constant 0 : i32
    %c0_i32_1 = arith.constant 0 : i32
    return %c0_i32, %c0_i32_0 : i32, i32
  }
  func.func @transform_5(%arg0: i32) -> (i32, i32) {
    %c0_i32 = arith.constant 0 : i32
    %c0_i32_0 = arith.constant 0 : i32
    %c0_i32_1 = arith.constant 0 : i32
    return %c0_i32, %c0_i32_0 : i32, i32
  }
  func.func @transform_6(%arg0: i32) -> (i32, i32, i32) {
    %c0_i32 = arith.constant 0 : i32
    %c0_i32_0 = arith.constant 0 : i32
    %c0_i32_1 = arith.constant 0 : i32
    return %arg0, %c0_i32, %c0_i32_0 : i32, i32, i32
  }
  func.func @transform_7(%arg0: i32) -> (i32, i32, i32) {
    %c0_i32 = arith.constant 0 : i32
    %c0_i32_0 = arith.constant 0 : i32
    %c0_i32_1 = arith.constant 0 : i32
    return %arg0, %c0_i32, %c0_i32_0 : i32, i32, i32
  }
}

module attributes {stable_mosaic.version = 11 : i64} {
  func.func @_bn_conv_stats_kernel(%arg0: i32, %arg1: memref<2x8x512xbf16, #tpu.memory_space<vmem>>, %arg2: memref<1x2x512xf32, #tpu.memory_space<vmem>>, %arg3: memref<1x512xf32, #tpu.memory_space<vmem>>, %arg4: memref<1x512xf32, #tpu.memory_space<vmem>>, %arg5: memref<1536x256xbf16, #tpu.memory_space<vmem>>, %arg6: memref<1x256xf32, #tpu.memory_space<vmem>>, %arg7: memref<2x8x256xbf16, #tpu.memory_space<vmem>>, %arg8: memref<1x2x256xf32, #tpu.memory_space<vmem>>) attributes {dimension_semantics = [#tpu.dimension_semantics<parallel>], iteration_bounds = array<i64: 1>, scalar_prefetch = 0 : i64, scratch_operands = 0 : i64, tpu.core_type = #tpu.core_type<tc>, window_params = [{transform_indices = @transform_0, window_bounds = array<i64: 2, 8, 512>}, {pipeline_mode = #tpu.pipeline_mode<synchronous>, transform_indices = @transform_1, window_bounds = array<i64: 1, 2, 512>}, {pipeline_mode = #tpu.pipeline_mode<synchronous>, transform_indices = @transform_2, window_bounds = array<i64: 1, 512>}, {pipeline_mode = #tpu.pipeline_mode<synchronous>, transform_indices = @transform_3, window_bounds = array<i64: 1, 512>}, {pipeline_mode = #tpu.pipeline_mode<synchronous>, transform_indices = @transform_4, window_bounds = array<i64: 1536, 256>}, {pipeline_mode = #tpu.pipeline_mode<synchronous>, transform_indices = @transform_5, window_bounds = array<i64: 1, 256>}, {transform_indices = @transform_6, window_bounds = array<i64: 2, 8, 256>}, {transform_indices = @transform_7, window_bounds = array<i64: 1, 2, 256>}]} {
    %c0 = arith.constant 0 : index
    %c0_0 = arith.constant 0 : index
    %c0_1 = arith.constant 0 : index
    %0 = vector.load %arg2[%c0, %c0_0, %c0_1] : memref<1x2x512xf32, #tpu.memory_space<vmem>>, vector<1x2x512xf32>
    %cst = arith.constant dense<0.000000e+00> : vector<2x512xf32>
    %1 = vector.multi_reduction <add>, %0, %cst [0] : vector<1x2x512xf32> to vector<2x512xf32>
    %2 = vector.extract_strided_slice %1 {offsets = [0, 0], sizes = [1, 512], strides = [1, 1]} : vector<2x512xf32> to vector<1x512xf32>
    %cst_2 = arith.constant 6.250000e-02 : f32
    %3 = vector.broadcast %cst_2 : f32 to vector<1x512xf32>
    %4 = arith.mulf %2, %3 : vector<1x512xf32>
    %5 = vector.extract_strided_slice %1 {offsets = [1, 0], sizes = [1, 512], strides = [1, 1]} : vector<2x512xf32> to vector<1x512xf32>
    %cst_3 = arith.constant 6.250000e-02 : f32
    %6 = vector.broadcast %cst_3 : f32 to vector<1x512xf32>
    %7 = arith.mulf %5, %6 : vector<1x512xf32>
    %8 = arith.mulf %4, %4 : vector<1x512xf32>
    %9 = arith.subf %7, %8 : vector<1x512xf32>
    %cst_4 = arith.constant 0.000000e+00 : f32
    %10 = vector.broadcast %cst_4 : f32 to vector<1x512xf32>
    %11 = arith.maximumf %9, %10 : vector<1x512xf32>
    %c0_5 = arith.constant 0 : index
    %c0_6 = arith.constant 0 : index
    %12 = vector.load %arg3[%c0_5, %c0_6] : memref<1x512xf32, #tpu.memory_space<vmem>>, vector<1x512xf32>
    %cst_7 = arith.constant 9.99999974E-6 : f32
    %13 = vector.broadcast %cst_7 : f32 to vector<1x512xf32>
    %14 = arith.addf %11, %13 : vector<1x512xf32>
    %15 = math.rsqrt %14 : vector<1x512xf32>
    %16 = arith.mulf %12, %15 : vector<1x512xf32>
    %c0_8 = arith.constant 0 : index
    %c0_9 = arith.constant 0 : index
    %17 = vector.load %arg4[%c0_8, %c0_9] : memref<1x512xf32, #tpu.memory_space<vmem>>, vector<1x512xf32>
    %18 = arith.mulf %4, %16 : vector<1x512xf32>
    %19 = arith.subf %17, %18 : vector<1x512xf32>
    %c0_10 = arith.constant 0 : index
    %c0_11 = arith.constant 0 : index
    %c0_12 = arith.constant 0 : index
    %20 = vector.load %arg1[%c0_10, %c0_11, %c0_12] : memref<2x8x512xbf16, #tpu.memory_space<vmem>>, vector<2x8x512xbf16>
    %21 = arith.extf %20 : vector<2x8x512xbf16> to vector<2x8x512xf32>
    %22 = vector.shape_cast %16 : vector<1x512xf32> to vector<1x1x512xf32>
    %23 = vector.broadcast %22 : vector<1x1x512xf32> to vector<2x8x512xf32>
    %24 = arith.mulf %21, %23 : vector<2x8x512xf32>
    %25 = vector.shape_cast %19 : vector<1x512xf32> to vector<1x1x512xf32>
    %26 = vector.broadcast %25 : vector<1x1x512xf32> to vector<2x8x512xf32>
    %27 = arith.addf %24, %26 : vector<2x8x512xf32>
    %28 = arith.truncf %27 : vector<2x8x512xf32> to vector<2x8x512xbf16>
    %cst_13 = arith.constant 0.000000e+00 : bf16
    %29 = vector.broadcast %cst_13 : bf16 to vector<2x1x512xbf16>
    %30 = tpu.concatenate %29, %28, %29 in 1 : vector<2x1x512xbf16>, vector<2x8x512xbf16>, vector<2x1x512xbf16> -> vector<2x10x512xbf16>
    %31 = vector.extract_strided_slice %30 {offsets = [0, 0, 0], sizes = [2, 8, 512], strides = [1, 1, 1]} : vector<2x10x512xbf16> to vector<2x8x512xbf16>
    %32 = vector.extract_strided_slice %30 {offsets = [0, 1, 0], sizes = [2, 8, 512], strides = [1, 1, 1]} : vector<2x10x512xbf16> to vector<2x8x512xbf16>
    %33 = vector.extract_strided_slice %30 {offsets = [0, 2, 0], sizes = [2, 8, 512], strides = [1, 1, 1]} : vector<2x10x512xbf16> to vector<2x8x512xbf16>
    %34 = tpu.concatenate %31, %32, %33 in 2 : vector<2x8x512xbf16>, vector<2x8x512xbf16>, vector<2x8x512xbf16> -> vector<2x8x1536xbf16>
    %35 = vector.shape_cast %34 : vector<2x8x1536xbf16> to vector<16x1536xbf16>
    %c0_14 = arith.constant 0 : index
    %c0_15 = arith.constant 0 : index
    %36 = vector.load %arg5[%c0_14, %c0_15] : memref<1536x256xbf16, #tpu.memory_space<vmem>>, vector<1536x256xbf16>
    %cst_16 = arith.constant dense<0.000000e+00> : vector<16x256xf32>
    %37 = tpu.matmul %35, %36, %cst_16 {dimension_numbers = #tpu.dot_dimension_numbers<[1], [0], [0], [1], [0, 0, 1, 1], [], []>} : vector<16x1536xbf16>, vector<1536x256xbf16>, vector<16x256xf32> -> vector<16x256xf32>
    %c0_17 = arith.constant 0 : index
    %c0_18 = arith.constant 0 : index
    %38 = vector.load %arg6[%c0_17, %c0_18] : memref<1x256xf32, #tpu.memory_space<vmem>>, vector<1x256xf32>
    %39 = vector.broadcast %38 : vector<1x256xf32> to vector<16x256xf32>
    %40 = arith.addf %37, %39 : vector<16x256xf32>
    %cst_19 = arith.constant dense<0.000000e+00> : vector<256xf32>
    %41 = vector.multi_reduction <add>, %40, %cst_19 [0] : vector<16x256xf32> to vector<256xf32>
    %42 = vector.shape_cast %41 : vector<256xf32> to vector<1x256xf32>
    %43 = arith.mulf %40, %40 : vector<16x256xf32>
    %cst_20 = arith.constant dense<0.000000e+00> : vector<256xf32>
    %44 = vector.multi_reduction <add>, %43, %cst_20 [0] : vector<16x256xf32> to vector<256xf32>
    %45 = vector.shape_cast %44 : vector<256xf32> to vector<1x256xf32>
    %46 = tpu.concatenate %42, %45 in 0 : vector<1x256xf32>, vector<1x256xf32> -> vector<2x256xf32>
    %47 = vector.shape_cast %46 : vector<2x256xf32> to vector<1x2x256xf32>
    %c0_21 = arith.constant 0 : index
    %c0_22 = arith.constant 0 : index
    %c0_23 = arith.constant 0 : index
    %48 = vector.load %arg8[%c0_21, %c0_22, %c0_23] : memref<1x2x256xf32, #tpu.memory_space<vmem>>, vector<1x2x256xf32>
    tpu.vector_store %arg8[%c0_21, %c0_22, %c0_23], %47 {strides = array<i32>} : memref<1x2x256xf32, #tpu.memory_space<vmem>>, vector<1x2x256xf32>,
    %49 = vector.shape_cast %40 : vector<16x256xf32> to vector<2x8x256xf32>
    %50 = arith.truncf %49 : vector<2x8x256xf32> to vector<2x8x256xbf16>
    %c0_24 = arith.constant 0 : index
    %c0_25 = arith.constant 0 : index
    %c0_26 = arith.constant 0 : index
    %51 = vector.load %arg7[%c0_24, %c0_25, %c0_26] : memref<2x8x256xbf16, #tpu.memory_space<vmem>>, vector<2x8x256xbf16>
    tpu.vector_store %arg7[%c0_24, %c0_25, %c0_26], %50 {strides = array<i32>} : memref<2x8x256xbf16, #tpu.memory_space<vmem>>, vector<2x8x256xbf16>,
    return
  }
  func.func @transform_0(%arg0: i32) -> (i32, i32, i32) {
    %c0_i32 = arith.constant 0 : i32
    %c0_i32_0 = arith.constant 0 : i32
    %c0_i32_1 = arith.constant 0 : i32
    return %arg0, %c0_i32, %c0_i32_0 : i32, i32, i32
  }
  func.func @transform_1(%arg0: i32) -> (i32, i32, i32) {
    %c0_i32 = arith.constant 0 : i32
    %c0_i32_0 = arith.constant 0 : i32
    %c0_i32_1 = arith.constant 0 : i32
    %c0_i32_2 = arith.constant 0 : i32
    return %c0_i32, %c0_i32_0, %c0_i32_1 : i32, i32, i32
  }
  func.func @transform_2(%arg0: i32) -> (i32, i32) {
    %c0_i32 = arith.constant 0 : i32
    %c0_i32_0 = arith.constant 0 : i32
    %c0_i32_1 = arith.constant 0 : i32
    return %c0_i32, %c0_i32_0 : i32, i32
  }
  func.func @transform_3(%arg0: i32) -> (i32, i32) {
    %c0_i32 = arith.constant 0 : i32
    %c0_i32_0 = arith.constant 0 : i32
    %c0_i32_1 = arith.constant 0 : i32
    return %c0_i32, %c0_i32_0 : i32, i32
  }
  func.func @transform_4(%arg0: i32) -> (i32, i32) {
    %c0_i32 = arith.constant 0 : i32
    %c0_i32_0 = arith.constant 0 : i32
    %c0_i32_1 = arith.constant 0 : i32
    return %c0_i32, %c0_i32_0 : i32, i32
  }
  func.func @transform_5(%arg0: i32) -> (i32, i32) {
    %c0_i32 = arith.constant 0 : i32
    %c0_i32_0 = arith.constant 0 : i32
    %c0_i32_1 = arith.constant 0 : i32
    return %c0_i32, %c0_i32_0 : i32, i32
  }
  func.func @transform_6(%arg0: i32) -> (i32, i32, i32) {
    %c0_i32 = arith.constant 0 : i32
    %c0_i32_0 = arith.constant 0 : i32
    %c0_i32_1 = arith.constant 0 : i32
    return %arg0, %c0_i32, %c0_i32_0 : i32, i32, i32
  }
  func.func @transform_7(%arg0: i32) -> (i32, i32, i32) {
    %c0_i32 = arith.constant 0 : i32
    %c0_i32_0 = arith.constant 0 : i32
    %c0_i32_1 = arith.constant 0 : i32
    return %arg0, %c0_i32, %c0_i32_0 : i32, i32, i32
  }
}

module attributes {stable_mosaic.version = 11 : i64} {
  func.func @_bn_proj_kernel(%arg0: i32, %arg1: memref<2x8x128xbf16, #tpu.memory_space<vmem>>, %arg2: memref<1x2x128xf32, #tpu.memory_space<vmem>>, %arg3: memref<1x128xf32, #tpu.memory_space<vmem>>, %arg4: memref<1x128xf32, #tpu.memory_space<vmem>>, %arg5: memref<128x1024xbf16, #tpu.memory_space<vmem>>, %arg6: memref<1x1024xf32, #tpu.memory_space<vmem>>, %arg7: memref<2x8x512xbf16, #tpu.memory_space<vmem>>, %arg8: memref<2x8x512xbf16, #tpu.memory_space<vmem>>) attributes {dimension_semantics = [#tpu.dimension_semantics<parallel>], iteration_bounds = array<i64: 1>, scalar_prefetch = 0 : i64, scratch_operands = 0 : i64, tpu.core_type = #tpu.core_type<tc>, window_params = [{transform_indices = @transform_0, window_bounds = array<i64: 2, 8, 128>}, {pipeline_mode = #tpu.pipeline_mode<synchronous>, transform_indices = @transform_1, window_bounds = array<i64: 1, 2, 128>}, {pipeline_mode = #tpu.pipeline_mode<synchronous>, transform_indices = @transform_2, window_bounds = array<i64: 1, 128>}, {pipeline_mode = #tpu.pipeline_mode<synchronous>, transform_indices = @transform_3, window_bounds = array<i64: 1, 128>}, {pipeline_mode = #tpu.pipeline_mode<synchronous>, transform_indices = @transform_4, window_bounds = array<i64: 128, 1024>}, {pipeline_mode = #tpu.pipeline_mode<synchronous>, transform_indices = @transform_5, window_bounds = array<i64: 1, 1024>}, {transform_indices = @transform_6, window_bounds = array<i64: 2, 8, 512>}, {transform_indices = @transform_7, window_bounds = array<i64: 2, 8, 512>}]} {
    %c0 = arith.constant 0 : index
    %c0_0 = arith.constant 0 : index
    %c0_1 = arith.constant 0 : index
    %0 = vector.load %arg2[%c0, %c0_0, %c0_1] : memref<1x2x128xf32, #tpu.memory_space<vmem>>, vector<1x2x128xf32>
    %cst = arith.constant dense<0.000000e+00> : vector<2x128xf32>
    %1 = vector.multi_reduction <add>, %0, %cst [0] : vector<1x2x128xf32> to vector<2x128xf32>
    %2 = vector.extract_strided_slice %1 {offsets = [0, 0], sizes = [1, 128], strides = [1, 1]} : vector<2x128xf32> to vector<1x128xf32>
    %cst_2 = arith.constant 6.250000e-02 : f32
    %3 = vector.broadcast %cst_2 : f32 to vector<1x128xf32>
    %4 = arith.mulf %2, %3 : vector<1x128xf32>
    %5 = vector.extract_strided_slice %1 {offsets = [1, 0], sizes = [1, 128], strides = [1, 1]} : vector<2x128xf32> to vector<1x128xf32>
    %cst_3 = arith.constant 6.250000e-02 : f32
    %6 = vector.broadcast %cst_3 : f32 to vector<1x128xf32>
    %7 = arith.mulf %5, %6 : vector<1x128xf32>
    %8 = arith.mulf %4, %4 : vector<1x128xf32>
    %9 = arith.subf %7, %8 : vector<1x128xf32>
    %cst_4 = arith.constant 0.000000e+00 : f32
    %10 = vector.broadcast %cst_4 : f32 to vector<1x128xf32>
    %11 = arith.maximumf %9, %10 : vector<1x128xf32>
    %c0_5 = arith.constant 0 : index
    %c0_6 = arith.constant 0 : index
    %12 = vector.load %arg3[%c0_5, %c0_6] : memref<1x128xf32, #tpu.memory_space<vmem>>, vector<1x128xf32>
    %cst_7 = arith.constant 9.99999974E-6 : f32
    %13 = vector.broadcast %cst_7 : f32 to vector<1x128xf32>
    %14 = arith.addf %11, %13 : vector<1x128xf32>
    %15 = math.rsqrt %14 : vector<1x128xf32>
    %16 = arith.mulf %12, %15 : vector<1x128xf32>
    %c0_8 = arith.constant 0 : index
    %c0_9 = arith.constant 0 : index
    %17 = vector.load %arg4[%c0_8, %c0_9] : memref<1x128xf32, #tpu.memory_space<vmem>>, vector<1x128xf32>
    %18 = arith.mulf %4, %16 : vector<1x128xf32>
    %19 = arith.subf %17, %18 : vector<1x128xf32>
    %c0_10 = arith.constant 0 : index
    %c0_11 = arith.constant 0 : index
    %c0_12 = arith.constant 0 : index
    %20 = vector.load %arg1[%c0_10, %c0_11, %c0_12] : memref<2x8x128xbf16, #tpu.memory_space<vmem>>, vector<2x8x128xbf16>
    %21 = arith.extf %20 : vector<2x8x128xbf16> to vector<2x8x128xf32>
    %22 = vector.shape_cast %16 : vector<1x128xf32> to vector<1x1x128xf32>
    %23 = vector.broadcast %22 : vector<1x1x128xf32> to vector<2x8x128xf32>
    %24 = arith.mulf %21, %23 : vector<2x8x128xf32>
    %25 = vector.shape_cast %19 : vector<1x128xf32> to vector<1x1x128xf32>
    %26 = vector.broadcast %25 : vector<1x1x128xf32> to vector<2x8x128xf32>
    %27 = arith.addf %24, %26 : vector<2x8x128xf32>
    %28 = vector.shape_cast %27 : vector<2x8x128xf32> to vector<16x128xf32>
    %29 = arith.truncf %28 : vector<16x128xf32> to vector<16x128xbf16>
    %c0_13 = arith.constant 0 : index
    %c0_14 = arith.constant 0 : index
    %30 = vector.load %arg5[%c0_13, %c0_14] : memref<128x1024xbf16, #tpu.memory_space<vmem>>, vector<128x1024xbf16>
    %cst_15 = arith.constant dense<0.000000e+00> : vector<16x1024xf32>
    %31 = tpu.matmul %29, %30, %cst_15 {dimension_numbers = #tpu.dot_dimension_numbers<[1], [0], [0], [1], [0, 0, 1, 1], [], []>} : vector<16x128xbf16>, vector<128x1024xbf16>, vector<16x1024xf32> -> vector<16x1024xf32>
    %c0_16 = arith.constant 0 : index
    %c0_17 = arith.constant 0 : index
    %32 = vector.load %arg6[%c0_16, %c0_17] : memref<1x1024xf32, #tpu.memory_space<vmem>>, vector<1x1024xf32>
    %33 = vector.broadcast %32 : vector<1x1024xf32> to vector<16x1024xf32>
    %34 = arith.addf %31, %33 : vector<16x1024xf32>
    %35 = vector.extract_strided_slice %34 {offsets = [0, 0], sizes = [16, 512], strides = [1, 1]} : vector<16x1024xf32> to vector<16x512xf32>
    %36 = vector.shape_cast %35 : vector<16x512xf32> to vector<2x8x512xf32>
    %37 = arith.truncf %36 : vector<2x8x512xf32> to vector<2x8x512xbf16>
    %c0_18 = arith.constant 0 : index
    %c0_19 = arith.constant 0 : index
    %c0_20 = arith.constant 0 : index
    %38 = vector.load %arg7[%c0_18, %c0_19, %c0_20] : memref<2x8x512xbf16, #tpu.memory_space<vmem>>, vector<2x8x512xbf16>
    tpu.vector_store %arg7[%c0_18, %c0_19, %c0_20], %37 {strides = array<i32>} : memref<2x8x512xbf16, #tpu.memory_space<vmem>>, vector<2x8x512xbf16>,
    %39 = vector.extract_strided_slice %34 {offsets = [0, 512], sizes = [16, 512], strides = [1, 1]} : vector<16x1024xf32> to vector<16x512xf32>
    %40 = vector.shape_cast %39 : vector<16x512xf32> to vector<2x8x512xf32>
    %41 = arith.truncf %40 : vector<2x8x512xf32> to vector<2x8x512xbf16>
    %c0_21 = arith.constant 0 : index
    %c0_22 = arith.constant 0 : index
    %c0_23 = arith.constant 0 : index
    %42 = vector.load %arg8[%c0_21, %c0_22, %c0_23] : memref<2x8x512xbf16, #tpu.memory_space<vmem>>, vector<2x8x512xbf16>
    tpu.vector_store %arg8[%c0_21, %c0_22, %c0_23], %41 {strides = array<i32>} : memref<2x8x512xbf16, #tpu.memory_space<vmem>>, vector<2x8x512xbf16>,
    return
  }
  func.func @transform_0(%arg0: i32) -> (i32, i32, i32) {
    %c0_i32 = arith.constant 0 : i32
    %c0_i32_0 = arith.constant 0 : i32
    %c0_i32_1 = arith.constant 0 : i32
    return %arg0, %c0_i32, %c0_i32_0 : i32, i32, i32
  }
  func.func @transform_1(%arg0: i32) -> (i32, i32, i32) {
    %c0_i32 = arith.constant 0 : i32
    %c0_i32_0 = arith.constant 0 : i32
    %c0_i32_1 = arith.constant 0 : i32
    %c0_i32_2 = arith.constant 0 : i32
    return %c0_i32, %c0_i32_0, %c0_i32_1 : i32, i32, i32
  }
  func.func @transform_2(%arg0: i32) -> (i32, i32) {
    %c0_i32 = arith.constant 0 : i32
    %c0_i32_0 = arith.constant 0 : i32
    %c0_i32_1 = arith.constant 0 : i32
    return %c0_i32, %c0_i32_0 : i32, i32
  }
  func.func @transform_3(%arg0: i32) -> (i32, i32) {
    %c0_i32 = arith.constant 0 : i32
    %c0_i32_0 = arith.constant 0 : i32
    %c0_i32_1 = arith.constant 0 : i32
    return %c0_i32, %c0_i32_0 : i32, i32
  }
  func.func @transform_4(%arg0: i32) -> (i32, i32) {
    %c0_i32 = arith.constant 0 : i32
    %c0_i32_0 = arith.constant 0 : i32
    %c0_i32_1 = arith.constant 0 : i32
    return %c0_i32, %c0_i32_0 : i32, i32
  }
  func.func @transform_5(%arg0: i32) -> (i32, i32) {
    %c0_i32 = arith.constant 0 : i32
    %c0_i32_0 = arith.constant 0 : i32
    %c0_i32_1 = arith.constant 0 : i32
    return %c0_i32, %c0_i32_0 : i32, i32
  }
  func.func @transform_6(%arg0: i32) -> (i32, i32, i32) {
    %c0_i32 = arith.constant 0 : i32
    %c0_i32_0 = arith.constant 0 : i32
    %c0_i32_1 = arith.constant 0 : i32
    return %arg0, %c0_i32, %c0_i32_0 : i32, i32, i32
  }
  func.func @transform_7(%arg0: i32) -> (i32, i32, i32) {
    %c0_i32 = arith.constant 0 : i32
    %c0_i32_0 = arith.constant 0 : i32
    %c0_i32_1 = arith.constant 0 : i32
    return %arg0, %c0_i32, %c0_i32_0 : i32, i32, i32
  }
}

module attributes {stable_mosaic.version = 11 : i64} {
  func.func @_bilstm_pool_kernel(%arg0: i32, %arg1: memref<2x8x512xbf16, #tpu.memory_space<vmem>>, %arg2: memref<2x8x512xbf16, #tpu.memory_space<vmem>>, %arg3: memref<2x128x512xbf16, #tpu.memory_space<vmem>>, %arg4: memref<2x1x128xf32, #tpu.memory_space<vmem>>, %arg5: memref<2x1x128xf32, #tpu.memory_space<vmem>>, %arg6: memref<8x128xf32, #tpu.memory_space<vmem>>, %arg7: memref<8x128xf32, #tpu.memory_space<vmem>>, %arg8: memref<8x128xf32, #tpu.memory_space<vmem>>, %arg9: memref<8x128xf32, #tpu.memory_space<vmem>>) attributes {dimension_semantics = [#tpu.dimension_semantics<arbitrary>], iteration_bounds = array<i64: 1>, scalar_prefetch = 0 : i64, scratch_operands = 4 : i64, tpu.core_type = #tpu.core_type<tc>, window_params = [{transform_indices = @transform_0, window_bounds = array<i64: 2, 8, 512>}, {transform_indices = @transform_1, window_bounds = array<i64: 2, 8, 512>}, {pipeline_mode = #tpu.pipeline_mode<synchronous>, transform_indices = @transform_2, window_bounds = array<i64: 2, 128, 512>}, {transform_indices = @transform_3, window_bounds = array<i64: 2, 1, 128>}, {transform_indices = @transform_4, window_bounds = array<i64: 2, 1, 128>}]} {
    %c0_i32 = arith.constant 0 : i32
    %0 = arith.cmpi eq, %arg0, %c0_i32 : i32
    %1 = arith.extui %0 : i1 to i32
    %c0_i32_0 = arith.constant 0 : i32
    %2 = arith.cmpi ne, %1, %c0_i32_0 : i32
    scf.if %2 {
      %cst_62 = arith.constant 0.000000e+00 : f32
      %161 = vector.broadcast %cst_62 : f32 to vector<8x128xf32>
      %c0_63 = arith.constant 0 : index
      %c0_64 = arith.constant 0 : index
      %162 = vector.load %arg6[%c0_63, %c0_64] : memref<8x128xf32, #tpu.memory_space<vmem>>, vector<8x128xf32>
      tpu.vector_store %arg6[%c0_63, %c0_64], %161 {strides = array<i32>} : memref<8x128xf32, #tpu.memory_space<vmem>>, vector<8x128xf32>,
      %cst_65 = arith.constant 0.000000e+00 : f32
      %163 = vector.broadcast %cst_65 : f32 to vector<8x128xf32>
      %c0_66 = arith.constant 0 : index
      %c0_67 = arith.constant 0 : index
      %164 = vector.load %arg7[%c0_66, %c0_67] : memref<8x128xf32, #tpu.memory_space<vmem>>, vector<8x128xf32>
      tpu.vector_store %arg7[%c0_66, %c0_67], %163 {strides = array<i32>} : memref<8x128xf32, #tpu.memory_space<vmem>>, vector<8x128xf32>,
      %cst_68 = arith.constant 0.000000e+00 : f32
      %165 = vector.broadcast %cst_68 : f32 to vector<8x128xf32>
      %c0_69 = arith.constant 0 : index
      %c0_70 = arith.constant 0 : index
      %166 = vector.load %arg8[%c0_69, %c0_70] : memref<8x128xf32, #tpu.memory_space<vmem>>, vector<8x128xf32>
      tpu.vector_store %arg8[%c0_69, %c0_70], %165 {strides = array<i32>} : memref<8x128xf32, #tpu.memory_space<vmem>>, vector<8x128xf32>,
      %cst_71 = arith.constant 0.000000e+00 : f32
      %167 = vector.broadcast %cst_71 : f32 to vector<8x128xf32>
      %c0_72 = arith.constant 0 : index
      %c0_73 = arith.constant 0 : index
      %168 = vector.load %arg9[%c0_72, %c0_73] : memref<8x128xf32, #tpu.memory_space<vmem>>, vector<8x128xf32>
      tpu.vector_store %arg9[%c0_72, %c0_73], %167 {strides = array<i32>} : memref<8x128xf32, #tpu.memory_space<vmem>>, vector<8x128xf32>,
    } else {
    }
    %c0 = arith.constant 0 : index
    %c0_1 = arith.constant 0 : index
    %c0_2 = arith.constant 0 : index
    %3 = vector.load %arg3[%c0, %c0_1, %c0_2] : memref<2x128x512xbf16, #tpu.memory_space<vmem>>, vector<1x128x512xbf16>
    %4 = vector.shape_cast %3 : vector<1x128x512xbf16> to vector<128x512xbf16>
    %c1 = arith.constant 1 : index
    %c0_3 = arith.constant 0 : index
    %c0_4 = arith.constant 0 : index
    %5 = vector.load %arg3[%c1, %c0_3, %c0_4] : memref<2x128x512xbf16, #tpu.memory_space<vmem>>, vector<1x128x512xbf16>
    %6 = vector.shape_cast %5 : vector<1x128x512xbf16> to vector<128x512xbf16>
    %c0_5 = arith.constant 0 : index
    %c0_6 = arith.constant 0 : index
    %7 = vector.load %arg6[%c0_5, %c0_6] : memref<8x128xf32, #tpu.memory_space<vmem>>, vector<8x128xf32>
    %c0_7 = arith.constant 0 : index
    %c0_8 = arith.constant 0 : index
    %8 = vector.load %arg7[%c0_7, %c0_8] : memref<8x128xf32, #tpu.memory_space<vmem>>, vector<8x128xf32>
    %c0_9 = arith.constant 0 : index
    %c0_10 = arith.constant 0 : index
    %9 = vector.load %arg8[%c0_9, %c0_10] : memref<8x128xf32, #tpu.memory_space<vmem>>, vector<8x128xf32>
    %c0_11 = arith.constant 0 : index
    %c0_12 = arith.constant 0 : index
    %10 = vector.load %arg9[%c0_11, %c0_12] : memref<8x128xf32, #tpu.memory_space<vmem>>, vector<8x128xf32>
    %c0_13 = arith.constant 0 : index
    %c0_14 = arith.constant 0 : index
    %c0_15 = arith.constant 0 : index
    %11 = vector.load %arg1[%c0_13, %c0_14, %c0_15] : memref<2x8x512xbf16, #tpu.memory_space<vmem>>, vector<1x8x512xbf16>
    %12 = vector.shape_cast %11 : vector<1x8x512xbf16> to vector<8x512xbf16>
    %13 = arith.extf %12 : vector<8x512xbf16> to vector<8x512xf32>
    %14 = arith.truncf %7 : vector<8x128xf32> to vector<8x128xbf16>
    %cst = arith.constant dense<0.000000e+00> : vector<8x512xf32>
    %15 = tpu.matmul %14, %4, %cst {dimension_numbers = #tpu.dot_dimension_numbers<[1], [0], [0], [1], [0, 0, 1, 1], [], []>} : vector<8x128xbf16>, vector<128x512xbf16>, vector<8x512xf32> -> vector<8x512xf32>
    %16 = arith.addf %13, %15 : vector<8x512xf32>
    %17 = vector.extract_strided_slice %16 {offsets = [0, 0], sizes = [8, 128], strides = [1, 1]} : vector<8x512xf32> to vector<8x128xf32>
    %18 = arith.negf %17 : vector<8x128xf32>
    %19 = math.exp %18 : vector<8x128xf32>
    %cst_16 = arith.constant 1.000000e+00 : f32
    %20 = vector.broadcast %cst_16 : f32 to vector<8x128xf32>
    %21 = arith.addf %20, %19 : vector<8x128xf32>
    %22 = arith.divf %20, %21 : vector<8x128xf32>
    %23 = vector.extract_strided_slice %16 {offsets = [0, 128], sizes = [8, 128], strides = [1, 1]} : vector<8x512xf32> to vector<8x128xf32>
    %24 = arith.negf %23 : vector<8x128xf32>
    %25 = math.exp %24 : vector<8x128xf32>
    %cst_17 = arith.constant 1.000000e+00 : f32
    %26 = vector.broadcast %cst_17 : f32 to vector<8x128xf32>
    %27 = arith.addf %26, %25 : vector<8x128xf32>
    %28 = arith.divf %26, %27 : vector<8x128xf32>
    %29 = vector.extract_strided_slice %16 {offsets = [0, 256], sizes = [8, 128], strides = [1, 1]} : vector<8x512xf32> to vector<8x128xf32>
    %30 = math.tanh %29 : vector<8x128xf32>
    %31 = vector.extract_strided_slice %16 {offsets = [0, 384], sizes = [8, 128], strides = [1, 1]} : vector<8x512xf32> to vector<8x128xf32>
    %32 = arith.negf %31 : vector<8x128xf32>
    %33 = math.exp %32 : vector<8x128xf32>
    %cst_18 = arith.constant 1.000000e+00 : f32
    %34 = vector.broadcast %cst_18 : f32 to vector<8x128xf32>
    %35 = arith.addf %34, %33 : vector<8x128xf32>
    %36 = arith.divf %34, %35 : vector<8x128xf32>
    %37 = arith.mulf %28, %8 : vector<8x128xf32>
    %38 = arith.mulf %22, %30 : vector<8x128xf32>
    %39 = arith.addf %37, %38 : vector<8x128xf32>
    %40 = math.tanh %39 : vector<8x128xf32>
    %41 = arith.mulf %36, %40 : vector<8x128xf32>
    %c1_19 = arith.constant 1 : index
    %c0_20 = arith.constant 0 : index
    %c0_21 = arith.constant 0 : index
    %42 = vector.load %arg2[%c1_19, %c0_20, %c0_21] : memref<2x8x512xbf16, #tpu.memory_space<vmem>>, vector<1x8x512xbf16>
    %43 = vector.shape_cast %42 : vector<1x8x512xbf16> to vector<8x512xbf16>
    %44 = arith.extf %43 : vector<8x512xbf16> to vector<8x512xf32>
    %45 = arith.truncf %9 : vector<8x128xf32> to vector<8x128xbf16>
    %cst_22 = arith.constant dense<0.000000e+00> : vector<8x512xf32>
    %46 = tpu.matmul %45, %6, %cst_22 {dimension_numbers = #tpu.dot_dimension_numbers<[1], [0], [0], [1], [0, 0, 1, 1], [], []>} : vector<8x128xbf16>, vector<128x512xbf16>, vector<8x512xf32> -> vector<8x512xf32>
    %47 = arith.addf %44, %46 : vector<8x512xf32>
    %48 = vector.extract_strided_slice %47 {offsets = [0, 0], sizes = [8, 128], strides = [1, 1]} : vector<8x512xf32> to vector<8x128xf32>
    %49 = arith.negf %48 : vector<8x128xf32>
    %50 = math.exp %49 : vector<8x128xf32>
    %cst_23 = arith.constant 1.000000e+00 : f32
    %51 = vector.broadcast %cst_23 : f32 to vector<8x128xf32>
    %52 = arith.addf %51, %50 : vector<8x128xf32>
    %53 = arith.divf %51, %52 : vector<8x128xf32>
    %54 = vector.extract_strided_slice %47 {offsets = [0, 128], sizes = [8, 128], strides = [1, 1]} : vector<8x512xf32> to vector<8x128xf32>
    %55 = arith.negf %54 : vector<8x128xf32>
    %56 = math.exp %55 : vector<8x128xf32>
    %cst_24 = arith.constant 1.000000e+00 : f32
    %57 = vector.broadcast %cst_24 : f32 to vector<8x128xf32>
    %58 = arith.addf %57, %56 : vector<8x128xf32>
    %59 = arith.divf %57, %58 : vector<8x128xf32>
    %60 = vector.extract_strided_slice %47 {offsets = [0, 256], sizes = [8, 128], strides = [1, 1]} : vector<8x512xf32> to vector<8x128xf32>
    %61 = math.tanh %60 : vector<8x128xf32>
    %62 = vector.extract_strided_slice %47 {offsets = [0, 384], sizes = [8, 128], strides = [1, 1]} : vector<8x512xf32> to vector<8x128xf32>
    %63 = arith.negf %62 : vector<8x128xf32>
    %64 = math.exp %63 : vector<8x128xf32>
    %cst_25 = arith.constant 1.000000e+00 : f32
    %65 = vector.broadcast %cst_25 : f32 to vector<8x128xf32>
    %66 = arith.addf %65, %64 : vector<8x128xf32>
    %67 = arith.divf %65, %66 : vector<8x128xf32>
    %68 = arith.mulf %59, %10 : vector<8x128xf32>
    %69 = arith.mulf %53, %61 : vector<8x128xf32>
    %70 = arith.addf %68, %69 : vector<8x128xf32>
    %71 = math.tanh %70 : vector<8x128xf32>
    %72 = arith.mulf %67, %71 : vector<8x128xf32>
    %cst_26 = arith.constant dense<0.000000e+00> : vector<128xf32>
    %73 = vector.multi_reduction <add>, %41, %cst_26 [0] : vector<8x128xf32> to vector<128xf32>
    %74 = vector.shape_cast %73 : vector<128xf32> to vector<1x128xf32>
    %cst_27 = arith.constant 1.250000e-01 : f32
    %75 = vector.broadcast %cst_27 : f32 to vector<1x128xf32>
    %76 = arith.mulf %74, %75 : vector<1x128xf32>
    %cst_28 = arith.constant dense<0.000000e+00> : vector<128xf32>
    %77 = vector.multi_reduction <add>, %72, %cst_28 [0] : vector<8x128xf32> to vector<128xf32>
    %78 = vector.shape_cast %77 : vector<128xf32> to vector<1x128xf32>
    %cst_29 = arith.constant 1.250000e-01 : f32
    %79 = vector.broadcast %cst_29 : f32 to vector<1x128xf32>
    %80 = arith.mulf %78, %79 : vector<1x128xf32>
    %c1_30 = arith.constant 1 : index
    %c0_31 = arith.constant 0 : index
    %c0_32 = arith.constant 0 : index
    %81 = vector.load %arg1[%c1_30, %c0_31, %c0_32] : memref<2x8x512xbf16, #tpu.memory_space<vmem>>, vector<1x8x512xbf16>
    %82 = vector.shape_cast %81 : vector<1x8x512xbf16> to vector<8x512xbf16>
    %83 = arith.extf %82 : vector<8x512xbf16> to vector<8x512xf32>
    %84 = arith.truncf %41 : vector<8x128xf32> to vector<8x128xbf16>
    %cst_33 = arith.constant dense<0.000000e+00> : vector<8x512xf32>
    %85 = tpu.matmul %84, %4, %cst_33 {dimension_numbers = #tpu.dot_dimension_numbers<[1], [0], [0], [1], [0, 0, 1, 1], [], []>} : vector<8x128xbf16>, vector<128x512xbf16>, vector<8x512xf32> -> vector<8x512xf32>
    %86 = arith.addf %83, %85 : vector<8x512xf32>
    %87 = vector.extract_strided_slice %86 {offsets = [0, 0], sizes = [8, 128], strides = [1, 1]} : vector<8x512xf32> to vector<8x128xf32>
    %88 = arith.negf %87 : vector<8x128xf32>
    %89 = math.exp %88 : vector<8x128xf32>
    %cst_34 = arith.constant 1.000000e+00 : f32
    %90 = vector.broadcast %cst_34 : f32 to vector<8x128xf32>
    %91 = arith.addf %90, %89 : vector<8x128xf32>
    %92 = arith.divf %90, %91 : vector<8x128xf32>
    %93 = vector.extract_strided_slice %86 {offsets = [0, 128], sizes = [8, 128], strides = [1, 1]} : vector<8x512xf32> to vector<8x128xf32>
    %94 = arith.negf %93 : vector<8x128xf32>
    %95 = math.exp %94 : vector<8x128xf32>
    %cst_35 = arith.constant 1.000000e+00 : f32
    %96 = vector.broadcast %cst_35 : f32 to vector<8x128xf32>
    %97 = arith.addf %96, %95 : vector<8x128xf32>
    %98 = arith.divf %96, %97 : vector<8x128xf32>
    %99 = vector.extract_strided_slice %86 {offsets = [0, 256], sizes = [8, 128], strides = [1, 1]} : vector<8x512xf32> to vector<8x128xf32>
    %100 = math.tanh %99 : vector<8x128xf32>
    %101 = vector.extract_strided_slice %86 {offsets = [0, 384], sizes = [8, 128], strides = [1, 1]} : vector<8x512xf32> to vector<8x128xf32>
    %102 = arith.negf %101 : vector<8x128xf32>
    %103 = math.exp %102 : vector<8x128xf32>
    %cst_36 = arith.constant 1.000000e+00 : f32
    %104 = vector.broadcast %cst_36 : f32 to vector<8x128xf32>
    %105 = arith.addf %104, %103 : vector<8x128xf32>
    %106 = arith.divf %104, %105 : vector<8x128xf32>
    %107 = arith.mulf %98, %39 : vector<8x128xf32>
    %108 = arith.mulf %92, %100 : vector<8x128xf32>
    %109 = arith.addf %107, %108 : vector<8x128xf32>
    %110 = math.tanh %109 : vector<8x128xf32>
    %111 = arith.mulf %106, %110 : vector<8x128xf32>
    %c0_37 = arith.constant 0 : index
    %c0_38 = arith.constant 0 : index
    %c0_39 = arith.constant 0 : index
    %112 = vector.load %arg2[%c0_37, %c0_38, %c0_39] : memref<2x8x512xbf16, #tpu.memory_space<vmem>>, vector<1x8x512xbf16>
    %113 = vector.shape_cast %112 : vector<1x8x512xbf16> to vector<8x512xbf16>
    %114 = arith.extf %113 : vector<8x512xbf16> to vector<8x512xf32>
    %115 = arith.truncf %72 : vector<8x128xf32> to vector<8x128xbf16>
    %cst_40 = arith.constant dense<0.000000e+00> : vector<8x512xf32>
    %116 = tpu.matmul %115, %6, %cst_40 {dimension_numbers = #tpu.dot_dimension_numbers<[1], [0], [0], [1], [0, 0, 1, 1], [], []>} : vector<8x128xbf16>, vector<128x512xbf16>, vector<8x512xf32> -> vector<8x512xf32>
    %117 = arith.addf %114, %116 : vector<8x512xf32>
    %118 = vector.extract_strided_slice %117 {offsets = [0, 0], sizes = [8, 128], strides = [1, 1]} : vector<8x512xf32> to vector<8x128xf32>
    %119 = arith.negf %118 : vector<8x128xf32>
    %120 = math.exp %119 : vector<8x128xf32>
    %cst_41 = arith.constant 1.000000e+00 : f32
    %121 = vector.broadcast %cst_41 : f32 to vector<8x128xf32>
    %122 = arith.addf %121, %120 : vector<8x128xf32>
    %123 = arith.divf %121, %122 : vector<8x128xf32>
    %124 = vector.extract_strided_slice %117 {offsets = [0, 128], sizes = [8, 128], strides = [1, 1]} : vector<8x512xf32> to vector<8x128xf32>
    %125 = arith.negf %124 : vector<8x128xf32>
    %126 = math.exp %125 : vector<8x128xf32>
    %cst_42 = arith.constant 1.000000e+00 : f32
    %127 = vector.broadcast %cst_42 : f32 to vector<8x128xf32>
    %128 = arith.addf %127, %126 : vector<8x128xf32>
    %129 = arith.divf %127, %128 : vector<8x128xf32>
    %130 = vector.extract_strided_slice %117 {offsets = [0, 256], sizes = [8, 128], strides = [1, 1]} : vector<8x512xf32> to vector<8x128xf32>
    %131 = math.tanh %130 : vector<8x128xf32>
    %132 = vector.extract_strided_slice %117 {offsets = [0, 384], sizes = [8, 128], strides = [1, 1]} : vector<8x512xf32> to vector<8x128xf32>
    %133 = arith.negf %132 : vector<8x128xf32>
    %134 = math.exp %133 : vector<8x128xf32>
    %cst_43 = arith.constant 1.000000e+00 : f32
    %135 = vector.broadcast %cst_43 : f32 to vector<8x128xf32>
    %136 = arith.addf %135, %134 : vector<8x128xf32>
    %137 = arith.divf %135, %136 : vector<8x128xf32>
    %138 = arith.mulf %129, %70 : vector<8x128xf32>
    %139 = arith.mulf %123, %131 : vector<8x128xf32>
    %140 = arith.addf %138, %139 : vector<8x128xf32>
    %141 = math.tanh %140 : vector<8x128xf32>
    %142 = arith.mulf %137, %141 : vector<8x128xf32>
    %cst_44 = arith.constant dense<0.000000e+00> : vector<128xf32>
    %143 = vector.multi_reduction <add>, %111, %cst_44 [0] : vector<8x128xf32> to vector<128xf32>
    %144 = vector.shape_cast %143 : vector<128xf32> to vector<1x128xf32>
    %cst_45 = arith.constant 1.250000e-01 : f32
    %145 = vector.broadcast %cst_45 : f32 to vector<1x128xf32>
    %146 = arith.mulf %144, %145 : vector<1x128xf32>
    %cst_46 = arith.constant dense<0.000000e+00> : vector<128xf32>
    %147 = vector.multi_reduction <add>, %142, %cst_46 [0] : vector<8x128xf32> to vector<128xf32>
    %148 = vector.shape_cast %147 : vector<128xf32> to vector<1x128xf32>
    %cst_47 = arith.constant 1.250000e-01 : f32
    %149 = vector.broadcast %cst_47 : f32 to vector<1x128xf32>
    %150 = arith.mulf %148, %149 : vector<1x128xf32>
    %c0_48 = arith.constant 0 : index
    %c0_49 = arith.constant 0 : index
    %151 = vector.load %arg6[%c0_48, %c0_49] : memref<8x128xf32, #tpu.memory_space<vmem>>, vector<8x128xf32>
    tpu.vector_store %arg6[%c0_48, %c0_49], %111 {strides = array<i32>} : memref<8x128xf32, #tpu.memory_space<vmem>>, vector<8x128xf32>,
    %c0_50 = arith.constant 0 : index
    %c0_51 = arith.constant 0 : index
    %152 = vector.load %arg7[%c0_50, %c0_51] : memref<8x128xf32, #tpu.memory_space<vmem>>, vector<8x128xf32>
    tpu.vector_store %arg7[%c0_50, %c0_51], %109 {strides = array<i32>} : memref<8x128xf32, #tpu.memory_space<vmem>>, vector<8x128xf32>,
    %c0_52 = arith.constant 0 : index
    %c0_53 = arith.constant 0 : index
    %153 = vector.load %arg8[%c0_52, %c0_53] : memref<8x128xf32, #tpu.memory_space<vmem>>, vector<8x128xf32>
    tpu.vector_store %arg8[%c0_52, %c0_53], %142 {strides = array<i32>} : memref<8x128xf32, #tpu.memory_space<vmem>>, vector<8x128xf32>,
    %c0_54 = arith.constant 0 : index
    %c0_55 = arith.constant 0 : index
    %154 = vector.load %arg9[%c0_54, %c0_55] : memref<8x128xf32, #tpu.memory_space<vmem>>, vector<8x128xf32>
    tpu.vector_store %arg9[%c0_54, %c0_55], %140 {strides = array<i32>} : memref<8x128xf32, #tpu.memory_space<vmem>>, vector<8x128xf32>,
    %155 = tpu.concatenate %76, %146 in 0 : vector<1x128xf32>, vector<1x128xf32> -> vector<2x128xf32>
    %156 = vector.shape_cast %155 : vector<2x128xf32> to vector<2x1x128xf32>
    %c0_56 = arith.constant 0 : index
    %c0_57 = arith.constant 0 : index
    %c0_58 = arith.constant 0 : index
    %157 = vector.load %arg4[%c0_56, %c0_57, %c0_58] : memref<2x1x128xf32, #tpu.memory_space<vmem>>, vector<2x1x128xf32>
    tpu.vector_store %arg4[%c0_56, %c0_57, %c0_58], %156 {strides = array<i32>} : memref<2x1x128xf32, #tpu.memory_space<vmem>>, vector<2x1x128xf32>,
    %158 = tpu.concatenate %150, %80 in 0 : vector<1x128xf32>, vector<1x128xf32> -> vector<2x128xf32>
    %159 = vector.shape_cast %158 : vector<2x128xf32> to vector<2x1x128xf32>
    %c0_59 = arith.constant 0 : index
    %c0_60 = arith.constant 0 : index
    %c0_61 = arith.constant 0 : index
    %160 = vector.load %arg5[%c0_59, %c0_60, %c0_61] : memref<2x1x128xf32, #tpu.memory_space<vmem>>, vector<2x1x128xf32>
    tpu.vector_store %arg5[%c0_59, %c0_60, %c0_61], %159 {strides = array<i32>} : memref<2x1x128xf32, #tpu.memory_space<vmem>>, vector<2x1x128xf32>,
    return
  }
  func.func @transform_0(%arg0: i32) -> (i32, i32, i32) {
    %c0_i32 = arith.constant 0 : i32
    %c0_i32_0 = arith.constant 0 : i32
    %c0_i32_1 = arith.constant 0 : i32
    return %arg0, %c0_i32, %c0_i32_0 : i32, i32, i32
  }
  func.func @transform_1(%arg0: i32) -> (i32, i32, i32) {
    %c0_i32 = arith.constant 0 : i32
    %0 = arith.subi %c0_i32, %arg0 : i32
    %c0_i32_0 = arith.constant 0 : i32
    %c0_i32_1 = arith.constant 0 : i32
    %c0_i32_2 = arith.constant 0 : i32
    return %0, %c0_i32_0, %c0_i32_1 : i32, i32, i32
  }
  func.func @transform_2(%arg0: i32) -> (i32, i32, i32) {
    %c0_i32 = arith.constant 0 : i32
    %c0_i32_0 = arith.constant 0 : i32
    %c0_i32_1 = arith.constant 0 : i32
    %c0_i32_2 = arith.constant 0 : i32
    return %c0_i32, %c0_i32_0, %c0_i32_1 : i32, i32, i32
  }
  func.func @transform_3(%arg0: i32) -> (i32, i32, i32) {
    %c0_i32 = arith.constant 0 : i32
    %c0_i32_0 = arith.constant 0 : i32
    %c0_i32_1 = arith.constant 0 : i32
    return %arg0, %c0_i32, %c0_i32_0 : i32, i32, i32
  }
  func.func @transform_4(%arg0: i32) -> (i32, i32, i32) {
    %c0_i32 = arith.constant 0 : i32
    %0 = arith.subi %c0_i32, %arg0 : i32
    %c0_i32_0 = arith.constant 0 : i32
    %c0_i32_1 = arith.constant 0 : i32
    %c0_i32_2 = arith.constant 0 : i32
    return %0, %c0_i32_0, %c0_i32_1 : i32, i32, i32
  }
}

module attributes {stable_mosaic.version = 11 : i64} {
  func.func @_pool_decoder_kernel(%arg0: i32, %arg1: memref<2x1x128xf32, #tpu.memory_space<vmem>>, %arg2: memref<2x1x128xf32, #tpu.memory_space<vmem>>, %arg3: memref<128x256xbf16, #tpu.memory_space<vmem>>, %arg4: memref<128x256xbf16, #tpu.memory_space<vmem>>, %arg5: memref<1x256xf32, #tpu.memory_space<vmem>>, %arg6: memref<256x512xbf16, #tpu.memory_space<vmem>>, %arg7: memref<1x512xf32, #tpu.memory_space<vmem>>, %arg8: memref<512x128xbf16, #tpu.memory_space<vmem>>, %arg9: memref<1x128xf32, #tpu.memory_space<vmem>>, %arg10: memref<2x1x128xf32, #tpu.memory_space<vmem>>) attributes {dimension_semantics = [#tpu.dimension_semantics<parallel>], iteration_bounds = array<i64: 1>, scalar_prefetch = 0 : i64, scratch_operands = 0 : i64, tpu.core_type = #tpu.core_type<tc>, window_params = [{transform_indices = @transform_0, window_bounds = array<i64: 2, 1, 128>}, {transform_indices = @transform_1, window_bounds = array<i64: 2, 1, 128>}, {pipeline_mode = #tpu.pipeline_mode<synchronous>, transform_indices = @transform_2, window_bounds = array<i64: 128, 256>}, {pipeline_mode = #tpu.pipeline_mode<synchronous>, transform_indices = @transform_3, window_bounds = array<i64: 128, 256>}, {pipeline_mode = #tpu.pipeline_mode<synchronous>, transform_indices = @transform_4, window_bounds = array<i64: 1, 256>}, {pipeline_mode = #tpu.pipeline_mode<synchronous>, transform_indices = @transform_5, window_bounds = array<i64: 256, 512>}, {pipeline_mode = #tpu.pipeline_mode<synchronous>, transform_indices = @transform_6, window_bounds = array<i64: 1, 512>}, {pipeline_mode = #tpu.pipeline_mode<synchronous>, transform_indices = @transform_7, window_bounds = array<i64: 512, 128>}, {pipeline_mode = #tpu.pipeline_mode<synchronous>, transform_indices = @transform_8, window_bounds = array<i64: 1, 128>}, {transform_indices = @transform_9, window_bounds = array<i64: 2, 1, 128>}]} {
    %c0 = arith.constant 0 : index
    %c0_0 = arith.constant 0 : index
    %c0_1 = arith.constant 0 : index
    %0 = vector.load %arg1[%c0, %c0_0, %c0_1] : memref<2x1x128xf32, #tpu.memory_space<vmem>>, vector<2x1x128xf32>
    %1 = vector.shape_cast %0 : vector<2x1x128xf32> to vector<2x128xf32>
    %2 = arith.truncf %1 : vector<2x128xf32> to vector<2x128xbf16>
    %c0_2 = arith.constant 0 : index
    %c0_3 = arith.constant 0 : index
    %c0_4 = arith.constant 0 : index
    %3 = vector.load %arg2[%c0_2, %c0_3, %c0_4] : memref<2x1x128xf32, #tpu.memory_space<vmem>>, vector<2x1x128xf32>
    %4 = vector.shape_cast %3 : vector<2x1x128xf32> to vector<2x128xf32>
    %5 = arith.truncf %4 : vector<2x128xf32> to vector<2x128xbf16>
    %c0_5 = arith.constant 0 : index
    %c0_6 = arith.constant 0 : index
    %6 = vector.load %arg3[%c0_5, %c0_6] : memref<128x256xbf16, #tpu.memory_space<vmem>>, vector<128x256xbf16>
    %cst = arith.constant dense<0.000000e+00> : vector<2x256xf32>
    %7 = tpu.matmul %2, %6, %cst {dimension_numbers = #tpu.dot_dimension_numbers<[1], [0], [0], [1], [0, 0, 1, 1], [], []>} : vector<2x128xbf16>, vector<128x256xbf16>, vector<2x256xf32> -> vector<2x256xf32>
    %c0_7 = arith.constant 0 : index
    %c0_8 = arith.constant 0 : index
    %8 = vector.load %arg4[%c0_7, %c0_8] : memref<128x256xbf16, #tpu.memory_space<vmem>>, vector<128x256xbf16>
    %cst_9 = arith.constant dense<0.000000e+00> : vector<2x256xf32>
    %9 = tpu.matmul %5, %8, %cst_9 {dimension_numbers = #tpu.dot_dimension_numbers<[1], [0], [0], [1], [0, 0, 1, 1], [], []>} : vector<2x128xbf16>, vector<128x256xbf16>, vector<2x256xf32> -> vector<2x256xf32>
    %10 = arith.addf %7, %9 : vector<2x256xf32>
    %c0_10 = arith.constant 0 : index
    %c0_11 = arith.constant 0 : index
    %11 = vector.load %arg5[%c0_10, %c0_11] : memref<1x256xf32, #tpu.memory_space<vmem>>, vector<1x256xf32>
    %12 = vector.broadcast %11 : vector<1x256xf32> to vector<2x256xf32>
    %13 = arith.addf %10, %12 : vector<2x256xf32>
    %cst_12 = arith.constant 0.000000e+00 : f32
    %14 = vector.broadcast %cst_12 : f32 to vector<2x256xf32>
    %15 = arith.maximumf %13, %14 : vector<2x256xf32>
    %16 = arith.truncf %15 : vector<2x256xf32> to vector<2x256xbf16>
    %c0_13 = arith.constant 0 : index
    %c0_14 = arith.constant 0 : index
    %17 = vector.load %arg6[%c0_13, %c0_14] : memref<256x512xbf16, #tpu.memory_space<vmem>>, vector<256x512xbf16>
    %cst_15 = arith.constant dense<0.000000e+00> : vector<2x512xf32>
    %18 = tpu.matmul %16, %17, %cst_15 {dimension_numbers = #tpu.dot_dimension_numbers<[1], [0], [0], [1], [0, 0, 1, 1], [], []>} : vector<2x256xbf16>, vector<256x512xbf16>, vector<2x512xf32> -> vector<2x512xf32>
    %c0_16 = arith.constant 0 : index
    %c0_17 = arith.constant 0 : index
    %19 = vector.load %arg7[%c0_16, %c0_17] : memref<1x512xf32, #tpu.memory_space<vmem>>, vector<1x512xf32>
    %20 = vector.broadcast %19 : vector<1x512xf32> to vector<2x512xf32>
    %21 = arith.addf %18, %20 : vector<2x512xf32>
    %cst_18 = arith.constant 0.000000e+00 : f32
    %22 = vector.broadcast %cst_18 : f32 to vector<2x512xf32>
    %23 = arith.maximumf %21, %22 : vector<2x512xf32>
    %24 = arith.truncf %23 : vector<2x512xf32> to vector<2x512xbf16>
    %c0_19 = arith.constant 0 : index
    %c0_20 = arith.constant 0 : index
    %25 = vector.load %arg8[%c0_19, %c0_20] : memref<512x128xbf16, #tpu.memory_space<vmem>>, vector<512x128xbf16>
    %cst_21 = arith.constant dense<0.000000e+00> : vector<2x128xf32>
    %26 = tpu.matmul %24, %25, %cst_21 {dimension_numbers = #tpu.dot_dimension_numbers<[1], [0], [0], [1], [0, 0, 1, 1], [], []>} : vector<2x512xbf16>, vector<512x128xbf16>, vector<2x128xf32> -> vector<2x128xf32>
    %c0_22 = arith.constant 0 : index
    %c0_23 = arith.constant 0 : index
    %27 = vector.load %arg9[%c0_22, %c0_23] : memref<1x128xf32, #tpu.memory_space<vmem>>, vector<1x128xf32>
    %28 = vector.broadcast %27 : vector<1x128xf32> to vector<2x128xf32>
    %29 = arith.addf %26, %28 : vector<2x128xf32>
    %30 = vector.shape_cast %29 : vector<2x128xf32> to vector<2x1x128xf32>
    %c0_24 = arith.constant 0 : index
    %c0_25 = arith.constant 0 : index
    %c0_26 = arith.constant 0 : index
    %31 = vector.load %arg10[%c0_24, %c0_25, %c0_26] : memref<2x1x128xf32, #tpu.memory_space<vmem>>, vector<2x1x128xf32>
    tpu.vector_store %arg10[%c0_24, %c0_25, %c0_26], %30 {strides = array<i32>} : memref<2x1x128xf32, #tpu.memory_space<vmem>>, vector<2x1x128xf32>,
    return
  }
  func.func @transform_0(%arg0: i32) -> (i32, i32, i32) {
    %c0_i32 = arith.constant 0 : i32
    %c0_i32_0 = arith.constant 0 : i32
    %c0_i32_1 = arith.constant 0 : i32
    return %arg0, %c0_i32, %c0_i32_0 : i32, i32, i32
  }
  func.func @transform_1(%arg0: i32) -> (i32, i32, i32) {
    %c0_i32 = arith.constant 0 : i32
    %c0_i32_0 = arith.constant 0 : i32
    %c0_i32_1 = arith.constant 0 : i32
    return %arg0, %c0_i32, %c0_i32_0 : i32, i32, i32
  }
  func.func @transform_2(%arg0: i32) -> (i32, i32) {
    %c0_i32 = arith.constant 0 : i32
    %c0_i32_0 = arith.constant 0 : i32
    %c0_i32_1 = arith.constant 0 : i32
    return %c0_i32, %c0_i32_0 : i32, i32
  }
  func.func @transform_3(%arg0: i32) -> (i32, i32) {
    %c0_i32 = arith.constant 0 : i32
    %c0_i32_0 = arith.constant 0 : i32
    %c0_i32_1 = arith.constant 0 : i32
    return %c0_i32, %c0_i32_0 : i32, i32
  }
  func.func @transform_4(%arg0: i32) -> (i32, i32) {
    %c0_i32 = arith.constant 0 : i32
    %c0_i32_0 = arith.constant 0 : i32
    %c0_i32_1 = arith.constant 0 : i32
    return %c0_i32, %c0_i32_0 : i32, i32
  }
  func.func @transform_5(%arg0: i32) -> (i32, i32) {
    %c0_i32 = arith.constant 0 : i32
    %c0_i32_0 = arith.constant 0 : i32
    %c0_i32_1 = arith.constant 0 : i32
    return %c0_i32, %c0_i32_0 : i32, i32
  }
  func.func @transform_6(%arg0: i32) -> (i32, i32) {
    %c0_i32 = arith.constant 0 : i32
    %c0_i32_0 = arith.constant 0 : i32
    %c0_i32_1 = arith.constant 0 : i32
    return %c0_i32, %c0_i32_0 : i32, i32
  }
  func.func @transform_7(%arg0: i32) -> (i32, i32) {
    %c0_i32 = arith.constant 0 : i32
    %c0_i32_0 = arith.constant 0 : i32
    %c0_i32_1 = arith.constant 0 : i32
    return %c0_i32, %c0_i32_0 : i32, i32
  }
  func.func @transform_8(%arg0: i32) -> (i32, i32) {
    %c0_i32 = arith.constant 0 : i32
    %c0_i32_0 = arith.constant 0 : i32
    %c0_i32_1 = arith.constant 0 : i32
    return %c0_i32, %c0_i32_0 : i32, i32
  }
  func.func @transform_9(%arg0: i32) -> (i32, i32, i32) {
    %c0_i32 = arith.constant 0 : i32
    %c0_i32_0 = arith.constant 0 : i32
    %c0_i32_1 = arith.constant 0 : i32
    return %arg0, %c0_i32, %c0_i32_0 : i32, i32, i32
  }
}

</mosaic_0001>

<bundles_post_ra>
// kernel: ts_prediction_forward.6
= control target key start
LH: loop header
LB: loop body
LE: loop exit
PB: predicated region body
PF: predicated region fallthrough
CT: control target
= control target key end

     0   :  { %vm113_vm0 = vcmask 1041408   ;;  %v676_v2 = vmov 0   ;;  %vm37_vm1 = vcmask 1040384   ;;  %vm38_vm2 = vsmask.f32 256  ;;  %s793_s1 = inlined_call_operand.vmem [shape: bf16[12,512], index: 1, kind: input, shape index: {}]   ;;  %s794_s0 = inlined_call_operand.vmem [shape: f32[2,8,4], index: 0, kind: input, shape index: {}]   ;;  %s795_s2 = inlined_call_operand.vmem [shape: f32[1,512], index: 2, kind: input, shape index: {}]   ;;  %s796_s3 = inlined_call_operand.vmem [shape: bf16[2,8,512], index: 3, kind: output, shape index: {0}]   ;;  %s797_s4 = inlined_call_operand.vmem [shape: f32[1,2,512], index: 4, kind: output, shape index: {1}]  }
   0x1   :  { %v47_v0 = vld [vmem:[%s793_s1] sm:$0xff]  ;;  %v48_v1 = vld [vmem:[%s793_s1 + $0x8] sm:$0xff]  ;;  %158 = vmatprep.mubr.bf16.mxu0 %v676_v2  ;;  %201 = vmatprep.mubr.bf16.mxu1 %v676_v2  ;;  %vm42_vm3 = vcmask 1044480   ;;  %vm43_vm4 = vsmask.f32 4352  ;;  %vm39_vm5 = vmand %vm37_vm1, %vm38_vm2  ;;  %vm109_vm10 = vcmask 31744  }
   0x2   :  { %v17_v3 = vld [vmem:[%s794_s0] sm:$0xff]  ;;  %v619_v4 = vcombine.high %v47_v0, %v47_v0  ;;  %v621_v5 = vcombine.high %v48_v1, %v48_v1  ;;  %v714_v6 = vcombine.low %v47_v0, %v47_v0  ;;  %v716_v7 = vcombine.low %v48_v1, %v48_v1  ;;  %v18_v8 = vld [vmem:[%s794_s0 + $0x8] sm:$0xff]  ;;  %vm44_vm6 = vmand %vm42_vm3, %vm43_vm4 }
   0x3   :  { %v19_v9 = vpack.c.bf16 %v17_v3, %v17_v3  ;;  %v20_v10 = vpack.c.bf16 %v18_v8, %v18_v8  ;;  %vm61_vm7 = vsmask.f32 3328  ;;  %vm62_vm8 = vsmask.f32 7440  ;;  %v49_v50 = vld [vmem:[%s793_s1 + $0x10] sm:$0x33] }
   0x4   :  { %v106_v11 = vrot.slane %v619_v4, 2  ;;  %v108_v12 = vrot.slane %v621_v5, 2  ;;  %v105_v13 = vrot.slane %v714_v6, 2  ;;  %v107_v14 = vrot.slane %v716_v7, 2  ;;  %vm63_vm9 = vmor %vm61_vm7, %vm62_vm8  ;;  %v50_v51 = vld [vmem:[%s793_s1 + $0x18] sm:$0x33] }
   0x5   :  { %v22_v15 = vshrl.u32 %v19_v9, 16  ;;  %v25_v16 = vshll.u32 %v19_v9, 16  ;;  %v29_v17 = vshrl.u32 %v20_v10, 16  ;;  %v32_v18 = vshll.u32 %v20_v10, 16 }
   0x6   :  { %622 = vmatprep.subr.msk.bf16.mxu0 %vm113_vm0, %v106_v11  ;;  %624 = vmatprep.subr.msk.bf16.mxu1 %vm113_vm0, %v108_v12  ;;  %v115_v19 = vsel %vm113_vm0, %v105_v13, 0  ;;  %v121_v20 = vsel %vm113_vm0, %v107_v14, 0  ;;  %v217_v54 = vsel %vm113_vm0, %v714_v6, 0  ;;  %v223_v55 = vsel %vm113_vm0, %v716_v7, 0  ;;  %v447_v11 = vld [vmem:[%s795_s2] sm:$0xf] }
   0x7   :  { %127 = vmatpush1.bf16.msra.mxu0 %v115_v19  ;;  %170 = vmatpush1.bf16.msra.mxu1 %v121_v20  ;;  %v24_v21 = vrot.slane %v22_v15, 7  ;;  %v31_v22 = vrot.slane %v29_v17, 7  ;;  %v635_v56 = vcombine.high %v49_v50, %v49_v50  ;;  %v637_v57 = vcombine.high %v50_v51, %v50_v51 }
   0x8   :  { %627 = vmatprep.subr.msk.bf16.mxu0 %vm113_vm0, %v619_v4  ;;  %629 = vmatprep.subr.msk.bf16.mxu1 %vm113_vm0, %v621_v5  ;;  %v634_v58 = vcombine.low %v49_v50, %v49_v50  ;;  %v636_v59 = vcombine.low %v50_v51, %v50_v51  ;;  %vm314_vm11 = vcmask 1042432   ;;  %vm315_vm12 = vcmask 1046532  }
   0x9   :  { %v27_v23 = vor.u32 %v25_v16, %v24_v21  ;;  %v34_v24 = vor.u32 %v32_v18, %v31_v22  ;;  %vm316_vm13 = vmor %vm314_vm11, %vm315_vm12  ;;  %v449_v7 = vlaneseq }
   0xa   :  { %v342_v61 = vsel %vm113_vm0, %v634_v58, 0  ;;  %v348_v62 = vsel %vm113_vm0, %v636_v59, 0 }
   0xb   :  { %v40_v25 = vsel %vm39_vm5, 0, %v27_v23  ;;  %v41_v26 = vsel %vm39_vm5, 0, %v34_v24  ;;  %v755_v8 = vshrl.u32 %v449_v7, 7 }
   0xc   :  { %v45_v27 = vsel %vm44_vm6, %v40_v25, 0  ;;  %v46_v28 = vsel %vm44_vm6, %v41_v26, 0 }
   0xd   :  { %v613_v29 = vcombine.low %v45_v27, %v45_v27  ;;  %v614_v30 = vcombine.high %v45_v27, %v45_v27  ;;  %v615_v31 = vcombine.low %v46_v28, %v46_v28  ;;  %v616_v32 = vcombine.high %v46_v28, %v46_v28 }
   0xe   :  { %v626_v60 = vcombine.low %v45_v27, %v46_v28  ;;  %v451_v9 = vsub.s32 0, %v755_v8  ;;  %v459_v10 = vsub.s32 2, %v755_v8  ;;  %v463_v12 = vsub.s32 3, %v755_v8 }
   0xf   :  { %v65_v33 = vshrl.u32 %v613_v29, 16  ;;  %v68_v34 = vshll.u32 %v613_v29, 16  ;;  %v74_v35 = vshll.u32 %v614_v30, 16  ;;  %v79_v36 = vshrl.u32 %v615_v31, 16 }
  0x10   :  { %v82_v37 = vshll.u32 %v615_v31, 16  ;;  %v88_v38 = vshll.u32 %v616_v32, 16  ;;  %v631_v63 = vrot.slane %v613_v29, 9  ;;  %v319_v0 = vrot.slane %v614_v30, 5 }
  0x11   :  { %v67_v39 = vrot.slane %v65_v33, 4  ;;  %v70_v40 = vrot.slane %v68_v34, 5  ;;  %v81_v41 = vrot.slane %v79_v36, 4  ;;  %v76_v44 = vrot.slane %v74_v35, 5 }
  0x12   :  { %v84_v42 = vrot.slane %v82_v37, 5  ;;  %v90_v46 = vrot.slane %v88_v38, 5  ;;  %v632_v1 = vrot.slane %v615_v31, 9  ;;  %v323_v3 = vrot.slane %v616_v32, 5 }
  0x13   :  { %v71_v43 = vor.u32 %v70_v40, %v67_v39  ;;  %v320_v4 = vsel %vm316_vm13, %v631_v63, %v319_v0  ;;  %v452_v13 = vrot.slane %v447_v11, %v451_v9  ;;  %v460_v14 = vrot.slane %v447_v11, %v459_v10 }
  0x14   :  { %v85_v45 = vor.u32 %v84_v42, %v81_v41  ;;  %v324_v5 = vsel %vm316_vm13, %v632_v1, %v323_v3  ;;  %v464_v16 = vrot.slane %v447_v11, %v463_v12  ;;  %v677_v30 = vmov 1983009808  }
  0x15   :  { %v72_v47 = vrot.slane %v71_v43, 4  ;;  %v633_v6 = vcombine.low %v320_v4, %v324_v5  ;;  %v766_v31 = vunpack.c.l.s4 %v677_v30 }
  0x16   :  { %v86_v48 = vrot.slane %v85_v45, 4 }
  0x17   :  { %v77_v49 = vsel %vm63_vm9, %v72_v47, %v76_v44 }
  0x18   :  { %v91_v52 = vsel %vm63_vm9, %v86_v48, %v90_v46 }
  0x19   :  { %v617_v53 = vcombine.low %v77_v49, %v91_v52 }
  0x1b   :  { %623 = vmatmul.mubr.msk.bf16.vlgmr.msra.gmra.mrb[0].mxu0 %vm109_vm10, %v617_v53  ;;  %625 = vmatmul.mubr.msk.bf16.vlgmr.msra.gmra.mrb[0].mxu1 %vm109_vm10, %v617_v53 }
  0x1c   :  { %229 = vmatpush1.bf16.msra.mxu0 %v217_v54  ;;  %272 = vmatpush1.bf16.msra.mxu1 %v223_v55 }
  0x1d   :  { %260 = vmatprep.mubr.bf16.mxu0 %v676_v2  ;;  %303 = vmatprep.mubr.bf16.mxu1 %v676_v2 }
  0x1e   :  { %638 = vmatprep.subr.msk.bf16.mxu0 %vm113_vm0, %v635_v56  ;;  %640 = vmatprep.subr.msk.bf16.mxu1 %vm113_vm0, %v637_v57 }
  0x27   :  { %628 = vmatmul.mubr.msk.bf16.vlgmr.msra.gmra.mrb[0].mxu0 %vm109_vm10, %v626_v60  ;;  %630 = vmatmul.mubr.msk.bf16.vlgmr.msra.gmra.mrb[0].mxu1 %vm109_vm10, %v626_v60 }
  0x28   :  { %354 = vmatpush1.bf16.msra.mxu0 %v342_v61  ;;  %397 = vmatpush1.bf16.msra.mxu1 %v348_v62 }
  0x29   :  { %385 = vmatprep.mubr.bf16.mxu0 %v676_v2  ;;  %428 = vmatprep.mubr.bf16.mxu1 %v676_v2  ;;  %v455_v2 = vsub.s32 1, %v755_v8 }
  0x2b   :  { %v456_v15 = vrot.slane %v447_v11, %v455_v2 }
  0x33   :  { %639 = vmatmul.mubr.msk.bf16.vlgmr.msra.gmra.mrb[0].mxu0 %vm109_vm10, %v633_v6  ;;  %641 = vmatmul.mubr.msk.bf16.vlgmr.msra.gmra.mrb[0].mxu1 %vm109_vm10, %v633_v6 }
 0x106   :  { %v387_v17 = vpop.f32.mrb[0].mxu0  ;;  %v430_v18 = vpop.f32.mrb[0].mxu1 }
 0x107   :  { %v469_v19 = vadd.f32 %v452_v13, %v387_v17  ;;  %v471_v20 = vadd.f32 %v460_v14, %v430_v18  ;;  %v389_v21 = vpop.f32.mrb[1].mxu0  ;;  %v432_v22 = vpop.f32.mrb[1].mxu1 }
 0x108   :  { %v470_v23 = vadd.f32 %v456_v15, %v389_v21  ;;  %v472_v24 = vadd.f32 %v464_v16, %v432_v22  ;;  %v391_v25 = vpop.f32.mrb[2].mxu0  ;;  %v434_v26 = vpop.f32.mrb[2].mxu1 }
 0x109   :  { %v473_v27 = vadd.f32 %v452_v13, %v391_v25  ;;  %v764_v28 = vadd.f32 %v460_v14, %v434_v26  ;;  %v393_v29 = vpop.f32.mrb[3].mxu0  ;;  %v436_v32 = vpop.f32.mrb[3].mxu1  ;;  %v505_v33 = vmul.f32 %v469_v19, %v469_v19  ;;  %v507_v34 = vmul.f32 %v471_v20, %v471_v20 }
 0x10a   :  { %v646_v35 = vpack.c.bf16 %v470_v23, %v469_v19  ;;  %v647_v36 = vpack.c.bf16 %v472_v24, %v471_v20  ;;  %v506_v41 = vmul.f32 %v470_v23, %v470_v23  ;;  %v508_v42 = vmul.f32 %v472_v24, %v472_v24 }
 0x10b   :  { %v477_v37 = vadd.f32 %v473_v27, %v469_v19  ;;  %v509_v38 = vmul.f32 %v473_v27, %v473_v27  ;;  %v491_v39 = vadd.f32 %v764_v28, %v471_v20  ;;  %v511_v40 = vmul.f32 %v764_v28, %v764_v28 }
 0x10c   :  { %601 = vst [vmem:[%s796_s3] sm:$0xff] %v646_v35  ;;  %602 = vst [vmem:[%s796_s3 + $0x8] sm:$0xff] %v647_v36  ;;  %v474_v43 = vadd.f32 %v456_v15, %v393_v29  ;;  %v476_v44 = vadd.f32 %v464_v16, %v436_v32 }
 0x10d   :  { %v478_v45 = vrot.slane %v477_v37, 4  ;;  %v513_v46 = vadd.f32 %v509_v38, %v505_v33  ;;  %v492_v47 = vrot.slane %v491_v39, 4  ;;  %v527_v48 = vadd.f32 %v511_v40, %v507_v34 }
 0x10e   :  { %v484_v49 = vadd.f32 %v474_v43, %v470_v23  ;;  %v510_v50 = vmul.f32 %v474_v43, %v474_v43  ;;  %v648_v51 = vpack.c.bf16 %v474_v43, %v473_v27  ;;  %v498_v52 = vadd.f32 %v476_v44, %v472_v24 }
 0x10f   :  { %v479_v53 = vadd.f32 %v478_v45, %v477_v37  ;;  %v514_v54 = vrot.slane %v513_v46, 4  ;;  %v493_v55 = vadd.f32 %v492_v47, %v491_v39  ;;  %v528_v56 = vrot.slane %v527_v48, 4 }
 0x110   :  { %v485_v57 = vrot.slane %v484_v49, 4  ;;  %v520_v58 = vadd.f32 %v510_v50, %v506_v41  ;;  %603 = vst [vmem:[%s796_s3 + $0x10] sm:$0xff] %v648_v51  ;;  %v499_v59 = vrot.slane %v498_v52, 4  ;;  %v512_v60 = vmul.f32 %v476_v44, %v476_v44 }
 0x111   :  { %v480_v61 = vrot.slane %v479_v53, 2  ;;  %v515_v62 = vadd.f32 %v514_v54, %v513_v46  ;;  %v494_v63 = vrot.slane %v493_v55, 2  ;;  %v529_v0 = vadd.f32 %v528_v56, %v527_v48 }
 0x112   :  { %v486_v1 = vadd.f32 %v485_v57, %v484_v49  ;;  %v521_v3 = vrot.slane %v520_v58, 4  ;;  %v500_v4 = vadd.f32 %v499_v59, %v498_v52  ;;  %v534_v5 = vadd.f32 %v512_v60, %v508_v42 }
 0x113   :  { %v481_v6 = vadd.f32 %v480_v61, %v479_v53  ;;  %v516_v7 = vrot.slane %v515_v62, 2  ;;  %v495_v9 = vadd.f32 %v494_v63, %v493_v55  ;;  %v530_v10 = vrot.slane %v529_v0, 2 }
 0x114   :  { %v487_v11 = vrot.slane %v486_v1, 2  ;;  %v522_v2 = vadd.f32 %v521_v3, %v520_v58  ;;  %v501_v12 = vrot.slane %v500_v4, 2  ;;  %v535_v13 = vrot.slane %v534_v5, 4 }
 0x115   :  { %v482_v14 = vrot.slane %v481_v6, 1  ;;  %v517_v15 = vadd.f32 %v516_v7, %v515_v62  ;;  %v496_v16 = vrot.slane %v495_v9, 1  ;;  %v531_v17 = vadd.f32 %v530_v10, %v529_v0 }
 0x116   :  { %v488_v18 = vadd.f32 %v487_v11, %v486_v1  ;;  %v523_v19 = vrot.slane %v522_v2, 2  ;;  %v502_v20 = vadd.f32 %v501_v12, %v500_v4  ;;  %v536_v21 = vadd.f32 %v535_v13, %v534_v5 }
 0x117   :  { %v518_v22 = vrot.slane %v517_v15, 1  ;;  %v532_v23 = vrot.slane %v531_v17, 1  ;;  %v554_v24 = vunpack.c.0.s8 %v766_v31  ;;  %v483_v25 = vadd.f32 %v482_v14, %v481_v6 }
 0x118   :  { %v489_v26 = vrot.slane %v488_v18, 1  ;;  %v524_v27 = vadd.f32 %v523_v19, %v522_v2  ;;  %v537_v29 = vrot.slane %v536_v21, 2  ;;  %v497_v32 = vadd.f32 %v496_v16, %v495_v9 }
 0x119   :  { %v519_v30 = vadd.f32 %v518_v22, %v517_v15  ;;  %v533_v33 = vadd.f32 %v532_v23, %v531_v17  ;;  %v649_v34 = vpack.c.bf16 %v476_v44, %v764_v28  ;;  %v503_v36 = vrot.slane %v502_v20, 1 }
 0x11a   :  { %v525_v35 = vrot.slane %v524_v27, 1  ;;  %v538_v37 = vadd.f32 %v537_v29, %v536_v21  ;;  %v490_v31 = vadd.f32 %v489_v26, %v488_v18  ;;  %v557_v42 = vsub.s32 %v554_v24, %v755_v8 }
 0x11b   :  { %v542_v38 = vsel %vm37_vm1, %v483_v25, %v519_v30  ;;  %v544_v39 = vsel %vm37_vm1, %v497_v32, %v533_v33  ;;  %604 = vst [vmem:[%s796_s3 + $0x18] sm:$0xff] %v649_v34  ;;  %v504_v45 = vadd.f32 %v503_v36, %v502_v20 }
 0x11c   :  { %v526_v40 = vadd.f32 %v525_v35, %v524_v27  ;;  %v539_v41 = vrot.slane %v538_v37, 1 }
 0x11e   :  { %v543_v43 = vsel %vm37_vm1, %v490_v31, %v526_v40  ;;  %v540_v28 = vadd.f32 %v539_v41, %v538_v37 }
 0x11f   :  { %v550_v44 = vcombine.low %v542_v38, %v543_v43 }
 0x120   :  { %v545_v46 = vsel %vm37_vm1, %v504_v45, %v540_v28 }
 0x121   :  { %v558_v47 = vrot.slane %v550_v44, %v557_v42  ;;  %v551_v48 = vcombine.low %v544_v39, %v545_v46 }
 0x123   :  { %v565_v49 = vrot.slane %v551_v48, %v557_v42 }
 0x125   :  { %v566_v50 = vcombine.low %v558_v47, %v565_v49 }
 0x127   :  { %568 = vst [vmem:[%s797_s4] sm:$0xff] %v566_v50 }

// kernel: ts_prediction_forward.8
= control target key start
LH: loop header
LB: loop body
LE: loop exit
PB: predicated region body
PF: predicated region fallthrough
CT: control target
= control target key end

     0   :  { %v938_v40 = vmov 1966171168   ;;  %v42_v42 = vlaneseq  ;;  %v939_v45 = vmov 857870592   ;;  %vm141_vm0 = vcmask 1040384   ;;  %s1164_s4 = inlined_call_operand.vmem [shape: bf16[768,128], index: 4, kind: input, shape index: {}]   ;;  %s1165_s1 = inlined_call_operand.vmem [shape: f32[1,2,256], index: 1, kind: input, shape index: {}]   ;;  %s1166_s2 = inlined_call_operand.vmem [shape: f32[1,256], index: 2, kind: input, shape index: {}]   ;;  %s1167_s0 = inlined_call_operand.vmem [shape: bf16[2,8,256], index: 0, kind: input, shape index: {}]   ;;  %s1168_s3 = inlined_call_operand.vmem [shape: f32[1,256], index: 3, kind: input, shape index: {}]   ;;  %s1169_s5 = inlined_call_operand.vmem [shape: f32[1,128], index: 5, kind: input, shape index: {}]   ;;  %s1170_s6 = inlined_call_operand.vmem [shape: bf16[2,8,128], index: 6, kind: output, shape index: {0}]   ;;  %s1171_s7 = inlined_call_operand.vmem [shape: f32[1,2,128], index: 7, kind: output, shape index: {1}]  }
   0x1   :  { %v888_v0 = vld [vmem:[%s1164_s4 + $0x40] sm:$0xff]   ;;  %v890_v2 = vld [vmem:[%s1164_s4 + $0x48] sm:$0xff]   ;;  %v893_v5 = vld [vmem:[%s1164_s4 + $0x50] sm:$0xff]   ;;  %v40_v41 = vunpack.c.l.s4 %v938_v40  ;;  %v52_v46 = vunpack.c.l.s4 %v939_v45  ;;  %vm142_vm1 = vsmask.f32 256  ;;  %vm148_vm2 = vcmask 1044480  }
   0x2   :  { %v889_v1 = vld [vmem:[%s1164_s4] sm:$0xff]   ;;  %820 = vmatprep.subr.bf16.mxu0 %v888_v0  ;;  %v891_v3 = vld [vmem:[%s1164_s4 + $0x8] sm:$0xff]   ;;  %v895_v7 = vld [vmem:[%s1164_s4 + $0x10] sm:$0xff]   ;;  %v43_v44 = vshrl.u32 %v42_v42, 7  ;;  %vm149_vm3 = vsmask.f32 4352 }
   0x3   :  { %821 = vmatpush3.bf16.msra.mxu0 %v889_v1  ;;  %v892_v4 = vld [vmem:[%s1164_s4 + $0xc0] sm:$0xff]   ;;  %v896_v8 = vld [vmem:[%s1164_s4 + $0xc8] sm:$0xff]   ;;  %v897_v9 = vld [vmem:[%s1164_s4 + $0x58] sm:$0xff]   ;;  %v41_v43 = vunpack.c.0.s8 %v40_v41  ;;  %v53_v48 = vunpack.c.0.s8 %v52_v46 }
   0x4   :  { %822 = vmatprep.subr.bf16.mxu0 %v890_v2  ;;  %842 = vmatprep.subr.bf16.mxu1 %v892_v4  ;;  %v894_v6 = vld [vmem:[%s1164_s4 + $0x80] sm:$0xff]   ;;  %v898_v10 = vld [vmem:[%s1164_s4 + $0x88] sm:$0xff]   ;;  %v899_v11 = vld [vmem:[%s1164_s4 + $0x18] sm:$0xff]   ;;  %v82_v54 = vsub.s32 1, %v43_v44  ;;  %v78_v57 = vsub.s32 0, %v43_v44 }
   0x5   :  { %843 = vmatpush3.bf16.msra.mxu1 %v894_v6  ;;  %v900_v12 = vld [vmem:[%s1164_s4 + $0xd0] sm:$0xff]   ;;  %v901_v13 = vld [vmem:[%s1164_s4 + $0x60] sm:$0xff]   ;;  %v904_v16 = vld [vmem:[%s1164_s4 + $0xd8] sm:$0xff]   ;;  %v44_v47 = vsub.s32 %v41_v43, %v43_v44  ;;  %v56_v53 = vsub.s32 %v53_v48, %v43_v44 }
   0x6   :  { %844 = vmatprep.subr.bf16.mxu1 %v896_v8  ;;  %v902_v14 = vld [vmem:[%s1164_s4 + $0x90] sm:$0xff]   ;;  %v903_v15 = vld [vmem:[%s1164_s4 + $0x20] sm:$0xff]   ;;  %v905_v17 = vld [vmem:[%s1164_s4 + $0x68] sm:$0xff]  }
   0x7   :  { %823 = vmatpush3.bf16.msra.mxu0 %v891_v3  ;;  %v906_v18 = vld [vmem:[%s1164_s4 + $0x98] sm:$0xff]   ;;  %v907_v19 = vld [vmem:[%s1164_s4 + $0x28] sm:$0xff]   ;;  %v908_v20 = vld [vmem:[%s1164_s4 + $0xe0] sm:$0xff]  }
   0x8   :  { %824 = vmatprep.subr.bf16.mxu0 %v893_v5  ;;  %v909_v21 = vld [vmem:[%s1164_s4 + $0x70] sm:$0xff]   ;;  %v910_v22 = vld [vmem:[%s1164_s4 + $0xa0] sm:$0xff]   ;;  %v912_v24 = vld [vmem:[%s1164_s4 + $0xe8] sm:$0xff]  }
   0x9   :  { %845 = vmatpush3.bf16.msra.mxu1 %v898_v10  ;;  %v911_v23 = vld [vmem:[%s1164_s4 + $0x30] sm:$0xff]   ;;  %v913_v25 = vld [vmem:[%s1164_s4 + $0x78] sm:$0xff]   ;;  %v914_v26 = vld [vmem:[%s1164_s4 + $0xa8] sm:$0xff]  }
   0xa   :  { %846 = vmatprep.subr.bf16.mxu1 %v900_v12  ;;  %v915_v27 = vld [vmem:[%s1164_s4 + $0x38] sm:$0xff]   ;;  %v916_v28 = vld [vmem:[%s1164_s4 + $0xf0] sm:$0xff]   ;;  %v26_v29 = vld [vmem:[%s1165_s1] sm:$0xf] }
   0xb   :  { %825 = vmatpush3.bf16.msra.mxu0 %v895_v7  ;;  %v28_v30 = vmul.f32 0.0625, %v26_v29  ;;  %v917_v31 = vld [vmem:[%s1164_s4 + $0xb0] sm:$0xff]   ;;  %v918_v33 = vld [vmem:[%s1164_s4 + $0x140] sm:$0xff]   ;;  %v920_v35 = vld [vmem:[%s1164_s4 + $0xf8] sm:$0xff]  }
   0xc   :  { %826 = vmatprep.subr.bf16.mxu0 %v897_v9  ;;  %v921_v37 = vld [vmem:[%s1164_s4 + $0xb8] sm:$0xff]   ;;  %v35_v51 = vld [vmem:[%s1166_s2] sm:$0x3]  ;;  %v71_v58 = vld [vmem:[%s1167_s0 + $0x8] sm:$0xff] }
   0xd   :  { %847 = vmatpush3.bf16.msra.mxu1 %v902_v14  ;;  %v29_v32 = vmul.f32 %v28_v30, %v28_v30  ;;  %v70_v56 = vld [vmem:[%s1167_s0] sm:$0xff]  ;;  %v74_v0 = vunpack.c.l.bf16 %v71_v58  ;;  %v75_v1 = vunpack.c.h.bf16 %v71_v58  ;;  %vm1095_vm4 = vmand %vm141_vm0, %vm142_vm1 }
   0xe   :  { %848 = vmatprep.subr.bf16.mxu1 %v904_v16  ;;  %v72_v60 = vunpack.c.l.bf16 %v70_v56  ;;  %v73_v61 = vunpack.c.h.bf16 %v70_v56  ;;  %v49_v3 = vld [vmem:[%s1168_s3] sm:$0x3]  ;;  %vm150_vm5 = vmand %vm148_vm2, %vm149_vm3 }
   0xf   :  { %827 = vmatpush3.bf16.msra.mxu0 %v899_v11  ;;  %v31_v34 = vrot.slane %v29_v32, 7  ;;  %v919_v46 = vld [vmem:[%s1164_s4 + $0x100] sm:$0xff]  }
  0x10   :  { %828 = vmatprep.subr.bf16.mxu0 %v901_v13 }
  0x11   :  { %849 = vmatpush3.bf16.msra.mxu1 %v906_v18  ;;  %v33_v36 = vsub.f32 %v28_v30, %v31_v34 }
  0x12   :  { %850 = vmatprep.subr.bf16.mxu1 %v908_v20 }
  0x13   :  { %829 = vmatpush3.bf16.msra.mxu0 %v903_v15  ;;  %v34_v38 = vmax.f32 %v33_v36, 0.0 }
  0x14   :  { %830 = vmatprep.subr.bf16.mxu0 %v905_v17 }
  0x15   :  { %851 = vmatpush3.bf16.msra.mxu1 %v910_v22  ;;  %v36_v39 = vadd.f32 1e-05, %v34_v38 }
  0x16   :  { %852 = vmatprep.subr.bf16.mxu1 %v912_v24 }
  0x17   :  { %831 = vmatpush3.bf16.msra.mxu0 %v907_v19  ;;  %936 = vrsqrt.f32 %v36_v39 }
  0x18   :  { %832 = vmatprep.subr.bf16.mxu0 %v909_v21 }
  0x19   :  { %853 = vmatpush3.bf16.msra.mxu1 %v914_v26 }
  0x1a   :  { %854 = vmatprep.subr.bf16.mxu1 %v916_v28 }
  0x1b   :  { %833 = vmatpush3.bf16.msra.mxu0 %v911_v23 }
  0x1c   :  { %834 = vmatprep.subr.bf16.mxu0 %v913_v25 }
  0x1d   :  { %855 = vmatpush3.bf16.msra.mxu1 %v917_v31 }
  0x1e   :  { %856 = vmatprep.subr.bf16.mxu1 %v920_v35 }
  0x1f   :  { %835 = vmatpush3.bf16.msra.mxu0 %v915_v27 }
  0x20   :  { %864 = vmatprep.subr.bf16.mxu0 %v918_v33 }
  0x21   :  { %857 = vmatpush3.bf16.msra.mxu1 %v921_v37  ;;  %v937_v49 = vpop.eup %936 }
  0x22   :  { %v45_v50 = vrot.slane %v937_v49, %v44_v47  ;;  %v922_v49 = vld [vmem:[%s1164_s4 + $0x148] sm:$0xff]  }
  0x24   :  { %v46_v52 = vcombine.high %v45_v50, %v45_v50 }
  0x26   :  { %v48_v55 = vmul.f32 %v46_v52, %v35_v51 }
  0x28   :  { %v57_v59 = vrot.slane %v48_v55, %v56_v53  ;;  %v83_v62 = vrot.slane %v48_v55, %v82_v54  ;;  %v79_v2 = vrot.slane %v48_v55, %v78_v57 }
  0x2a   :  { %v59_v63 = vmul.f32 %v57_v59, %v28_v30  ;;  %v87_v5 = vmul.f32 %v83_v62, %v73_v61  ;;  %v89_v7 = vmul.f32 %v83_v62, %v75_v1  ;;  %v86_v8 = vmul.f32 %v79_v2, %v72_v60  ;;  %v923_v61 = vld [vmem:[%s1164_s4 + $0x108] sm:$0xff]  }
  0x2b   :  { %v88_v9 = vmul.f32 %v79_v2, %v74_v0  ;;  %v924_v2 = vld [vmem:[%s1164_s4 + $0x150] sm:$0xff]  }
  0x2c   :  { %v67_v4 = vrot.slane %v59_v63, %v44_v47 }
  0x2e   :  { %v69_v6 = vsub.f32 %v49_v3, %v67_v4 }
  0x30   :  { %v98_v10 = vrot.slane %v69_v6, %v82_v54  ;;  %v94_v11 = vrot.slane %v69_v6, %v78_v57 }
  0x32   :  { %v102_v12 = vadd.f32 %v98_v10, %v87_v5  ;;  %v104_v13 = vadd.f32 %v98_v10, %v89_v7  ;;  %v101_v14 = vadd.f32 %v94_v11, %v86_v8  ;;  %v103_v15 = vadd.f32 %v94_v11, %v88_v9  ;;  %v925_v8 = vld [vmem:[%s1164_s4 + $0x110] sm:$0xff]   ;;  %v926_v9 = vld [vmem:[%s1164_s4 + $0x158] sm:$0xff]   ;;  %v928_v11 = vld [vmem:[%s1164_s4 + $0x160] sm:$0xff]  }
  0x33   :  { %v927_v10 = vld [vmem:[%s1164_s4 + $0x118] sm:$0xff]  }
  0x34   :  { %v106_v16 = vpack.c.bf16 %v102_v12, %v102_v12  ;;  %v108_v17 = vpack.c.bf16 %v104_v13, %v104_v13  ;;  %v105_v18 = vpack.c.bf16 %v101_v14, %v101_v14  ;;  %v107_v19 = vpack.c.bf16 %v103_v15, %v103_v15  ;;  %v929_v12 = vld [vmem:[%s1164_s4 + $0x120] sm:$0xff]   ;;  %v930_v13 = vld [vmem:[%s1164_s4 + $0x168] sm:$0xff]   ;;  %v932_v15 = vld [vmem:[%s1164_s4 + $0x170] sm:$0xff]  }
  0x35   :  { %v931_v14 = vld [vmem:[%s1164_s4 + $0x128] sm:$0xff]  }
  0x36   :  { %v117_v20 = vshrl.u32 %v106_v16, 16  ;;  %v120_v21 = vshll.u32 %v106_v16, 16  ;;  %v131_v22 = vshrl.u32 %v108_v17, 16  ;;  %v134_v23 = vshll.u32 %v108_v17, 16  ;;  %v933_v16 = vld [vmem:[%s1164_s4 + $0x130] sm:$0xff]   ;;  %v934_v17 = vld [vmem:[%s1164_s4 + $0x178] sm:$0xff]  }
  0x37   :  { %v110_v24 = vshrl.u32 %v105_v18, 16  ;;  %v113_v25 = vshll.u32 %v105_v18, 16  ;;  %v124_v26 = vshrl.u32 %v107_v19, 16  ;;  %v127_v27 = vshll.u32 %v107_v19, 16 }
  0x38   :  { %v119_v28 = vrot.slane %v117_v20, 7  ;;  %v133_v29 = vrot.slane %v131_v22, 7  ;;  %v935_v20 = vld [vmem:[%s1164_s4 + $0x138] sm:$0xff]  }
  0x39   :  { %v112_v31 = vrot.slane %v110_v24, 7  ;;  %v126_v32 = vrot.slane %v124_v26, 7 }
  0x3a   :  { %v122_v33 = vor.u32 %v120_v21, %v119_v28  ;;  %v136_v34 = vor.u32 %v134_v23, %v133_v29  ;;  %v760_v28 = vld [vmem:[%s1169_s5] ss:$0 sm:$0xff] }
  0x3b   :  { %v115_v35 = vor.u32 %v113_v25, %v112_v31  ;;  %v129_v36 = vor.u32 %v127_v27, %v126_v32 }
  0x3c   :  { %v145_v37 = vsel %vm1095_vm4, 0, %v122_v33  ;;  %v147_v38 = vsel %vm1095_vm4, 0, %v136_v34 }
  0x3d   :  { %v152_v39 = vsel %vm150_vm5, %v145_v37, 0  ;;  %v154_v40 = vsel %vm150_vm5, %v147_v38, 0  ;;  %v144_v41 = vsel %vm1095_vm4, 0, %v115_v35  ;;  %v146_v42 = vsel %vm1095_vm4, 0, %v129_v36 }
  0x3e   :  { %v762_v43 = vcombine.low %v152_v39, %v154_v40  ;;  %v151_v44 = vsel %vm150_vm5, %v144_v41, 0  ;;  %v153_v45 = vsel %vm150_vm5, %v146_v42, 0  ;;  %v163_v47 = vshrl.u32 %v152_v39, 16 }
  0x3f   :  { %v761_v48 = vcombine.low %v151_v44, %v153_v45  ;;  %v165_v50 = vshll.u32 %v152_v39, 16  ;;  %v177_v51 = vshrl.u32 %v154_v40, 16  ;;  %v179_v52 = vshll.u32 %v154_v40, 16 }
  0x40   :  { %638 = vmatprep.mubr.bf16.mxu0 %v762_v43  ;;  %v156_v53 = vshrl.u32 %v151_v44, 16  ;;  %v158_v54 = vshll.u32 %v151_v44, 16  ;;  %v170_v55 = vshrl.u32 %v153_v45, 16  ;;  %v172_v56 = vshll.u32 %v153_v45, 16 }
  0x41   :  { %639 = vmatmul.mubr.bf16.vlgmr.msra.gmra.mrb[0].mxu0 %v761_v48  ;;  %v167_v57 = vrot.slane %v165_v50, 1  ;;  %v181_v58 = vrot.slane %v179_v52, 1  ;;  %v188_v59 = vrot.slane %v152_v39, 1  ;;  %v190_v60 = vrot.slane %v154_v40, 1 }
  0x42   :  { %865 = vmatpush3.bf16.msra.mxu0 %v919_v46  ;;  %v160_v62 = vrot.slane %v158_v54, 1  ;;  %v174_v63 = vrot.slane %v172_v56, 1  ;;  %v187_v18 = vrot.slane %v151_v44, 1  ;;  %v189_v19 = vrot.slane %v153_v45, 1 }
  0x43   :  { %866 = vmatprep.subr.bf16.mxu0 %v922_v49  ;;  %v168_v0 = vor.u32 %v167_v57, %v163_v47  ;;  %v182_v1 = vor.u32 %v181_v58, %v177_v51  ;;  %v766_v3 = vcombine.low %v188_v59, %v190_v60 }
  0x44   :  { %v161_v4 = vor.u32 %v160_v62, %v156_v53  ;;  %v175_v5 = vor.u32 %v174_v63, %v170_v55  ;;  %v765_v21 = vcombine.low %v187_v18, %v189_v19 }
  0x45   :  { %v764_v6 = vcombine.low %v168_v0, %v182_v1  ;;  %720 = vmatprep.mubr.bf16.mxu0 %v766_v3 }
  0x46   :  { %867 = vmatpush3.bf16.msra.mxu0 %v923_v61  ;;  %v763_v7 = vcombine.low %v161_v4, %v175_v5 }
  0x47   :  { %679 = vmatprep.mubr.bf16.mxu1 %v764_v6  ;;  %868 = vmatprep.subr.bf16.mxu0 %v924_v2 }
  0x48   :  { %680 = vmatmul.mubr.bf16.vlgmr.msra.gmra.mrb[0].mxu1 %v763_v7 }
  0x4a   :  { %869 = vmatpush3.bf16.msra.mxu0 %v925_v8 }
  0x4b   :  { %870 = vmatprep.subr.bf16.mxu0 %v926_v9 }
  0x4e   :  { %871 = vmatpush3.bf16.msra.mxu0 %v927_v10 }
  0x4f   :  { %872 = vmatprep.subr.bf16.mxu0 %v928_v11 }
  0x52   :  { %873 = vmatpush3.bf16.msra.mxu0 %v929_v12 }
  0x53   :  { %874 = vmatprep.subr.bf16.mxu0 %v930_v13 }
  0x56   :  { %875 = vmatpush3.bf16.msra.mxu0 %v931_v14 }
  0x57   :  { %876 = vmatprep.subr.bf16.mxu0 %v932_v15 }
  0x5a   :  { %877 = vmatpush3.bf16.msra.mxu0 %v933_v16 }
  0x5b   :  { %878 = vmatprep.subr.bf16.mxu0 %v934_v17 }
  0x5e   :  { %879 = vmatpush3.bf16.msra.mxu0 %v935_v20 }
  0x61   :  { %721 = vmatmul.mubr.bf16.vlgmr.msra.gmra.mrb[4].mxu0 %v765_v21 }
 0x114   :  { %v836_v22 = vpop.f32.mrb[0].mxu0 }
 0x115   :  { %v837_v23 = vpop.f32.mrb[1].mxu0 }
 0x116   :  { %v838_v24 = vadd.f32 %v837_v23, %v836_v22  ;;  %v839_v25 = vpop.f32.mrb[2].mxu0 }
 0x117   :  { %v840_v26 = vpop.f32.mrb[3].mxu0 }
 0x118   :  { %v841_v27 = vadd.f32 %v840_v26, %v839_v25  ;;  %v641_v31 = vadd.f32 %v838_v24, %v760_v28 }
 0x11a   :  { %v644_v35 = vadd.f32 %v841_v27, %v760_v28 }
 0x11b   :  { %v858_v29 = vpop.f32.mrb[0].mxu1 }
 0x11c   :  { %v859_v30 = vpop.f32.mrb[1].mxu1 }
 0x11d   :  { %v860_v32 = vadd.f32 %v859_v30, %v858_v29  ;;  %v861_v33 = vpop.f32.mrb[2].mxu1 }
 0x11e   :  { %v862_v34 = vpop.f32.mrb[3].mxu1 }
 0x11f   :  { %v682_v36 = vadd.f32 %v860_v32, %v641_v31  ;;  %v863_v37 = vadd.f32 %v862_v34, %v861_v33 }
 0x121   :  { %v685_v38 = vadd.f32 %v863_v37, %v644_v35 }
 0x134   :  { %v880_v39 = vpop.f32.mrb[4].mxu0 }
 0x135   :  { %v881_v40 = vpop.f32.mrb[5].mxu0 }
 0x136   :  { %v882_v41 = vadd.f32 %v881_v40, %v880_v39  ;;  %v883_v42 = vpop.f32.mrb[6].mxu0 }
 0x137   :  { %v884_v43 = vpop.f32.mrb[7].mxu0 }
 0x138   :  { %v723_v44 = vadd.f32 %v882_v41, %v682_v36  ;;  %v885_v45 = vadd.f32 %v884_v43, %v883_v42 }
 0x13a   :  { %v726_v46 = vadd.f32 %v885_v45, %v685_v38  ;;  %v736_v47 = vmul.f32 %v723_v44, %v723_v44 }
 0x13c   :  { %v729_v48 = vadd.f32 %v726_v46, %v723_v44  ;;  %v737_v49 = vmul.f32 %v726_v46, %v726_v46  ;;  %v818_v50 = vpack.c.bf16 %v726_v46, %v723_v44 }
 0x13e   :  { %v730_v51 = vrot.slane %v729_v48, 4  ;;  %v738_v52 = vadd.f32 %v737_v49, %v736_v47  ;;  %819 = vst [vmem:[%s1170_s6] sm:$0xff] %v818_v50  }
 0x140   :  { %v731_v53 = vadd.f32 %v730_v51, %v729_v48  ;;  %v739_v54 = vrot.slane %v738_v52, 4 }
 0x142   :  { %v732_v55 = vrot.slane %v731_v53, 2  ;;  %v740_v56 = vadd.f32 %v739_v54, %v738_v52 }
 0x144   :  { %v733_v57 = vadd.f32 %v732_v55, %v731_v53  ;;  %v741_v58 = vrot.slane %v740_v56, 2 }
 0x146   :  { %v734_v59 = vrot.slane %v733_v57, 1  ;;  %v742_v60 = vadd.f32 %v741_v58, %v740_v56 }
 0x148   :  { %v743_v61 = vrot.slane %v742_v60, 1  ;;  %v735_v62 = vadd.f32 %v734_v59, %v733_v57 }
 0x14a   :  { %v744_v63 = vadd.f32 %v743_v61, %v742_v60 }
 0x14c   :  { %v746_v0 = vsel %vm141_vm0, %v735_v62, %v744_v63 }
 0x14d   :  { %747 = vst [vmem:[%s1171_s7] sm:$0x3] %v746_v0 }

// kernel: ts_prediction_forward.9
= control target key start
LH: loop header
LB: loop body
LE: loop exit
PB: predicated region body
PF: predicated region fallthrough
CT: control target
= control target key end

     0   :  { %v846_v3 = vmov 0   ;;  %s1151_s4 = inlined_call_operand.vmem [shape: bf16[128,1024], index: 4, kind: input, shape index: {}]   ;;  %s1152_s1 = inlined_call_operand.vmem [shape: f32[1,2,128], index: 1, kind: input, shape index: {}]   ;;  %s1153_s0 = inlined_call_operand.vmem [shape: bf16[2,8,128], index: 0, kind: input, shape index: {}]   ;;  %s1154_s2 = inlined_call_operand.vmem [shape: f32[1,128], index: 2, kind: input, shape index: {}]   ;;  %s1155_s3 = inlined_call_operand.vmem [shape: f32[1,128], index: 3, kind: input, shape index: {}]   ;;  %s1156_s5 = inlined_call_operand.vmem [shape: f32[1,1024], index: 5, kind: input, shape index: {}]   ;;  %s1157_s6 = inlined_call_operand.vmem [shape: bf16[2,8,512], index: 6, kind: output, shape index: {0}]   ;;  %s1158_s7 = inlined_call_operand.vmem [shape: bf16[2,8,512], index: 7, kind: output, shape index: {1}]  }
   0x1   :  { %v80_v0 = vld [vmem:[%s1151_s4] sm:$0xff]  ;;  %v81_v2 = vld [vmem:[%s1151_s4 + $0x8] sm:$0xff]  ;;  %538 = vmatprep.mubr.bf16.mxu0 %v846_v3  ;;  %581 = vmatprep.mubr.bf16.mxu1 %v846_v3 }
   0x2   :  { %v84_v1 = vld [vmem:[%s1151_s4 + $0x20] sm:$0xff]  ;;  %v85_v5 = vld [vmem:[%s1151_s4 + $0x28] sm:$0xff] }
   0x3   :  { %v759_v4 = vcombine.high %v80_v0, %v84_v1  ;;  %v758_v6 = vcombine.low %v80_v0, %v84_v1  ;;  %v88_v7 = vld [vmem:[%s1151_s4 + $0x40] sm:$0xff]  ;;  %v761_v9 = vcombine.high %v81_v2, %v85_v5  ;;  %v760_v10 = vcombine.low %v81_v2, %v85_v5  ;;  %v89_v12 = vld [vmem:[%s1151_s4 + $0x48] sm:$0xff] }
   0x4   :  { %v92_v8 = vld [vmem:[%s1151_s4 + $0x60] sm:$0xff]  ;;  %v93_v13 = vld [vmem:[%s1151_s4 + $0x68] sm:$0xff] }
   0x5   :  { %v767_v11 = vcombine.high %v88_v7, %v92_v8  ;;  %v96_v14 = vld [vmem:[%s1151_s4 + $0x80] sm:$0xff]  ;;  %506 = vmatprep.subr.bf16.mxu0 %v759_v4  ;;  %v769_v15 = vcombine.high %v89_v12, %v93_v13  ;;  %v97_v17 = vld [vmem:[%s1151_s4 + $0x88] sm:$0xff]  ;;  %549 = vmatprep.subr.bf16.mxu1 %v761_v9  ;;  %v766_v19 = vcombine.low %v88_v7, %v92_v8  ;;  %v847_v4 = vmov 1966171168  }
   0x6   :  { %v100_v16 = vld [vmem:[%s1151_s4 + $0xa0] sm:$0xff]  ;;  %v101_v18 = vld [vmem:[%s1151_s4 + $0xa8] sm:$0xff]  ;;  %507 = vmatpush1.bf16.msra.mxu0 %v758_v6  ;;  %550 = vmatpush1.bf16.msra.mxu1 %v760_v10  ;;  %v768_v20 = vcombine.low %v89_v12, %v93_v13  ;;  %v40_v5 = vunpack.c.l.s4 %v847_v4  ;;  %v42_v6 = vlaneseq  ;;  %v82_v10 = vld [vmem:[%s1151_s4 + $0x10] sm:$0xff] }
   0x7   :  { %508 = vmatprep.subr.bf16.mxu0 %v767_v11  ;;  %v775_v21 = vcombine.high %v96_v14, %v100_v16  ;;  %551 = vmatprep.subr.bf16.mxu1 %v769_v15  ;;  %v777_v22 = vcombine.high %v97_v17, %v101_v18  ;;  %v104_v23 = vld [vmem:[%s1151_s4 + $0xc0] sm:$0xff]  ;;  %v105_v25 = vld [vmem:[%s1151_s4 + $0xc8] sm:$0xff]  ;;  %v774_v27 = vcombine.low %v96_v14, %v100_v16  ;;  %v86_v11 = vld [vmem:[%s1151_s4 + $0x30] sm:$0xff] }
   0x8   :  { %v108_v24 = vld [vmem:[%s1151_s4 + $0xe0] sm:$0xff]  ;;  %v109_v26 = vld [vmem:[%s1151_s4 + $0xe8] sm:$0xff]  ;;  %v776_v28 = vcombine.low %v97_v17, %v101_v18  ;;  %v83_v12 = vld [vmem:[%s1151_s4 + $0x18] sm:$0xff]  ;;  %v41_v15 = vunpack.c.0.s8 %v40_v5  ;;  %v1006_v16 = vshrl.u32 %v42_v6, 7  ;;  %v763_v18 = vcombine.high %v82_v10, %v86_v11 }
   0x9   :  { %v783_v29 = vcombine.high %v104_v23, %v108_v24  ;;  %v785_v30 = vcombine.high %v105_v25, %v109_v26  ;;  %v112_v31 = vld [vmem:[%s1151_s4 + $0x100] sm:$0xff]  ;;  %v113_v33 = vld [vmem:[%s1151_s4 + $0x108] sm:$0xff]  ;;  %v782_v35 = vcombine.low %v104_v23, %v108_v24  ;;  %v784_v37 = vcombine.low %v105_v25, %v109_v26  ;;  %v87_v13 = vld [vmem:[%s1151_s4 + $0x38] sm:$0xff] }
   0xa   :  { %509 = vmatpush1.bf16.msra.mxu0 %v766_v19  ;;  %552 = vmatpush1.bf16.msra.mxu1 %v768_v20  ;;  %v116_v32 = vld [vmem:[%s1151_s4 + $0x120] sm:$0xff]  ;;  %v117_v34 = vld [vmem:[%s1151_s4 + $0x128] sm:$0xff]  ;;  %v765_v19 = vcombine.high %v83_v12, %v87_v13  ;;  %v44_v20 = vsub.s32 %v41_v15, %v1006_v16  ;;  %v119_v4 = vld [vmem:[%s1151_s4 + $0x138] sm:$0xff] }
   0xb   :  { %510 = vmatprep.subr.bf16.mxu0 %v775_v21  ;;  %553 = vmatprep.subr.bf16.mxu1 %v777_v22  ;;  %v26_v36 = vld [vmem:[%s1152_s1] sm:$0x3]  ;;  %v791_v38 = vcombine.high %v112_v31, %v116_v32  ;;  %v793_v40 = vcombine.high %v113_v33, %v117_v34  ;;  %v121_v43 = vld [vmem:[%s1151_s4 + $0x148] sm:$0xff]  ;;  %v790_v46 = vcombine.low %v112_v31, %v116_v32 }
   0xc   :  { %v953_v39 = vmul.f32 0.0625, %v26_v36  ;;  %v120_v41 = vld [vmem:[%s1151_s4 + $0x140] sm:$0xff]  ;;  %v125_v44 = vld [vmem:[%s1151_s4 + $0x168] sm:$0xff]  ;;  %v792_v47 = vcombine.low %v113_v33, %v117_v34 }
   0xd   :  { %v124_v42 = vld [vmem:[%s1151_s4 + $0x160] sm:$0xff]  ;;  %v801_v50 = vcombine.high %v121_v43, %v125_v44  ;;  %v129_v53 = vld [vmem:[%s1151_s4 + $0x188] sm:$0xff]  ;;  %v800_v57 = vcombine.low %v121_v43, %v125_v44  ;;  %v762_v44 = vcombine.low %v82_v10, %v86_v11  ;;  %v126_v10 = vld [vmem:[%s1151_s4 + $0x170] sm:$0xff] }
   0xe   :  { %511 = vmatpush1.bf16.msra.mxu0 %v774_v27  ;;  %554 = vmatpush1.bf16.msra.mxu1 %v776_v28  ;;  %v29_v45 = vmul.f32 %v953_v39, %v953_v39  ;;  %v799_v48 = vcombine.high %v120_v41, %v124_v42  ;;  %v128_v51 = vld [vmem:[%s1151_s4 + $0x180] sm:$0xff]  ;;  %v133_v54 = vld [vmem:[%s1151_s4 + $0x1a8] sm:$0xff]  ;;  %v798_v56 = vcombine.low %v120_v41, %v124_v42  ;;  %v1016_v27 = vsub.s32 0, %v1006_v16  ;;  %v91_v41 = vld [vmem:[%s1151_s4 + $0x58] sm:$0xff] }
   0xf   :  { %512 = vmatprep.subr.bf16.mxu0 %v783_v29  ;;  %555 = vmatprep.subr.bf16.mxu1 %v785_v30  ;;  %v132_v52 = vld [vmem:[%s1151_s4 + $0x1a0] sm:$0xff]  ;;  %v809_v60 = vcombine.high %v129_v53, %v133_v54  ;;  %v137_v63 = vld [vmem:[%s1151_s4 + $0x1c8] sm:$0xff]  ;;  %v808_v7 = vcombine.low %v129_v53, %v133_v54  ;;  %v123_v11 = vld [vmem:[%s1151_s4 + $0x158] sm:$0xff] }
  0x10   :  { %v31_v49 = vrot.slane %v29_v45, 7  ;;  %v807_v58 = vcombine.high %v128_v51, %v132_v52  ;;  %v136_v61 = vld [vmem:[%s1151_s4 + $0x1c0] sm:$0xff]  ;;  %v141_v0 = vld [vmem:[%s1151_s4 + $0x1e8] sm:$0xff]  ;;  %v806_v2 = vcombine.low %v128_v51, %v132_v52  ;;  %v764_v45 = vcombine.low %v83_v12, %v87_v13  ;;  %v99_v51 = vld [vmem:[%s1151_s4 + $0x98] sm:$0xff] }
  0x11   :  { %v140_v62 = vld [vmem:[%s1151_s4 + $0x1e0] sm:$0xff]  ;;  %v817_v9 = vcombine.high %v137_v63, %v141_v0  ;;  %v816_v17 = vcombine.low %v137_v63, %v141_v0  ;;  %v103_v52 = vld [vmem:[%s1151_s4 + $0xb8] sm:$0xff] }
  0x12   :  { %513 = vmatpush1.bf16.msra.mxu0 %v782_v35  ;;  %556 = vmatpush1.bf16.msra.mxu1 %v784_v37  ;;  %v33_v55 = vsub.f32 %v953_v39, %v31_v49  ;;  %v815_v8 = vcombine.high %v136_v61, %v140_v62  ;;  %v814_v14 = vcombine.low %v136_v61, %v140_v62  ;;  %v35_v24 = vld [vmem:[%s1154_s2] sm:$0x1]  ;;  %v98_v49 = vld [vmem:[%s1151_s4 + $0x90] sm:$0xff]  ;;  %v127_v12 = vld [vmem:[%s1151_s4 + $0x178] sm:$0xff] }
  0x13   :  { %514 = vmatprep.subr.bf16.mxu0 %v791_v38  ;;  %557 = vmatprep.subr.bf16.mxu1 %v793_v40  ;;  %v839_v25 = vld [vmem:[%s1153_s0] sm:$0xff]   ;;  %v90_v38 = vld [vmem:[%s1151_s4 + $0x50] sm:$0xff]  ;;  %v780_v62 = vcombine.low %v99_v51, %v103_v52 }
  0x14   :  { %v34_v59 = vmax.f32 %v33_v55, 0.0  ;;  %v840_v29 = vunpack.c.l.bf16 %v839_v25  ;;  %v841_v30 = vunpack.c.h.bf16 %v839_v25  ;;  %v56_v31 = vld [vmem:[%s1155_s3] sm:$0x1]  ;;  %v94_v40 = vld [vmem:[%s1151_s4 + $0x70] sm:$0xff] }
  0x15   :  { %v770_v53 = vcombine.low %v90_v38, %v94_v40 }
  0x16   :  { %515 = vmatpush1.bf16.msra.mxu0 %v790_v46  ;;  %558 = vmatpush1.bf16.msra.mxu1 %v792_v47  ;;  %v36_v1 = vadd.f32 1e-05, %v34_v59  ;;  %v771_v47 = vcombine.high %v90_v38, %v94_v40  ;;  %v107_v59 = vld [vmem:[%s1151_s4 + $0xd8] sm:$0xff]  ;;  %v144_v38 = vld [vmem:[%s1156_s5] sm:$0xff]  ;;  %v152_v40 = vsub.s32 1, %v1006_v16 }
  0x17   :  { %516 = vmatprep.subr.bf16.mxu0 %v799_v48  ;;  %559 = vmatprep.subr.bf16.mxu1 %v801_v50  ;;  %v102_v50 = vld [vmem:[%s1151_s4 + $0xb0] sm:$0xff] }
  0x18   :  { %844 = vrsqrt.f32 %v36_v1  ;;  %v779_v55 = vcombine.high %v98_v49, %v102_v50  ;;  %v778_v61 = vcombine.low %v98_v49, %v102_v50  ;;  %v114_v1 = vld [vmem:[%s1151_s4 + $0x110] sm:$0xff] }
  0x1a   :  { %517 = vmatpush1.bf16.msra.mxu0 %v798_v56  ;;  %560 = vmatpush1.bf16.msra.mxu1 %v800_v57  ;;  %v781_v56 = vcombine.high %v99_v51, %v103_v52  ;;  %v106_v57 = vld [vmem:[%s1151_s4 + $0xd0] sm:$0xff] }
  0x1b   :  { %518 = vmatprep.subr.bf16.mxu0 %v807_v58  ;;  %561 = vmatprep.subr.bf16.mxu1 %v809_v60  ;;  %v110_v58 = vld [vmem:[%s1151_s4 + $0xf0] sm:$0xff]  ;;  %v111_v60 = vld [vmem:[%s1151_s4 + $0xf8] sm:$0xff] }
  0x1c   :  { %v787_v63 = vcombine.high %v106_v57, %v110_v58  ;;  %v789_v0 = vcombine.high %v107_v59, %v111_v60  ;;  %v786_v5 = vcombine.low %v106_v57, %v110_v58  ;;  %v788_v6 = vcombine.low %v107_v59, %v111_v60 }
  0x1e   :  { %519 = vmatpush1.bf16.msra.mxu0 %v806_v2  ;;  %562 = vmatpush1.bf16.msra.mxu1 %v808_v7  ;;  %v118_v2 = vld [vmem:[%s1151_s4 + $0x130] sm:$0xff] }
  0x1f   :  { %520 = vmatprep.subr.bf16.mxu0 %v815_v8  ;;  %563 = vmatprep.subr.bf16.mxu1 %v817_v9  ;;  %v795_v7 = vcombine.high %v114_v1, %v118_v2  ;;  %v122_v9 = vld [vmem:[%s1151_s4 + $0x150] sm:$0xff]  ;;  %v794_v13 = vcombine.low %v114_v1, %v118_v2  ;;  %v172_v1 = vsub.s32 6, %v1006_v16  ;;  %v168_v2 = vsub.s32 5, %v1006_v16 }
  0x20   :  { %v803_v15 = vcombine.high %v122_v9, %v126_v10 }
  0x22   :  { %521 = vmatpush1.bf16.msra.mxu0 %v814_v14  ;;  %564 = vmatpush1.bf16.msra.mxu1 %v816_v17  ;;  %v845_v21 = vpop.eup %844  ;;  %v805_v17 = vcombine.high %v123_v11, %v127_v12 }
  0x23   :  { %592 = vmatprep.subr.bf16.mxu0 %v763_v18  ;;  %635 = vmatprep.subr.bf16.mxu1 %v765_v19  ;;  %v45_v22 = vrot.slane %v845_v21, %v44_v20  ;;  %v130_v18 = vld [vmem:[%s1151_s4 + $0x190] sm:$0xff]  ;;  %v135_v21 = vld [vmem:[%s1151_s4 + $0x1b8] sm:$0xff] }
  0x24   :  { %v134_v19 = vld [vmem:[%s1151_s4 + $0x1b0] sm:$0xff] }
  0x25   :  { %v46_v23 = vcombine.high %v45_v22, %v45_v22  ;;  %v802_v22 = vcombine.low %v122_v9, %v126_v10 }
  0x27   :  { %v53_v26 = vrot.slane %v46_v23, %v44_v20  ;;  %v131_v20 = vld [vmem:[%s1151_s4 + $0x198] sm:$0xff]  ;;  %v804_v23 = vcombine.low %v123_v11, %v127_v12 }
  0x28   :  { %v813_v25 = vcombine.high %v131_v20, %v135_v21 }
  0x29   :  { %v55_v28 = vmul.f32 %v53_v26, %v35_v24  ;;  %v811_v24 = vcombine.high %v130_v18, %v134_v19  ;;  %v138_v26 = vld [vmem:[%s1151_s4 + $0x1d0] sm:$0xff] }
  0x2b   :  { %v57_v32 = vmul.f32 %v55_v28, %v953_v39  ;;  %v67_v33 = vrot.slane %v55_v28, %v1016_v27  ;;  %v95_v39 = vld [vmem:[%s1151_s4 + $0x78] sm:$0xff]  ;;  %v142_v28 = vld [vmem:[%s1151_s4 + $0x1f0] sm:$0xff] }
  0x2c   :  { %v773_v48 = vcombine.high %v91_v41, %v95_v39  ;;  %v772_v54 = vcombine.low %v91_v41, %v95_v39  ;;  %v160_v41 = vsub.s32 3, %v1006_v16  ;;  %v149_v39 = vrot.slane %v144_v38, %v1016_v27 }
  0x2d   :  { %v58_v34 = vsub.f32 %v56_v31, %v57_v32  ;;  %v69_v35 = vmul.f32 %v840_v29, %v67_v33  ;;  %v70_v36 = vmul.f32 %v841_v30, %v67_v33  ;;  %v139_v29 = vld [vmem:[%s1151_s4 + $0x1d8] sm:$0xff]  ;;  %v810_v31 = vcombine.low %v130_v18, %v134_v19 }
  0x2e   :  { %v143_v30 = vld [vmem:[%s1151_s4 + $0x1f8] sm:$0xff]  ;;  %v812_v32 = vcombine.low %v131_v20, %v135_v21  ;;  %v819_v33 = vcombine.high %v138_v26, %v142_v28 }
  0x2f   :  { %v75_v37 = vrot.slane %v58_v34, %v1016_v27  ;;  %v821_v34 = vcombine.high %v139_v29, %v143_v30 }
  0x31   :  { %v77_v42 = vadd.f32 %v75_v37, %v69_v35  ;;  %v78_v43 = vadd.f32 %v75_v37, %v70_v36  ;;  %v818_v35 = vcombine.low %v138_v26, %v142_v28  ;;  %v820_v36 = vcombine.low %v139_v29, %v143_v30 }
  0x32   :  { %v156_v37 = vsub.s32 2, %v1006_v16 }
  0x33   :  { %v1036_v46 = vpack.c.bf16 %v78_v43, %v77_v42  ;;  %v153_v43 = vrot.slane %v144_v38, %v152_v40 }
  0x34   :  { %v157_v42 = vrot.slane %v144_v38, %v156_v37 }
  0x35   :  { %539 = vmatmul.mubr.bf16.vlgmr.msra.gmra.mrb[0].mxu0 %v1036_v46  ;;  %582 = vmatmul.mubr.bf16.vlgmr.msra.gmra.mrb[0].mxu1 %v1036_v46 }
  0x36   :  { %593 = vmatpush1.bf16.msra.mxu0 %v762_v44  ;;  %636 = vmatpush1.bf16.msra.mxu1 %v764_v45  ;;  %v161_v44 = vrot.slane %v144_v38, %v160_v41 }
  0x37   :  { %594 = vmatprep.subr.bf16.mxu0 %v771_v47  ;;  %637 = vmatprep.subr.bf16.mxu1 %v773_v48 }
  0x38   :  { %624 = vmatprep.mubr.bf16.mxu0 %v846_v3  ;;  %667 = vmatprep.mubr.bf16.mxu1 %v846_v3  ;;  %v115_v3 = vld [vmem:[%s1151_s4 + $0x118] sm:$0xff] }
  0x39   :  { %v797_v8 = vcombine.high %v115_v3, %v119_v4  ;;  %v796_v14 = vcombine.low %v115_v3, %v119_v4  ;;  %v176_v3 = vsub.s32 7, %v1006_v16 }
  0x3a   :  { %595 = vmatpush1.bf16.msra.mxu0 %v770_v53  ;;  %638 = vmatpush1.bf16.msra.mxu1 %v772_v54 }
  0x3b   :  { %596 = vmatprep.subr.bf16.mxu0 %v779_v55  ;;  %639 = vmatprep.subr.bf16.mxu1 %v781_v56 }
  0x3e   :  { %597 = vmatpush1.bf16.msra.mxu0 %v778_v61  ;;  %640 = vmatpush1.bf16.msra.mxu1 %v780_v62 }
  0x3f   :  { %598 = vmatprep.subr.bf16.mxu0 %v787_v63  ;;  %641 = vmatprep.subr.bf16.mxu1 %v789_v0  ;;  %v164_v0 = vsub.s32 4, %v1006_v16 }
  0x41   :  { %v165_v4 = vrot.slane %v144_v38, %v164_v0 }
  0x42   :  { %599 = vmatpush1.bf16.msra.mxu0 %v786_v5  ;;  %642 = vmatpush1.bf16.msra.mxu1 %v788_v6  ;;  %v173_v5 = vrot.slane %v144_v38, %v172_v1  ;;  %v169_v6 = vrot.slane %v144_v38, %v168_v2 }
  0x43   :  { %600 = vmatprep.subr.bf16.mxu0 %v795_v7  ;;  %643 = vmatprep.subr.bf16.mxu1 %v797_v8  ;;  %v177_v7 = vrot.slane %v144_v38, %v176_v3 }
  0x46   :  { %601 = vmatpush1.bf16.msra.mxu0 %v794_v13  ;;  %644 = vmatpush1.bf16.msra.mxu1 %v796_v14 }
  0x47   :  { %602 = vmatprep.subr.bf16.mxu0 %v803_v15  ;;  %645 = vmatprep.subr.bf16.mxu1 %v805_v17 }
  0x4a   :  { %603 = vmatpush1.bf16.msra.mxu0 %v802_v22  ;;  %646 = vmatpush1.bf16.msra.mxu1 %v804_v23 }
  0x4b   :  { %604 = vmatprep.subr.bf16.mxu0 %v811_v24  ;;  %647 = vmatprep.subr.bf16.mxu1 %v813_v25 }
  0x4e   :  { %605 = vmatpush1.bf16.msra.mxu0 %v810_v31  ;;  %648 = vmatpush1.bf16.msra.mxu1 %v812_v32 }
  0x4f   :  { %606 = vmatprep.subr.bf16.mxu0 %v819_v33  ;;  %649 = vmatprep.subr.bf16.mxu1 %v821_v34 }
  0x52   :  { %607 = vmatpush1.bf16.msra.mxu0 %v818_v35  ;;  %650 = vmatpush1.bf16.msra.mxu1 %v820_v36 }
  0x55   :  { %625 = vmatmul.mubr.bf16.vlgmr.msra.gmra.mrb[4].mxu0 %v1036_v46  ;;  %668 = vmatmul.mubr.bf16.vlgmr.msra.gmra.mrb[4].mxu1 %v1036_v46 }
 0x108   :  { %v540_v45 = vpop.f32.mrb[0].mxu0  ;;  %v583_v47 = vpop.f32.mrb[0].mxu1 }
 0x109   :  { %v541_v48 = vadd.f32 %v540_v45, %v149_v39  ;;  %v584_v49 = vadd.f32 %v583_v47, %v157_v42  ;;  %v542_v46 = vpop.f32.mrb[1].mxu0  ;;  %v585_v50 = vpop.f32.mrb[1].mxu1 }
 0x10a   :  { %v543_v51 = vadd.f32 %v542_v46, %v153_v43  ;;  %v586_v52 = vadd.f32 %v585_v50, %v161_v44  ;;  %v544_v53 = vpop.f32.mrb[2].mxu0  ;;  %v587_v54 = vpop.f32.mrb[2].mxu1 }
 0x10b   :  { %v545_v55 = vadd.f32 %v544_v53, %v149_v39  ;;  %v588_v56 = vadd.f32 %v587_v54, %v157_v42  ;;  %v546_v57 = vpop.f32.mrb[3].mxu0  ;;  %v589_v58 = vpop.f32.mrb[3].mxu1 }
 0x10c   :  { %v830_v59 = vpack.c.bf16 %v543_v51, %v541_v48  ;;  %v831_v60 = vpack.c.bf16 %v586_v52, %v584_v49  ;;  %v547_v27 = vadd.f32 %v546_v57, %v153_v43  ;;  %v590_v61 = vadd.f32 %v589_v58, %v161_v44 }
 0x10e   :  { %710 = vst [vmem:[%s1157_s6] sm:$0xff] %v830_v59  ;;  %711 = vst [vmem:[%s1157_s6 + $0x8] sm:$0xff] %v831_v60  ;;  %v832_v62 = vpack.c.bf16 %v547_v27, %v545_v55  ;;  %v833_v63 = vpack.c.bf16 %v590_v61, %v588_v56 }
 0x110   :  { %712 = vst [vmem:[%s1157_s6 + $0x10] sm:$0xff] %v832_v62  ;;  %713 = vst [vmem:[%s1157_s6 + $0x18] sm:$0xff] %v833_v63 }
 0x128   :  { %v626_v8 = vpop.f32.mrb[4].mxu0  ;;  %v669_v9 = vpop.f32.mrb[4].mxu1 }
 0x129   :  { %v627_v10 = vadd.f32 %v626_v8, %v165_v4  ;;  %v670_v11 = vadd.f32 %v669_v9, %v173_v5  ;;  %v628_v12 = vpop.f32.mrb[5].mxu0  ;;  %v671_v13 = vpop.f32.mrb[5].mxu1 }
 0x12a   :  { %v629_v14 = vadd.f32 %v628_v12, %v169_v6  ;;  %v672_v15 = vadd.f32 %v671_v13, %v177_v7  ;;  %v630_v17 = vpop.f32.mrb[6].mxu0  ;;  %v673_v18 = vpop.f32.mrb[6].mxu1 }
 0x12b   :  { %v631_v19 = vadd.f32 %v630_v17, %v165_v4  ;;  %v674_v20 = vadd.f32 %v673_v18, %v173_v5  ;;  %v632_v21 = vpop.f32.mrb[7].mxu0  ;;  %v675_v22 = vpop.f32.mrb[7].mxu1 }
 0x12c   :  { %v834_v23 = vpack.c.bf16 %v629_v14, %v627_v10  ;;  %v835_v16 = vpack.c.bf16 %v672_v15, %v670_v11  ;;  %v633_v24 = vadd.f32 %v632_v21, %v169_v6  ;;  %v676_v25 = vadd.f32 %v675_v22, %v177_v7 }
 0x12e   :  { %746 = vst [vmem:[%s1158_s7] sm:$0xff] %v834_v23  ;;  %747 = vst [vmem:[%s1158_s7 + $0x8] sm:$0xff] %v835_v16  ;;  %v836_v26 = vpack.c.bf16 %v633_v24, %v631_v19  ;;  %v837_v28 = vpack.c.bf16 %v676_v25, %v674_v20 }
 0x130   :  { %748 = vst [vmem:[%s1158_s7 + $0x10] sm:$0xff] %v836_v26  ;;  %749 = vst [vmem:[%s1158_s7 + $0x18] sm:$0xff] %v837_v28 }

// kernel: ts_prediction_forward.7
= control target key start
LH: loop header
LB: loop body
LE: loop exit
PB: predicated region body
PF: predicated region fallthrough
CT: control target
= control target key end

     0   :  { %13 = vsyncpa [#allocation3], 0  ;;  %s2415_s24 = smov [#allocation2]   ;;  %s2646_s0 = inlined_call_operand.vmem [shape: bf16[2,8,512], index: 0, kind: input, shape index: {}]   ;;  %s2647_s1 = inlined_call_operand.vmem [shape: f32[1,2,512], index: 1, kind: input, shape index: {}]   ;;  %s2648_s2 = inlined_call_operand.vmem [shape: f32[1,512], index: 2, kind: input, shape index: {}]   ;;  %s2649_s3 = inlined_call_operand.vmem [shape: f32[1,512], index: 3, kind: input, shape index: {}]   ;;  %s2650_s4 = inlined_call_operand.hbm [shape: bf16[1536,256], index: 4, kind: input, shape index: {}]   ;;  %s2651_s5 = inlined_call_operand.vmem [shape: f32[1,256], index: 5, kind: input, shape index: {}]   ;;  %s2652_s6 = inlined_call_operand.vmem [shape: bf16[2,8,256], index: 6, kind: output, shape index: {0}]   ;;  %s2653_s7 = inlined_call_operand.vmem [shape: f32[1,2,256], index: 7, kind: output, shape index: {1}]  }
   0x1   :  { %s27_s25 = sshll.u32 %s2415_s24, 4  ;;  %s2391_s28 = scalar_lea.hbm %s2650_s4, 24576  ;;  %s28_s25 = int_to_ptr.vmem [resolvable:$true] %s27_s25 }
   0x2   :  { %p2392_p0 = scmp.ne.s32.totalorder %s2650_s4, %s2391_s28  ;;  %p2395_p1 = scmp.lt.u32.totalorder %s2391_s28, %s2650_s4 }
   0x4   :  { %p2397_p2 = pnand %p2395_p1, %p2392_p0 }
   0x6   :  { %2400 = shalt.err (!%p2397_p2)
}
   0x7   :  { %s2401_s10 = scalar_lea.vmem %s28_s25, 24576  ;;  %p2406_p4 = scmp.lt.s32.totalorder %s28_s25, %s28_s25 }
   0x8   :  { %p2402_p3 = scmp.ne.s32.totalorder %s28_s25, %s2401_s10  ;;  %p2407_p5 = scmp.lt.s32.totalorder %s2401_s10, %s2401_s10 }
   0xa   :  { %p2408_p6 = por %p2407_p5, %p2406_p4 }
   0xc   :  { %p2409_p7 = pnand %p2408_p6, %p2402_p3 }
   0xe   :  { %2412 = shalt.err (!%p2409_p7)
}
   0xf   :  { %s2416_s11 = smov 128   ;;  %s2417_s12 = smov 8  }
  0x10   :  { %33 = dma.hbm_to_vmem [thread:$0]  %s2650_s4, 24576, %s28_s25, [#allocation3], %s2416_s11, %s2416_s11, %s2417_s12  }
  0x11   :  { %2413 = dma.done.wait [#allocation3], 24576  }
  0x12   :  { %2414 = vsyncadd [#allocation3], 4294942720  ;;  %v2101_v0 = vld [vmem:[#allocation2 + $0x4] ss:$8 sps:$4 sm:$0xff]   ;;  %v2105_v2 = vld [vmem:[#allocation2] ss:$8 sps:$4 sm:$0xff]  }
  0x13   :  { %v2103_v1 = vld [vmem:[#allocation2 + $0x304] ss:$8 sps:$4 sm:$0xff]   ;;  %1531 = vmatprep.subr.bf16.mxu1 %v2101_v0  ;;  %v2106_v3 = vld [vmem:[#allocation2 + $0x300] ss:$8 sps:$4 sm:$0xff]   ;;  %v2107_v4 = vld [vmem:[#allocation2 + $0x14] ss:$8 sps:$4 sm:$0xff]  }
  0x14   :  { %1660 = vmatprep.subr.bf16.mxu0 %v2103_v1  ;;  %1532 = vmatpush1.bf16.msra.mxu1 %v2105_v2  ;;  %v2109_v5 = vld [vmem:[#allocation2 + $0x314] ss:$8 sps:$4 sm:$0xff]   ;;  %v2111_v6 = vld [vmem:[#allocation2 + $0x10] ss:$8 sps:$4 sm:$0xff]   ;;  %v2113_v8 = vld [vmem:[#allocation2 + $0x24] ss:$8 sps:$4 sm:$0xff]  }
  0x15   :  { %1661 = vmatpush1.bf16.msra.mxu0 %v2106_v3  ;;  %1533 = vmatprep.subr.bf16.mxu1 %v2107_v4  ;;  %v2112_v7 = vld [vmem:[#allocation2 + $0x310] ss:$8 sps:$4 sm:$0xff]   ;;  %v2115_v9 = vld [vmem:[#allocation2 + $0x324] ss:$8 sps:$4 sm:$0xff]   ;;  %v2117_v10 = vld [vmem:[#allocation2 + $0x20] ss:$8 sps:$4 sm:$0xff]   ;;  %v56_v3 = vlaneseq }
  0x16   :  { %1662 = vmatprep.subr.bf16.mxu0 %v2109_v5  ;;  %v2118_v11 = vld [vmem:[#allocation2 + $0x320] ss:$8 sps:$4 sm:$0xff]   ;;  %v2119_v12 = vld [vmem:[#allocation2 + $0x34] ss:$8 sps:$4 sm:$0xff]   ;;  %v2123_v14 = vld [vmem:[#allocation2 + $0x30] ss:$8 sps:$4 sm:$0xff]  }
  0x17   :  { %v2121_v13 = vld [vmem:[#allocation2 + $0x334] ss:$8 sps:$4 sm:$0xff]   ;;  %v2124_v15 = vld [vmem:[#allocation2 + $0x330] ss:$8 sps:$4 sm:$0xff]   ;;  %v2125_v16 = vld [vmem:[#allocation2 + $0x44] ss:$8 sps:$4 sm:$0xff]  }
  0x18   :  { %1534 = vmatpush1.bf16.msra.mxu1 %v2111_v6  ;;  %v2127_v17 = vld [vmem:[#allocation2 + $0x344] ss:$8 sps:$4 sm:$0xff]   ;;  %v2129_v18 = vld [vmem:[#allocation2 + $0x40] ss:$8 sps:$4 sm:$0xff]   ;;  %v2131_v20 = vld [vmem:[#allocation2 + $0x54] ss:$8 sps:$4 sm:$0xff]  }
  0x19   :  { %1663 = vmatpush1.bf16.msra.mxu0 %v2112_v7  ;;  %1535 = vmatprep.subr.bf16.mxu1 %v2113_v8  ;;  %v2130_v19 = vld [vmem:[#allocation2 + $0x340] ss:$8 sps:$4 sm:$0xff]   ;;  %v2133_v21 = vld [vmem:[#allocation2 + $0x354] ss:$8 sps:$4 sm:$0xff]   ;;  %v2135_v22 = vld [vmem:[#allocation2 + $0x50] ss:$8 sps:$4 sm:$0xff]  }
  0x1a   :  { %1664 = vmatprep.subr.bf16.mxu0 %v2115_v9  ;;  %v2136_v23 = vld [vmem:[#allocation2 + $0x350] ss:$8 sps:$4 sm:$0xff]   ;;  %v2137_v24 = vld [vmem:[#allocation2 + $0x64] ss:$8 sps:$4 sm:$0xff]   ;;  %v2141_v26 = vld [vmem:[#allocation2 + $0x60] ss:$8 sps:$4 sm:$0xff]  }
  0x1b   :  { %v2139_v25 = vld [vmem:[#allocation2 + $0x364] ss:$8 sps:$4 sm:$0xff]   ;;  %v2142_v27 = vld [vmem:[#allocation2 + $0x360] ss:$8 sps:$4 sm:$0xff]   ;;  %v2143_v28 = vld [vmem:[#allocation2 + $0x74] ss:$8 sps:$4 sm:$0xff]  }
  0x1c   :  { %1536 = vmatpush1.bf16.msra.mxu1 %v2117_v10  ;;  %v2145_v29 = vld [vmem:[#allocation2 + $0x374] ss:$8 sps:$4 sm:$0xff]   ;;  %v2147_v30 = vld [vmem:[#allocation2 + $0x70] ss:$8 sps:$4 sm:$0xff]   ;;  %v2149_v32 = vld [vmem:[#allocation2 + $0x84] ss:$8 sps:$4 sm:$0xff]  }
  0x1d   :  { %1665 = vmatpush1.bf16.msra.mxu0 %v2118_v11  ;;  %1537 = vmatprep.subr.bf16.mxu1 %v2119_v12  ;;  %v2148_v31 = vld [vmem:[#allocation2 + $0x370] ss:$8 sps:$4 sm:$0xff]   ;;  %v2151_v33 = vld [vmem:[#allocation2 + $0x384] ss:$8 sps:$4 sm:$0xff]   ;;  %v2153_v34 = vld [vmem:[#allocation2 + $0x80] ss:$8 sps:$4 sm:$0xff]  }
  0x1e   :  { %1666 = vmatprep.subr.bf16.mxu0 %v2121_v13  ;;  %v2154_v35 = vld [vmem:[#allocation2 + $0x380] ss:$8 sps:$4 sm:$0xff]   ;;  %v2155_v36 = vld [vmem:[#allocation2 + $0x94] ss:$8 sps:$4 sm:$0xff]   ;;  %v2159_v38 = vld [vmem:[#allocation2 + $0x90] ss:$8 sps:$4 sm:$0xff]  }
  0x1f   :  { %v2157_v37 = vld [vmem:[#allocation2 + $0x394] ss:$8 sps:$4 sm:$0xff]   ;;  %v2160_v39 = vld [vmem:[#allocation2 + $0x390] ss:$8 sps:$4 sm:$0xff]   ;;  %v2161_v40 = vld [vmem:[#allocation2 + $0xa4] ss:$8 sps:$4 sm:$0xff]  }
  0x20   :  { %1538 = vmatpush1.bf16.msra.mxu1 %v2123_v14  ;;  %v2163_v41 = vld [vmem:[#allocation2 + $0x3a4] ss:$8 sps:$4 sm:$0xff]   ;;  %v2165_v42 = vld [vmem:[#allocation2 + $0xa0] ss:$8 sps:$4 sm:$0xff]   ;;  %v2167_v44 = vld [vmem:[#allocation2 + $0xb4] ss:$8 sps:$4 sm:$0xff]  }
  0x21   :  { %1667 = vmatpush1.bf16.msra.mxu0 %v2124_v15  ;;  %1539 = vmatprep.subr.bf16.mxu1 %v2125_v16  ;;  %v2166_v43 = vld [vmem:[#allocation2 + $0x3a0] ss:$8 sps:$4 sm:$0xff]   ;;  %v2169_v45 = vld [vmem:[#allocation2 + $0x3b4] ss:$8 sps:$4 sm:$0xff]   ;;  %v2171_v47 = vld [vmem:[#allocation2 + $0xb0] ss:$8 sps:$4 sm:$0xff]  }
  0x22   :  { %1668 = vmatprep.subr.bf16.mxu0 %v2127_v17  ;;  %v40_v46 = vld [vmem:[%s2647_s1] sm:$0xff]  ;;  %v2172_v49 = vld [vmem:[#allocation2 + $0x3b0] ss:$8 sps:$4 sm:$0xff]   ;;  %v2179_v56 = vld [vmem:[#allocation2 + $0xd4] ss:$8 sps:$4 sm:$0xff]   ;;  %v57_v9 = vshrl.u32 %v56_v3, 7 }
  0x23   :  { %v2475_v48 = vmul.f32 0.0625, %v40_v46  ;;  %v2173_v50 = vld [vmem:[#allocation2 + $0xc4] ss:$8 sps:$4 sm:$0xff]   ;;  %v2177_v53 = vld [vmem:[#allocation2 + $0xc0] ss:$8 sps:$4 sm:$0xff]   ;;  %vm225_vm1 = vcmask 1040384  }
  0x24   :  { %1540 = vmatpush1.bf16.msra.mxu1 %v2129_v18  ;;  %v2175_v51 = vld [vmem:[#allocation2 + $0x3c4] ss:$8 sps:$4 sm:$0xff]   ;;  %v2178_v55 = vld [vmem:[#allocation2 + $0x3c0] ss:$8 sps:$4 sm:$0xff]   ;;  %v2181_v57 = vld [vmem:[#allocation2 + $0x3d4] ss:$8 sps:$4 sm:$0xff]  }
  0x25   :  { %1669 = vmatpush1.bf16.msra.mxu0 %v2130_v19  ;;  %1541 = vmatprep.subr.bf16.mxu1 %v2131_v20  ;;  %v43_v52 = vmul.f32 %v2475_v48, %v2475_v48  ;;  %v2183_v59 = vld [vmem:[#allocation2 + $0xd0] ss:$8 sps:$4 sm:$0xff]   ;;  %v2185_v62 = vld [vmem:[#allocation2 + $0xe4] ss:$8 sps:$4 sm:$0xff]   ;;  %v2418_v1 = vmov 1966171168  }
  0x26   :  { %1670 = vmatprep.subr.bf16.mxu0 %v2133_v21  ;;  %v2184_v61 = vld [vmem:[#allocation2 + $0x3d0] ss:$8 sps:$4 sm:$0xff]   ;;  %v2187_v63 = vld [vmem:[#allocation2 + $0x3e4] ss:$8 sps:$4 sm:$0xff]   ;;  %v54_v2 = vunpack.c.l.s4 %v2418_v1  ;;  %v2189_v4 = vld [vmem:[#allocation2 + $0xe0] ss:$8 sps:$4 sm:$0xff]  }
  0x27   :  { %v45_v54 = vrot.slane %v43_v52, 7  ;;  %v2190_v5 = vld [vmem:[#allocation2 + $0x3e0] ss:$8 sps:$4 sm:$0xff]   ;;  %v2191_v6 = vld [vmem:[#allocation2 + $0xf4] ss:$8 sps:$4 sm:$0xff]   ;;  %vm236_vm2 = vcmask 1044480  }
  0x28   :  { %1542 = vmatpush1.bf16.msra.mxu1 %v2135_v22  ;;  %v2193_v7 = vld [vmem:[#allocation2 + $0x3f4] ss:$8 sps:$4 sm:$0xff]   ;;  %v55_v8 = vunpack.c.0.s8 %v54_v2  ;;  %v2195_v10 = vld [vmem:[#allocation2 + $0xf0] ss:$8 sps:$4 sm:$0xff]   ;;  %v2419_v12 = vmov 857870592  }
  0x29   :  { %1671 = vmatpush1.bf16.msra.mxu0 %v2136_v23  ;;  %1543 = vmatprep.subr.bf16.mxu1 %v2137_v24  ;;  %v47_v58 = vsub.f32 %v2475_v48, %v45_v54  ;;  %v2196_v11 = vld [vmem:[#allocation2 + $0x3f0] ss:$8 sps:$4 sm:$0xff]   ;;  %v66_v13 = vunpack.c.l.s4 %v2419_v12  ;;  %v2199_v14 = vld [vmem:[#allocation2 + $0x104] ss:$8 sps:$4 sm:$0xff]   ;;  %v49_v20 = vld [vmem:[%s2648_s2] sm:$0xf] }
  0x2a   :  { %1672 = vmatprep.subr.bf16.mxu0 %v2139_v25  ;;  %v2202_v15 = vld [vmem:[#allocation2 + $0x404] ss:$8 sps:$4 sm:$0xff]   ;;  %v58_v16 = vsub.s32 %v55_v8, %v57_v9  ;;  %v2486_v24 = vsub.s32 1, %v57_v9  ;;  %vm226_vm0 = vsmask.f32 256 }
  0x2b   :  { %v48_v60 = vmax.f32 %v47_v58, 0.0  ;;  %v67_v17 = vunpack.c.0.s8 %v66_v13  ;;  %v84_v23 = vld [vmem:[%s2646_s0] sm:$0xff]  ;;  %vm237_vm3 = vsmask.f32 4352  ;;  %vm2511_vm4 = vmand %vm225_vm1, %vm226_vm0 }
  0x2c   :  { %1544 = vmatpush1.bf16.msra.mxu1 %v2141_v26  ;;  %v86_v26 = vld [vmem:[%s2646_s0 + $0x10] sm:$0xff]  ;;  %vm2517_vm5 = vmand %vm236_vm2, %vm237_vm3 }
  0x2d   :  { %1673 = vmatpush1.bf16.msra.mxu0 %v2142_v27  ;;  %1545 = vmatprep.subr.bf16.mxu1 %v2143_v28  ;;  %v50_v0 = vadd.f32 1e-05, %v48_v60  ;;  %v70_v22 = vsub.s32 %v67_v17, %v57_v9  ;;  %v110_v27 = vsub.s32 3, %v57_v9  ;;  %v85_v28 = vld [vmem:[%s2646_s0 + $0x8] sm:$0xff] }
  0x2e   :  { %1674 = vmatprep.subr.bf16.mxu0 %v2145_v29  ;;  %v87_v29 = vld [vmem:[%s2646_s0 + $0x18] sm:$0xff] }
  0x2f   :  { %2389 = vrsqrt.f32 %v50_v0 }
  0x30   :  { %1546 = vmatpush1.bf16.msra.mxu1 %v2147_v30  ;;  %v2497_v30 = vsub.s32 0, %v57_v9 }
  0x31   :  { %1675 = vmatpush1.bf16.msra.mxu0 %v2148_v31  ;;  %1547 = vmatprep.subr.bf16.mxu1 %v2149_v32  ;;  %v106_v31 = vsub.s32 2, %v57_v9 }
  0x32   :  { %1676 = vmatprep.subr.bf16.mxu0 %v2151_v33  ;;  %v88_v33 = vunpack.c.l.bf16 %v84_v23 }
  0x34   :  { %1548 = vmatpush1.bf16.msra.mxu1 %v2153_v34  ;;  %v89_v34 = vunpack.c.h.bf16 %v84_v23 }
  0x35   :  { %1677 = vmatpush1.bf16.msra.mxu0 %v2154_v35  ;;  %1549 = vmatprep.subr.bf16.mxu1 %v2155_v36  ;;  %v92_v35 = vunpack.c.l.bf16 %v86_v26  ;;  %v93_v36 = vunpack.c.h.bf16 %v86_v26 }
  0x36   :  { %1678 = vmatprep.subr.bf16.mxu0 %v2157_v37 }
  0x38   :  { %1550 = vmatpush1.bf16.msra.mxu1 %v2159_v38 }
  0x39   :  { %1679 = vmatpush1.bf16.msra.mxu0 %v2160_v39  ;;  %1551 = vmatprep.subr.bf16.mxu1 %v2161_v40  ;;  %v2390_v18 = vpop.eup %2389  ;;  %v91_v39 = vunpack.c.h.bf16 %v85_v28  ;;  %v95_v40 = vunpack.c.h.bf16 %v87_v29 }
  0x3a   :  { %1680 = vmatprep.subr.bf16.mxu0 %v2163_v41  ;;  %v59_v19 = vrot.slane %v2390_v18, %v58_v16 }
  0x3c   :  { %1552 = vmatpush1.bf16.msra.mxu1 %v2165_v42  ;;  %v60_v21 = vcombine.high %v59_v19, %v59_v19  ;;  %v63_v42 = vld [vmem:[%s2649_s3] sm:$0xf] }
  0x3d   :  { %1681 = vmatpush1.bf16.msra.mxu0 %v2166_v43  ;;  %1553 = vmatprep.subr.bf16.mxu1 %v2167_v44  ;;  %v90_v43 = vunpack.c.l.bf16 %v85_v28  ;;  %v94_v44 = vunpack.c.l.bf16 %v87_v29 }
  0x3e   :  { %1682 = vmatprep.subr.bf16.mxu0 %v2169_v45  ;;  %v62_v25 = vmul.f32 %v60_v21, %v49_v20 }
  0x40   :  { %1554 = vmatpush1.bf16.msra.mxu1 %v2171_v47  ;;  %v71_v32 = vrot.slane %v62_v25, %v70_v22  ;;  %v103_v37 = vrot.slane %v62_v25, %v2486_v24  ;;  %v111_v41 = vrot.slane %v62_v25, %v110_v27  ;;  %v99_v45 = vrot.slane %v62_v25, %v2497_v30 }
  0x41   :  { %1683 = vmatpush1.bf16.msra.mxu0 %v2172_v49  ;;  %1555 = vmatprep.subr.bf16.mxu1 %v2173_v50  ;;  %v107_v46 = vrot.slane %v62_v25, %v106_v31 }
  0x42   :  { %1684 = vmatprep.subr.bf16.mxu0 %v2175_v51  ;;  %v73_v38 = vmul.f32 %v71_v32, %v2475_v48  ;;  %v117_v49 = vmul.f32 %v103_v37, %v89_v34  ;;  %v121_v51 = vmul.f32 %v103_v37, %v93_v36  ;;  %v119_v52 = vmul.f32 %v111_v41, %v91_v39 }
  0x43   :  { %v116_v48 = vmul.f32 %v99_v45, %v88_v33  ;;  %v120_v54 = vmul.f32 %v99_v45, %v92_v35 }
  0x44   :  { %1556 = vmatpush1.bf16.msra.mxu1 %v2177_v53  ;;  %v81_v47 = vrot.slane %v73_v38, %v58_v16  ;;  %v123_v53 = vmul.f32 %v111_v41, %v95_v40 }
  0x45   :  { %1685 = vmatpush1.bf16.msra.mxu0 %v2178_v55  ;;  %1557 = vmatprep.subr.bf16.mxu1 %v2179_v56  ;;  %v118_v55 = vmul.f32 %v107_v46, %v90_v43  ;;  %v122_v56 = vmul.f32 %v107_v46, %v94_v44 }
  0x46   :  { %1686 = vmatprep.subr.bf16.mxu0 %v2181_v57  ;;  %v83_v50 = vsub.f32 %v63_v42, %v81_v47 }
  0x48   :  { %1558 = vmatpush1.bf16.msra.mxu1 %v2183_v59  ;;  %v132_v57 = vrot.slane %v83_v50, %v2486_v24  ;;  %v140_v58 = vrot.slane %v83_v50, %v110_v27  ;;  %v128_v59 = vrot.slane %v83_v50, %v2497_v30  ;;  %v136_v60 = vrot.slane %v83_v50, %v106_v31 }
  0x49   :  { %1687 = vmatpush1.bf16.msra.mxu0 %v2184_v61  ;;  %1559 = vmatprep.subr.bf16.mxu1 %v2185_v62 }
  0x4a   :  { %1688 = vmatprep.subr.bf16.mxu0 %v2187_v63  ;;  %v146_v61 = vadd.f32 %v132_v57, %v117_v49  ;;  %v150_v62 = vadd.f32 %v132_v57, %v121_v51  ;;  %v148_v63 = vadd.f32 %v140_v58, %v119_v52  ;;  %v152_v0 = vadd.f32 %v140_v58, %v123_v53 }
  0x4b   :  { %v145_v1 = vadd.f32 %v128_v59, %v116_v48  ;;  %v149_v2 = vadd.f32 %v128_v59, %v120_v54  ;;  %v147_v3 = vadd.f32 %v136_v60, %v118_v55  ;;  %v2197_v59 = vld [vmem:[#allocation2 + $0x100] ss:$8 sps:$4 sm:$0xff]  }
  0x4c   :  { %1560 = vmatpush1.bf16.msra.mxu1 %v2189_v4  ;;  %v151_v4 = vadd.f32 %v136_v60, %v122_v56  ;;  %v160_v8 = vpack.c.bf16 %v152_v0, %v152_v0 }
  0x4d   :  { %1689 = vmatpush1.bf16.msra.mxu0 %v2190_v5  ;;  %1561 = vmatprep.subr.bf16.mxu1 %v2191_v6  ;;  %v154_v5 = vpack.c.bf16 %v146_v61, %v146_v61  ;;  %v158_v6 = vpack.c.bf16 %v150_v62, %v150_v62  ;;  %v153_v9 = vpack.c.bf16 %v145_v1, %v145_v1 }
  0x4e   :  { %1690 = vmatprep.subr.bf16.mxu0 %v2193_v7  ;;  %v156_v7 = vpack.c.bf16 %v148_v63, %v148_v63  ;;  %v2507_v12 = vpack.c.bf16 %v151_v4, %v151_v4  ;;  %v211_v19 = vshrl.u32 %v160_v8, 16  ;;  %v214_v20 = vshll.u32 %v160_v8, 16  ;;  %v2205_v8 = vld [vmem:[#allocation2 + $0x114] ss:$8 sps:$4 sm:$0xff]  }
  0x4f   :  { %v169_v13 = vshrl.u32 %v154_v5, 16  ;;  %v200_v16 = vshll.u32 %v158_v6, 16  ;;  %v162_v23 = vshrl.u32 %v153_v9, 16  ;;  %v165_v25 = vshll.u32 %v153_v9, 16 }
  0x50   :  { %1562 = vmatpush1.bf16.msra.mxu1 %v2195_v10  ;;  %v157_v10 = vpack.c.bf16 %v149_v2, %v149_v2  ;;  %v183_v17 = vshrl.u32 %v156_v7, 16  ;;  %v186_v18 = vshll.u32 %v156_v7, 16  ;;  %v213_v27 = vrot.slane %v211_v19, 7 }
  0x51   :  { %1691 = vmatpush1.bf16.msra.mxu0 %v2196_v11  ;;  %1574 = vmatprep.subr.bf16.mxu1 %v2199_v14  ;;  %v155_v11 = vpack.c.bf16 %v147_v3, %v147_v3  ;;  %v172_v14 = vshll.u32 %v154_v5, 16  ;;  %v171_v21 = vrot.slane %v169_v13, 7  ;;  %v164_v34 = vrot.slane %v162_v23, 7 }
  0x52   :  { %1703 = vmatprep.subr.bf16.mxu0 %v2202_v15  ;;  %v197_v15 = vshrl.u32 %v158_v6, 16  ;;  %v185_v26 = vrot.slane %v183_v17, 7  ;;  %v190_v28 = vshrl.u32 %v157_v10, 16  ;;  %v193_v29 = vshll.u32 %v157_v10, 16 }
  0x53   :  { %v174_v31 = vor.u32 %v172_v14, %v171_v21  ;;  %v176_v35 = vshrl.u32 %v155_v11, 16  ;;  %v216_v38 = vor.u32 %v214_v20, %v213_v27  ;;  %v179_v40 = vshll.u32 %v155_v11, 16  ;;  %v2211_v21 = vld [vmem:[#allocation2 + $0x124] ss:$8 sps:$4 sm:$0xff]  }
  0x54   :  { %v199_v22 = vrot.slane %v197_v15, 7  ;;  %v188_v37 = vor.u32 %v186_v18, %v185_v26  ;;  %v192_v39 = vrot.slane %v190_v28, 7  ;;  %v167_v43 = vor.u32 %v165_v25, %v164_v34  ;;  %v2209_v28 = vld [vmem:[#allocation2 + $0x120] ss:$8 sps:$4 sm:$0xff]  }
  0x55   :  { %v229_v41 = vsel %vm2511_vm4, 0, %v174_v31  ;;  %v178_v44 = vrot.slane %v176_v35, 7  ;;  %v235_v49 = vsel %vm2511_vm4, 0, %v216_v38  ;;  %v204_v63 = vshrl.u32 %v2507_v12, 16 }
  0x56   :  { %v202_v32 = vor.u32 %v200_v16, %v199_v22  ;;  %v2527_v45 = vsel %vm2517_vm5, %v229_v41, 0  ;;  %v231_v47 = vsel %vm2511_vm4, 0, %v188_v37  ;;  %v2545_v52 = vsel %vm2517_vm5, %v235_v49, 0  ;;  %v2203_v16 = vld [vmem:[#allocation2 + $0x110] ss:$8 sps:$4 sm:$0xff]  }
  0x57   :  { %v2541_v51 = vsel %vm2517_vm5, %v231_v47, 0  ;;  %v195_v54 = vor.u32 %v193_v29, %v192_v39  ;;  %v297_v55 = vshrl.u32 %v2545_v52, 16  ;;  %v299_v56 = vshll.u32 %v2545_v52, 16  ;;  %v2217_v29 = vld [vmem:[#allocation2 + $0x134] ss:$8 sps:$4 sm:$0xff]  }
  0x58   :  { %v233_v42 = vsel %vm2511_vm4, 0, %v202_v32  ;;  %v269_v53 = vshrl.u32 %v2541_v51, 16  ;;  %v271_v48 = vshll.u32 %v2541_v51, 16  ;;  %v228_v57 = vsel %vm2511_vm4, 0, %v167_v43 }
  0x59   :  { %v2531_v46 = vsel %vm2517_vm5, %v233_v42, 0  ;;  %v181_v58 = vor.u32 %v179_v40, %v178_v44  ;;  %v232_v61 = vsel %vm2511_vm4, 0, %v195_v54  ;;  %v2557_v62 = vsel %vm2517_vm5, %v228_v57, 0  ;;  %v2200_v40 = vld [vmem:[#allocation2 + $0x400] ss:$8 sps:$4 sm:$0xff]  }
  0x5a   :  { %v1864_v50 = vcombine.low %v2527_v45, %v2531_v46  ;;  %v273_v60 = vrot.slane %v271_v48, 1  ;;  %v301_v0 = vrot.slane %v299_v56, 1  ;;  %v2562_v1 = vsel %vm2517_vm5, %v232_v61, 0  ;;  %v2208_v42 = vld [vmem:[#allocation2 + $0x414] ss:$8 sps:$4 sm:$0xff]  }
  0x5b   :  { %v207_v2 = vshll.u32 %v2507_v12, 16  ;;  %v230_v3 = vsel %vm2511_vm4, 0, %v181_v58  ;;  %v1863_v5 = vcombine.low %v2557_v62, %v2562_v1  ;;  %v206_v6 = vrot.slane %v204_v63, 7  ;;  %v2215_v44 = vld [vmem:[#allocation2 + $0x130] ss:$8 sps:$4 sm:$0xff]  }
  0x5c   :  { %1563 = vmatprep.mubr.bf16.mxu1 %v1864_v50  ;;  %v274_v4 = vor.u32 %v273_v60, %v269_v53  ;;  %v2571_v7 = vsel %vm2517_vm5, %v230_v3, 0  ;;  %v302_v9 = vor.u32 %v301_v0, %v297_v55  ;;  %v1866_v11 = vcombine.low %v2541_v51, %v2545_v52  ;;  %v2223_v50 = vld [vmem:[#allocation2 + $0x144] ss:$8 sps:$4 sm:$0xff]   ;;  %v2206_v57 = vld [vmem:[#allocation2 + $0x410] ss:$8 sps:$4 sm:$0xff]  }
  0x5d   :  { %v264_v10 = vshll.u32 %v2571_v7, 16  ;;  %1564 = vmatmul.mubr.bf16.vlgmr.msra.gmra.mrb[0].mxu1 %v1863_v5  ;;  %v209_v12 = vor.u32 %v207_v2, %v206_v6  ;;  %v311_v13 = vrot.slane %v2557_v62, 1  ;;  %v257_v14 = vshll.u32 %v2527_v45, 16  ;;  %v2220_v3 = vld [vmem:[#allocation2 + $0x434] ss:$8 sps:$4 sm:$0xff]  }
  0x5e   :  { %v1870_v15 = vcombine.low %v274_v4, %v302_v9  ;;  %1575 = vmatpush1.bf16.msra.mxu1 %v2197_v59  ;;  %1606 = vmatprep.mubr.bf16.mxu1 %v1866_v11  ;;  %v315_v17 = vrot.slane %v2562_v1, 1  ;;  %v262_v19 = vshrl.u32 %v2571_v7, 16  ;;  %v285_v22 = vshll.u32 %v2531_v46, 16  ;;  %v2221_v59 = vld [vmem:[#allocation2 + $0x140] ss:$8 sps:$4 sm:$0xff]  }
  0x5f   :  { %v234_v18 = vsel %vm2511_vm4, 0, %v209_v12  ;;  %v266_v20 = vrot.slane %v264_v10, 1  ;;  %1576 = vmatprep.subr.bf16.mxu1 %v2205_v8  ;;  %v312_v31 = vrot.slane %v2527_v45, 1  ;;  %v255_v32 = vshrl.u32 %v2527_v45, 16  ;;  %v2227_v5 = vld [vmem:[#allocation2 + $0x150] ss:$8 sps:$4 sm:$0xff]  }
  0x60   :  { %1692 = vmatprep.mubr.bf16.mxu0 %v1870_v15  ;;  %v2585_v23 = vsel %vm2517_vm5, %v234_v18, 0  ;;  %v2587_v25 = vcombine.low %v311_v13, %v315_v17  ;;  %v259_v33 = vrot.slane %v257_v14, 1  ;;  %v316_v36 = vrot.slane %v2531_v46, 1  ;;  %v2235_v8 = vld [vmem:[#allocation2 + $0x164] ss:$8 sps:$4 sm:$0xff]  }
  0x61   :  { %v290_v26 = vshrl.u32 %v2585_v23, 16  ;;  %v292_v27 = vshll.u32 %v2585_v23, 16  ;;  %v267_v34 = vor.u32 %v266_v20, %v262_v19  ;;  %v283_v37 = vshrl.u32 %v2531_v46, 16  ;;  %v2218_v9 = vld [vmem:[#allocation2 + $0x430] ss:$8 sps:$4 sm:$0xff]  }
  0x62   :  { %1577 = vmatpush1.bf16.msra.mxu1 %v2203_v16  ;;  %v2595_v38 = vor.u32 %v259_v33, %v255_v32  ;;  %v287_v39 = vrot.slane %v285_v22, 1  ;;  %v314_v43 = vrot.slane %v2541_v51, 1  ;;  %v318_v45 = vrot.slane %v2545_v52, 1  ;;  %v2214_v52 = vld [vmem:[#allocation2 + $0x424] ss:$8 sps:$4 sm:$0xff]  }
  0x63   :  { %v294_v35 = vrot.slane %v292_v27, 1  ;;  %1578 = vmatprep.subr.bf16.mxu1 %v2211_v21  ;;  %v1872_v53 = vcombine.low %v312_v31, %v316_v36  ;;  %v248_v46 = vshrl.u32 %v2557_v62, 16  ;;  %v250_v48 = vshll.u32 %v2557_v62, 16  ;;  %v2229_v62 = vld [vmem:[#allocation2 + $0x154] ss:$8 sps:$4 sm:$0xff]  }
  0x64   :  { %v2598_v47 = vor.u32 %v287_v39, %v283_v37  ;;  %v2605_v55 = vcombine.low %v314_v43, %v318_v45  ;;  %v276_v51 = vshrl.u32 %v2562_v1, 16  ;;  %v278_v56 = vshll.u32 %v2562_v1, 16  ;;  %v2212_v1 = vld [vmem:[#allocation2 + $0x420] ss:$8 sps:$4 sm:$0xff]   ;;  %v2226_v10 = vld [vmem:[#allocation2 + $0x444] ss:$8 sps:$4 sm:$0xff]  }
  0x65   :  { %v295_v41 = vor.u32 %v294_v35, %v290_v26  ;;  %v252_v58 = vrot.slane %v250_v48, 1  ;;  %v313_v61 = vrot.slane %v2571_v7, 1  ;;  %v317_v0 = vrot.slane %v2585_v23, 1  ;;  %v2233_v11 = vld [vmem:[#allocation2 + $0x160] ss:$8 sps:$4 sm:$0xff]  }
  0x66   :  { %1579 = vmatpush1.bf16.msra.mxu1 %v2209_v28  ;;  %v1868_v54 = vcombine.low %v2595_v38, %v2598_v47  ;;  %v280_v60 = vrot.slane %v278_v56, 1  ;;  %v2241_v12 = vld [vmem:[#allocation2 + $0x174] ss:$8 sps:$4 sm:$0xff]   ;;  %v2224_v13 = vld [vmem:[#allocation2 + $0x440] ss:$8 sps:$4 sm:$0xff]  }
  0x67   :  { %v1869_v49 = vcombine.low %v267_v34, %v295_v41  ;;  %1580 = vmatprep.subr.bf16.mxu1 %v2217_v29  ;;  %v2610_v63 = vor.u32 %v252_v58, %v248_v46  ;;  %v2615_v4 = vcombine.low %v313_v61, %v317_v0  ;;  %v2232_v14 = vld [vmem:[#allocation2 + $0x454] ss:$8 sps:$4 sm:$0xff]   ;;  %v2239_v15 = vld [vmem:[#allocation2 + $0x170] ss:$8 sps:$4 sm:$0xff]   ;;  %v2247_v16 = vld [vmem:[#allocation2 + $0x184] ss:$8 sps:$4 sm:$0xff]  }
  0x68   :  { %v2613_v2 = vor.u32 %v280_v60, %v276_v51  ;;  %v2230_v17 = vld [vmem:[#allocation2 + $0x450] ss:$8 sps:$4 sm:$0xff]   ;;  %v2238_v18 = vld [vmem:[#allocation2 + $0x464] ss:$8 sps:$4 sm:$0xff]   ;;  %v2245_v19 = vld [vmem:[#allocation2 + $0x180] ss:$8 sps:$4 sm:$0xff]  }
  0x69   :  { %1693 = vmatmul.mubr.bf16.vlgmr.msra.gmra.mrb[0].mxu0 %v1869_v49  ;;  %v2253_v20 = vld [vmem:[#allocation2 + $0x194] ss:$8 sps:$4 sm:$0xff]   ;;  %v2236_v21 = vld [vmem:[#allocation2 + $0x460] ss:$8 sps:$4 sm:$0xff]   ;;  %v2251_v26 = vld [vmem:[#allocation2 + $0x190] ss:$8 sps:$4 sm:$0xff]  }
  0x6a   :  { %1704 = vmatpush1.bf16.msra.mxu0 %v2200_v40  ;;  %1581 = vmatpush1.bf16.msra.mxu1 %v2215_v44  ;;  %v1867_v6 = vcombine.low %v2610_v63, %v2613_v2  ;;  %v2244_v22 = vld [vmem:[#allocation2 + $0x474] ss:$8 sps:$4 sm:$0xff]   ;;  %v2259_v27 = vld [vmem:[#allocation2 + $0x1a4] ss:$8 sps:$4 sm:$0xff]   ;;  %v2242_v28 = vld [vmem:[#allocation2 + $0x470] ss:$8 sps:$4 sm:$0xff]  }
  0x6b   :  { %1705 = vmatprep.subr.bf16.mxu0 %v2208_v42  ;;  %1582 = vmatprep.subr.bf16.mxu1 %v2223_v50  ;;  %v2257_v29 = vld [vmem:[#allocation2 + $0x1a0] ss:$8 sps:$4 sm:$0xff]   ;;  %v2250_v31 = vld [vmem:[#allocation2 + $0x484] ss:$8 sps:$4 sm:$0xff]   ;;  %v2265_v32 = vld [vmem:[#allocation2 + $0x1b4] ss:$8 sps:$4 sm:$0xff]  }
  0x6c   :  { %1735 = vmatprep.mubr.bf16.mxu0 %v1872_v53  ;;  %v2248_v33 = vld [vmem:[#allocation2 + $0x480] ss:$8 sps:$4 sm:$0xff]   ;;  %v2263_v34 = vld [vmem:[#allocation2 + $0x1b0] ss:$8 sps:$4 sm:$0xff]   ;;  %v2256_v35 = vld [vmem:[#allocation2 + $0x494] ss:$8 sps:$4 sm:$0xff]  }
  0x6d   :  { %v2271_v36 = vld [vmem:[#allocation2 + $0x1c4] ss:$8 sps:$4 sm:$0xff]   ;;  %v2254_v37 = vld [vmem:[#allocation2 + $0x490] ss:$8 sps:$4 sm:$0xff]   ;;  %v2269_v39 = vld [vmem:[#allocation2 + $0x1c0] ss:$8 sps:$4 sm:$0xff]  }
  0x6e   :  { %1706 = vmatpush1.bf16.msra.mxu0 %v2206_v57  ;;  %1583 = vmatpush1.bf16.msra.mxu1 %v2221_v59  ;;  %v2262_v40 = vld [vmem:[#allocation2 + $0x4a4] ss:$8 sps:$4 sm:$0xff]   ;;  %v2277_v41 = vld [vmem:[#allocation2 + $0x1d4] ss:$8 sps:$4 sm:$0xff]   ;;  %v2260_v42 = vld [vmem:[#allocation2 + $0x4a0] ss:$8 sps:$4 sm:$0xff]  }
  0x6f   :  { %1707 = vmatprep.subr.bf16.mxu0 %v2214_v52  ;;  %1584 = vmatprep.subr.bf16.mxu1 %v2229_v62  ;;  %v2275_v43 = vld [vmem:[#allocation2 + $0x1d0] ss:$8 sps:$4 sm:$0xff]   ;;  %v2268_v44 = vld [vmem:[#allocation2 + $0x4b4] ss:$8 sps:$4 sm:$0xff]   ;;  %v2283_v45 = vld [vmem:[#allocation2 + $0x1e4] ss:$8 sps:$4 sm:$0xff]   ;;  %v1865_v52 = vcombine.low %v2571_v7, %v2585_v23 }
  0x70   :  { %v2266_v49 = vld [vmem:[#allocation2 + $0x4b0] ss:$8 sps:$4 sm:$0xff]   ;;  %v2281_v50 = vld [vmem:[#allocation2 + $0x1e0] ss:$8 sps:$4 sm:$0xff]   ;;  %v2274_v53 = vld [vmem:[#allocation2 + $0x4c4] ss:$8 sps:$4 sm:$0xff]  }
  0x71   :  { %v2289_v46 = vld [vmem:[#allocation2 + $0x1f4] ss:$8 sps:$4 sm:$0xff]   ;;  %v2272_v48 = vld [vmem:[#allocation2 + $0x4c0] ss:$8 sps:$4 sm:$0xff]   ;;  %v2287_v51 = vld [vmem:[#allocation2 + $0x1f0] ss:$8 sps:$4 sm:$0xff]  }
  0x72   :  { %1708 = vmatpush1.bf16.msra.mxu0 %v2212_v1  ;;  %1585 = vmatpush1.bf16.msra.mxu1 %v2227_v5  ;;  %v2280_v56 = vld [vmem:[#allocation2 + $0x4d4] ss:$8 sps:$4 sm:$0xff]   ;;  %v2295_v57 = vld [vmem:[#allocation2 + $0x204] ss:$8 sps:$4 sm:$0xff]   ;;  %v2278_v58 = vld [vmem:[#allocation2 + $0x4d0] ss:$8 sps:$4 sm:$0xff]  }
  0x73   :  { %1709 = vmatprep.subr.bf16.mxu0 %v2220_v3  ;;  %1586 = vmatprep.subr.bf16.mxu1 %v2235_v8  ;;  %v2293_v59 = vld [vmem:[#allocation2 + $0x200] ss:$8 sps:$4 sm:$0xff]   ;;  %v2286_v60 = vld [vmem:[#allocation2 + $0x4e4] ss:$8 sps:$4 sm:$0xff]   ;;  %v2301_v61 = vld [vmem:[#allocation2 + $0x214] ss:$8 sps:$4 sm:$0xff]  }
  0x74   :  { %v2284_v62 = vld [vmem:[#allocation2 + $0x4e0] ss:$8 sps:$4 sm:$0xff]   ;;  %v2299_v0 = vld [vmem:[#allocation2 + $0x210] ss:$8 sps:$4 sm:$0xff]   ;;  %v2292_v1 = vld [vmem:[#allocation2 + $0x4f4] ss:$8 sps:$4 sm:$0xff]  }
  0x75   :  { %v2307_v3 = vld [vmem:[#allocation2 + $0x224] ss:$8 sps:$4 sm:$0xff]   ;;  %v2290_v7 = vld [vmem:[#allocation2 + $0x4f0] ss:$8 sps:$4 sm:$0xff]   ;;  %v2305_v23 = vld [vmem:[#allocation2 + $0x220] ss:$8 sps:$4 sm:$0xff]  }
  0x76   :  { %1710 = vmatpush1.bf16.msra.mxu0 %v2218_v9  ;;  %1587 = vmatpush1.bf16.msra.mxu1 %v2233_v11  ;;  %v2298_v5 = vld [vmem:[#allocation2 + $0x504] ss:$8 sps:$4 sm:$0xff]   ;;  %v2313_v8 = vld [vmem:[#allocation2 + $0x234] ss:$8 sps:$4 sm:$0xff]   ;;  %v2296_v9 = vld [vmem:[#allocation2 + $0x500] ss:$8 sps:$4 sm:$0xff]  }
  0x77   :  { %1711 = vmatprep.subr.bf16.mxu0 %v2226_v10  ;;  %1588 = vmatprep.subr.bf16.mxu1 %v2241_v12  ;;  %v2311_v10 = vld [vmem:[#allocation2 + $0x230] ss:$8 sps:$4 sm:$0xff]   ;;  %v2304_v11 = vld [vmem:[#allocation2 + $0x514] ss:$8 sps:$4 sm:$0xff]   ;;  %v2319_v12 = vld [vmem:[#allocation2 + $0x244] ss:$8 sps:$4 sm:$0xff]  }
  0x78   :  { %v2302_v38 = vld [vmem:[#allocation2 + $0x510] ss:$8 sps:$4 sm:$0xff]   ;;  %v2317_v47 = vld [vmem:[#allocation2 + $0x240] ss:$8 sps:$4 sm:$0xff]  }
  0x7a   :  { %1712 = vmatpush1.bf16.msra.mxu0 %v2224_v13  ;;  %1589 = vmatpush1.bf16.msra.mxu1 %v2239_v15  ;;  %v2325_v13 = vld [vmem:[#allocation2 + $0x254] ss:$8 sps:$4 sm:$0xff]   ;;  %v2323_v15 = vld [vmem:[#allocation2 + $0x250] ss:$8 sps:$4 sm:$0xff]  }
  0x7b   :  { %1713 = vmatprep.subr.bf16.mxu0 %v2232_v14  ;;  %1590 = vmatprep.subr.bf16.mxu1 %v2247_v16  ;;  %v2308_v14 = vld [vmem:[#allocation2 + $0x520] ss:$8 sps:$4 sm:$0xff]   ;;  %v2316_v16 = vld [vmem:[#allocation2 + $0x534] ss:$8 sps:$4 sm:$0xff]  }
  0x7e   :  { %1714 = vmatpush1.bf16.msra.mxu0 %v2230_v17  ;;  %1591 = vmatpush1.bf16.msra.mxu1 %v2245_v19  ;;  %v2331_v17 = vld [vmem:[#allocation2 + $0x264] ss:$8 sps:$4 sm:$0xff]  }
  0x7f   :  { %1715 = vmatprep.subr.bf16.mxu0 %v2238_v18  ;;  %1592 = vmatprep.subr.bf16.mxu1 %v2253_v20  ;;  %v2329_v18 = vld [vmem:[#allocation2 + $0x260] ss:$8 sps:$4 sm:$0xff]   ;;  %v2322_v19 = vld [vmem:[#allocation2 + $0x544] ss:$8 sps:$4 sm:$0xff]   ;;  %v2337_v20 = vld [vmem:[#allocation2 + $0x274] ss:$8 sps:$4 sm:$0xff]  }
  0x82   :  { %1716 = vmatpush1.bf16.msra.mxu0 %v2236_v21  ;;  %1593 = vmatpush1.bf16.msra.mxu1 %v2251_v26  ;;  %v2320_v21 = vld [vmem:[#allocation2 + $0x540] ss:$8 sps:$4 sm:$0xff]   ;;  %v2343_v26 = vld [vmem:[#allocation2 + $0x284] ss:$8 sps:$4 sm:$0xff]  }
  0x83   :  { %1717 = vmatprep.subr.bf16.mxu0 %v2244_v22  ;;  %1594 = vmatprep.subr.bf16.mxu1 %v2259_v27  ;;  %v2328_v22 = vld [vmem:[#allocation2 + $0x554] ss:$8 sps:$4 sm:$0xff]   ;;  %v2326_v27 = vld [vmem:[#allocation2 + $0x550] ss:$8 sps:$4 sm:$0xff]  }
  0x86   :  { %1718 = vmatpush1.bf16.msra.mxu0 %v2242_v28  ;;  %1595 = vmatpush1.bf16.msra.mxu1 %v2257_v29  ;;  %v2341_v28 = vld [vmem:[#allocation2 + $0x280] ss:$8 sps:$4 sm:$0xff]   ;;  %v2334_v29 = vld [vmem:[#allocation2 + $0x564] ss:$8 sps:$4 sm:$0xff]  }
  0x87   :  { %1719 = vmatprep.subr.bf16.mxu0 %v2250_v31  ;;  %1596 = vmatprep.subr.bf16.mxu1 %v2265_v32  ;;  %v2349_v31 = vld [vmem:[#allocation2 + $0x294] ss:$8 sps:$4 sm:$0xff]   ;;  %v2332_v32 = vld [vmem:[#allocation2 + $0x560] ss:$8 sps:$4 sm:$0xff]  }
  0x8a   :  { %1720 = vmatpush1.bf16.msra.mxu0 %v2248_v33  ;;  %1597 = vmatpush1.bf16.msra.mxu1 %v2263_v34  ;;  %v2347_v33 = vld [vmem:[#allocation2 + $0x290] ss:$8 sps:$4 sm:$0xff]   ;;  %v2340_v34 = vld [vmem:[#allocation2 + $0x574] ss:$8 sps:$4 sm:$0xff]  }
  0x8b   :  { %1721 = vmatprep.subr.bf16.mxu0 %v2256_v35  ;;  %1598 = vmatprep.subr.bf16.mxu1 %v2271_v36  ;;  %v2355_v35 = vld [vmem:[#allocation2 + $0x2a4] ss:$8 sps:$4 sm:$0xff]   ;;  %v2338_v36 = vld [vmem:[#allocation2 + $0x570] ss:$8 sps:$4 sm:$0xff]  }
  0x8e   :  { %1722 = vmatpush1.bf16.msra.mxu0 %v2254_v37  ;;  %1599 = vmatpush1.bf16.msra.mxu1 %v2269_v39  ;;  %v2353_v37 = vld [vmem:[#allocation2 + $0x2a0] ss:$8 sps:$4 sm:$0xff]   ;;  %v2346_v39 = vld [vmem:[#allocation2 + $0x584] ss:$8 sps:$4 sm:$0xff]  }
  0x8f   :  { %1723 = vmatprep.subr.bf16.mxu0 %v2262_v40  ;;  %1600 = vmatprep.subr.bf16.mxu1 %v2277_v41  ;;  %v2361_v40 = vld [vmem:[#allocation2 + $0x2b4] ss:$8 sps:$4 sm:$0xff]   ;;  %v2344_v41 = vld [vmem:[#allocation2 + $0x580] ss:$8 sps:$4 sm:$0xff]  }
  0x92   :  { %1724 = vmatpush1.bf16.msra.mxu0 %v2260_v42  ;;  %1601 = vmatpush1.bf16.msra.mxu1 %v2275_v43  ;;  %v2359_v42 = vld [vmem:[#allocation2 + $0x2b0] ss:$8 sps:$4 sm:$0xff]   ;;  %v2352_v43 = vld [vmem:[#allocation2 + $0x594] ss:$8 sps:$4 sm:$0xff]  }
  0x93   :  { %1725 = vmatprep.subr.bf16.mxu0 %v2268_v44  ;;  %1602 = vmatprep.subr.bf16.mxu1 %v2283_v45  ;;  %v2367_v44 = vld [vmem:[#allocation2 + $0x2c4] ss:$8 sps:$4 sm:$0xff]   ;;  %v2350_v45 = vld [vmem:[#allocation2 + $0x590] ss:$8 sps:$4 sm:$0xff]  }
  0x96   :  { %1726 = vmatpush1.bf16.msra.mxu0 %v2266_v49  ;;  %1603 = vmatpush1.bf16.msra.mxu1 %v2281_v50  ;;  %v2365_v49 = vld [vmem:[#allocation2 + $0x2c0] ss:$8 sps:$4 sm:$0xff]   ;;  %v2358_v50 = vld [vmem:[#allocation2 + $0x5a4] ss:$8 sps:$4 sm:$0xff]  }
  0x97   :  { %1727 = vmatprep.subr.bf16.mxu0 %v2274_v53  ;;  %1604 = vmatprep.subr.bf16.mxu1 %v2289_v46  ;;  %v2373_v53 = vld [vmem:[#allocation2 + $0x2d4] ss:$8 sps:$4 sm:$0xff]   ;;  %v2356_v46 = vld [vmem:[#allocation2 + $0x5a0] ss:$8 sps:$4 sm:$0xff]  }
  0x9a   :  { %1728 = vmatpush1.bf16.msra.mxu0 %v2272_v48  ;;  %1605 = vmatpush1.bf16.msra.mxu1 %v2287_v51  ;;  %v2371_v48 = vld [vmem:[#allocation2 + $0x2d0] ss:$8 sps:$4 sm:$0xff]   ;;  %v2364_v51 = vld [vmem:[#allocation2 + $0x5b4] ss:$8 sps:$4 sm:$0xff]  }
  0x9b   :  { %1729 = vmatprep.subr.bf16.mxu0 %v2280_v56  ;;  %1617 = vmatprep.subr.bf16.mxu1 %v2295_v57  ;;  %v2379_v56 = vld [vmem:[#allocation2 + $0x2e4] ss:$8 sps:$4 sm:$0xff]   ;;  %v2362_v57 = vld [vmem:[#allocation2 + $0x5b0] ss:$8 sps:$4 sm:$0xff]  }
  0x9d   :  { %1607 = vmatmul.mubr.bf16.vlgmr.msra.gmra.mrb[0].mxu1 %v1865_v52  ;;  %v2377_v52 = vld [vmem:[#allocation2 + $0x2e0] ss:$8 sps:$4 sm:$0xff]  }
  0x9e   :  { %1730 = vmatpush1.bf16.msra.mxu0 %v2278_v58  ;;  %1618 = vmatpush1.bf16.msra.mxu1 %v2293_v59  ;;  %v2370_v58 = vld [vmem:[#allocation2 + $0x5c4] ss:$8 sps:$4 sm:$0xff]   ;;  %v2385_v59 = vld [vmem:[#allocation2 + $0x2f4] ss:$8 sps:$4 sm:$0xff]  }
  0x9f   :  { %1731 = vmatprep.subr.bf16.mxu0 %v2286_v60  ;;  %1619 = vmatprep.subr.bf16.mxu1 %v2301_v61  ;;  %v2368_v60 = vld [vmem:[#allocation2 + $0x5c0] ss:$8 sps:$4 sm:$0xff]   ;;  %v2383_v61 = vld [vmem:[#allocation2 + $0x2f0] ss:$8 sps:$4 sm:$0xff]  }
  0xa0   :  { %1649 = vmatprep.mubr.bf16.mxu1 %v1868_v54  ;;  %v2310_v54 = vld [vmem:[#allocation2 + $0x524] ss:$8 sps:$4 sm:$0xff]  }
  0xa2   :  { %1732 = vmatpush1.bf16.msra.mxu0 %v2284_v62  ;;  %1620 = vmatpush1.bf16.msra.mxu1 %v2299_v0  ;;  %v2376_v62 = vld [vmem:[#allocation2 + $0x5d4] ss:$8 sps:$4 sm:$0xff]   ;;  %v2374_v0 = vld [vmem:[#allocation2 + $0x5d0] ss:$8 sps:$4 sm:$0xff]  }
  0xa3   :  { %1733 = vmatprep.subr.bf16.mxu0 %v2292_v1  ;;  %1621 = vmatprep.subr.bf16.mxu1 %v2307_v3  ;;  %v2382_v1 = vld [vmem:[#allocation2 + $0x5e4] ss:$8 sps:$4 sm:$0xff]   ;;  %v2380_v3 = vld [vmem:[#allocation2 + $0x5e0] ss:$8 sps:$4 sm:$0xff]  }
  0xa6   :  { %1734 = vmatpush1.bf16.msra.mxu0 %v2290_v7  ;;  %1622 = vmatpush1.bf16.msra.mxu1 %v2305_v23  ;;  %v2388_v7 = vld [vmem:[#allocation2 + $0x5f4] ss:$8 sps:$4 sm:$0xff]   ;;  %v2386_v23 = vld [vmem:[#allocation2 + $0x5f0] ss:$8 sps:$4 sm:$0xff]  }
  0xa7   :  { %1746 = vmatprep.subr.bf16.mxu0 %v2298_v5  ;;  %1623 = vmatprep.subr.bf16.mxu1 %v2313_v8 }
  0xa9   :  { %1736 = vmatmul.mubr.bf16.vlgmr.msra.gmra.mrb[0].mxu0 %v2587_v25  ;;  %v2314_v25 = vld [vmem:[#allocation2 + $0x530] ss:$8 sps:$4 sm:$0xff]  }
  0xaa   :  { %1747 = vmatpush1.bf16.msra.mxu0 %v2296_v9  ;;  %1624 = vmatpush1.bf16.msra.mxu1 %v2311_v10  ;;  %v535_v9 = vld [vmem:[%s2651_s5] sm:$0x3] }
  0xab   :  { %1748 = vmatprep.subr.bf16.mxu0 %v2304_v11  ;;  %1625 = vmatprep.subr.bf16.mxu1 %v2319_v12  ;;  %v540_v63 = vrot.slane %v535_v9, %v2497_v30  ;;  %v544_v2 = vrot.slane %v535_v9, %v2486_v24 }
  0xac   :  { %1778 = vmatprep.mubr.bf16.mxu0 %v2605_v55  ;;  %v2335_v55 = vld [vmem:[#allocation2 + $0x270] ss:$8 sps:$4 sm:$0xff]  }
  0xae   :  { %1749 = vmatpush1.bf16.msra.mxu0 %v2302_v38  ;;  %1626 = vmatpush1.bf16.msra.mxu1 %v2317_v47 }
  0xaf   :  { %1750 = vmatprep.subr.bf16.mxu0 %v2310_v54  ;;  %1627 = vmatprep.subr.bf16.mxu1 %v2325_v13 }
  0xb2   :  { %1751 = vmatpush1.bf16.msra.mxu0 %v2308_v14  ;;  %1628 = vmatpush1.bf16.msra.mxu1 %v2323_v15 }
  0xb3   :  { %1752 = vmatprep.subr.bf16.mxu0 %v2316_v16  ;;  %1629 = vmatprep.subr.bf16.mxu1 %v2331_v17 }
  0xb6   :  { %1753 = vmatpush1.bf16.msra.mxu0 %v2314_v25  ;;  %1630 = vmatpush1.bf16.msra.mxu1 %v2329_v18 }
  0xb7   :  { %1754 = vmatprep.subr.bf16.mxu0 %v2322_v19  ;;  %1631 = vmatprep.subr.bf16.mxu1 %v2337_v20 }
  0xba   :  { %1755 = vmatpush1.bf16.msra.mxu0 %v2320_v21  ;;  %1632 = vmatpush1.bf16.msra.mxu1 %v2335_v55 }
  0xbb   :  { %1756 = vmatprep.subr.bf16.mxu0 %v2328_v22  ;;  %1633 = vmatprep.subr.bf16.mxu1 %v2343_v26 }
  0xbe   :  { %1757 = vmatpush1.bf16.msra.mxu0 %v2326_v27  ;;  %1634 = vmatpush1.bf16.msra.mxu1 %v2341_v28 }
  0xbf   :  { %1758 = vmatprep.subr.bf16.mxu0 %v2334_v29  ;;  %1635 = vmatprep.subr.bf16.mxu1 %v2349_v31 }
  0xc2   :  { %1759 = vmatpush1.bf16.msra.mxu0 %v2332_v32  ;;  %1636 = vmatpush1.bf16.msra.mxu1 %v2347_v33 }
  0xc3   :  { %1760 = vmatprep.subr.bf16.mxu0 %v2340_v34  ;;  %1637 = vmatprep.subr.bf16.mxu1 %v2355_v35 }
  0xc6   :  { %1761 = vmatpush1.bf16.msra.mxu0 %v2338_v36  ;;  %1638 = vmatpush1.bf16.msra.mxu1 %v2353_v37 }
  0xc7   :  { %1762 = vmatprep.subr.bf16.mxu0 %v2346_v39  ;;  %1639 = vmatprep.subr.bf16.mxu1 %v2361_v40 }
  0xca   :  { %1763 = vmatpush1.bf16.msra.mxu0 %v2344_v41  ;;  %1640 = vmatpush1.bf16.msra.mxu1 %v2359_v42 }
  0xcb   :  { %1764 = vmatprep.subr.bf16.mxu0 %v2352_v43  ;;  %1641 = vmatprep.subr.bf16.mxu1 %v2367_v44 }
  0xce   :  { %1765 = vmatpush1.bf16.msra.mxu0 %v2350_v45  ;;  %1642 = vmatpush1.bf16.msra.mxu1 %v2365_v49 }
  0xcf   :  { %1766 = vmatprep.subr.bf16.mxu0 %v2358_v50  ;;  %1643 = vmatprep.subr.bf16.mxu1 %v2373_v53 }
  0xd2   :  { %1767 = vmatpush1.bf16.msra.mxu0 %v2356_v46  ;;  %1644 = vmatpush1.bf16.msra.mxu1 %v2371_v48 }
  0xd3   :  { %1768 = vmatprep.subr.bf16.mxu0 %v2364_v51  ;;  %1645 = vmatprep.subr.bf16.mxu1 %v2379_v56 }
  0xd6   :  { %1769 = vmatpush1.bf16.msra.mxu0 %v2362_v57  ;;  %1646 = vmatpush1.bf16.msra.mxu1 %v2377_v52 }
  0xd7   :  { %1770 = vmatprep.subr.bf16.mxu0 %v2370_v58  ;;  %1647 = vmatprep.subr.bf16.mxu1 %v2385_v59 }
  0xda   :  { %1771 = vmatpush1.bf16.msra.mxu0 %v2368_v60  ;;  %1648 = vmatpush1.bf16.msra.mxu1 %v2383_v61 }
  0xdb   :  { %1772 = vmatprep.subr.bf16.mxu0 %v2376_v62 }
  0xdd   :  { %1650 = vmatmul.mubr.bf16.vlgmr.msra.gmra.mrb[0].mxu1 %v1867_v6 }
  0xde   :  { %1773 = vmatpush1.bf16.msra.mxu0 %v2374_v0 }
  0xdf   :  { %1774 = vmatprep.subr.bf16.mxu0 %v2382_v1 }
  0xe2   :  { %1775 = vmatpush1.bf16.msra.mxu0 %v2380_v3 }
  0xe3   :  { %1776 = vmatprep.subr.bf16.mxu0 %v2388_v7 }
  0xe6   :  { %1777 = vmatpush1.bf16.msra.mxu0 %v2386_v23 }
  0xe9   :  { %1779 = vmatmul.mubr.bf16.vlgmr.msra.gmra.mrb[0].mxu0 %v2615_v4 }
 0x1b0   :  { %v1651_v5 = vpop.f32.mrb[0].mxu1 }
 0x1b1   :  { %v1653_v8 = vpop.f32.mrb[1].mxu1  ;;  %v2072_v6 = vadd.f32 %v1651_v5, %v540_v63 }
 0x1b2   :  { %v1655_v10 = vpop.f32.mrb[2].mxu1  ;;  %v2074_v12 = vadd.f32 %v1653_v8, %v544_v2 }
 0x1b3   :  { %v1657_v11 = vpop.f32.mrb[3].mxu1  ;;  %v2076_v38 = vadd.f32 %v1655_v10, %v540_v63 }
 0x1b4   :  { %v2078_v54 = vadd.f32 %v1657_v11, %v544_v2 }
 0x1bc   :  { %v1780_v47 = vpop.f32.mrb[0].mxu0 }
 0x1bd   :  { %v2073_v13 = vadd.f32 %v2072_v6, %v1780_v47  ;;  %v1782_v14 = vpop.f32.mrb[1].mxu0 }
 0x1be   :  { %v2075_v4 = vadd.f32 %v2074_v12, %v1782_v14  ;;  %v1784_v15 = vpop.f32.mrb[2].mxu0 }
 0x1bf   :  { %v2077_v16 = vadd.f32 %v2076_v38, %v1784_v15  ;;  %v1786_v17 = vpop.f32.mrb[3].mxu0  ;;  %v1803_v19 = vmul.f32 %v2073_v13, %v2073_v13 }
 0x1c0   :  { %v2070_v25 = vpack.c.bf16 %v2075_v4, %v2073_v13  ;;  %v2079_v18 = vadd.f32 %v2078_v54, %v1786_v17  ;;  %v1804_v55 = vmul.f32 %v2075_v4, %v2075_v4 }
 0x1c1   :  { %v1789_v20 = vadd.f32 %v2077_v16, %v2073_v13  ;;  %v1805_v21 = vmul.f32 %v2077_v16, %v2077_v16 }
 0x1c2   :  { %1852 = vst [vmem:[%s2652_s6] sm:$0xff] %v2070_v25  ;;  %v1796_v24 = vadd.f32 %v2079_v18, %v2075_v4  ;;  %v1806_v30 = vmul.f32 %v2079_v18, %v2079_v18  ;;  %v2071_v22 = vpack.c.bf16 %v2079_v18, %v2077_v16 }
 0x1c3   :  { %v1790_v26 = vrot.slane %v1789_v20, 4  ;;  %v1807_v27 = vadd.f32 %v1805_v21, %v1803_v19 }
 0x1c4   :  { %v1797_v28 = vrot.slane %v1796_v24, 4  ;;  %v1814_v29 = vadd.f32 %v1806_v30, %v1804_v55  ;;  %1853 = vst [vmem:[%s2652_s6 + $0x8] sm:$0xff] %v2071_v22 }
 0x1c5   :  { %v1791_v31 = vadd.f32 %v1790_v26, %v1789_v20  ;;  %v1808_v32 = vrot.slane %v1807_v27, 4 }
 0x1c6   :  { %v1798_v33 = vadd.f32 %v1797_v28, %v1796_v24  ;;  %v1815_v34 = vrot.slane %v1814_v29, 4 }
 0x1c7   :  { %v1792_v35 = vrot.slane %v1791_v31, 2  ;;  %v1809_v36 = vadd.f32 %v1808_v32, %v1807_v27 }
 0x1c8   :  { %v1799_v37 = vrot.slane %v1798_v33, 2  ;;  %v1816_v39 = vadd.f32 %v1815_v34, %v1814_v29 }
 0x1c9   :  { %v1793_v40 = vadd.f32 %v1792_v35, %v1791_v31  ;;  %v1810_v41 = vrot.slane %v1809_v36, 2 }
 0x1ca   :  { %v1800_v42 = vadd.f32 %v1799_v37, %v1798_v33  ;;  %v1817_v43 = vrot.slane %v1816_v39, 2 }
 0x1cb   :  { %v1794_v44 = vrot.slane %v1793_v40, 1  ;;  %v1811_v45 = vadd.f32 %v1810_v41, %v1809_v36 }
 0x1cc   :  { %v1801_v49 = vrot.slane %v1800_v42, 1  ;;  %v1818_v50 = vadd.f32 %v1817_v43, %v1816_v39 }
 0x1cd   :  { %v1812_v53 = vrot.slane %v1811_v45, 1  ;;  %v1795_v48 = vadd.f32 %v1794_v44, %v1793_v40 }
 0x1ce   :  { %v1819_v46 = vrot.slane %v1818_v50, 1  ;;  %v1802_v56 = vadd.f32 %v1801_v49, %v1800_v42 }
 0x1cf   :  { %v1813_v51 = vadd.f32 %v1812_v53, %v1811_v45 }
 0x1d0   :  { %v1820_v57 = vadd.f32 %v1819_v46, %v1818_v50 }
 0x1d1   :  { %v1822_v52 = vsel %vm225_vm1, %v1795_v48, %v1813_v51 }
 0x1d2   :  { %v1823_v58 = vsel %vm225_vm1, %v1802_v56, %v1820_v57 }
 0x1d3   :  { %v1826_v59 = vcombine.low %v1822_v52, %v1823_v58 }
 0x1d5   :  { %2067 = vst.sshfl [vmem:[%s2653_s7] sm:$0x33 pattern:$0x76325410] %v1826_v59 }
 0x1d6   :  { %1862 = vsyncpa [#allocation3], 1 }

// kernel: ts_prediction_forward.10
= control target key start
LH: loop header
LB: loop body
LE: loop exit
PB: predicated region body
PF: predicated region fallthrough
CT: control target
= control target key end

     0   :  { %v1870_v1 = vmov 0   ;;  %v1872_v37 = vmov 0.0|0.0   ;;  %vm953_vm0 = vcmask 1040384   ;;  %s1865_s2 = inlined_call_operand.vmem [shape: bf16[2,128,512], index: 2, kind: input, shape index: {}]   ;;  %s1866_s0 = inlined_call_operand.vmem [shape: bf16[2,8,512], index: 0, kind: input, shape index: {}]   ;;  %s1867_s1 = inlined_call_operand.vmem [shape: bf16[2,8,512], index: 1, kind: input, shape index: {}]   ;;  %s1868_s3 = inlined_call_operand.vmem [shape: f32[2,1,128], index: 3, kind: output, shape index: {0}]   ;;  %s1869_s4 = inlined_call_operand.vmem [shape: f32[2,1,128], index: 4, kind: output, shape index: {1}]  }
   0x1   :  { %v1350_v0 = vld [vmem:[%s1865_s2 + $0x4] ss:$16 sps:$4 sm:$0xff]   ;;  %330 = vmatprep.mubr.bf16.mxu0 %v1870_v1  ;;  %371 = vmatprep.mubr.bf16.mxu1 %v1870_v1  ;;  %v1357_v2 = vld [vmem:[%s1865_s2] ss:$16 sps:$4 sm:$0xff]   ;;  %v1380_v6 = vld [vmem:[%s1865_s2 + $0xc] ss:$16 sps:$4 sm:$0xff]  }
   0x2   :  { %298 = vmatprep.subr.bf16.mxu0 %v1350_v0  ;;  %v1363_v3 = vld [vmem:[%s1865_s2 + $0x24] ss:$16 sps:$4 sm:$0xff]   ;;  %v1369_v4 = vld [vmem:[%s1865_s2 + $0x20] ss:$16 sps:$4 sm:$0xff]   ;;  %v1385_v7 = vld [vmem:[%s1865_s2 + $0x8] ss:$16 sps:$4 sm:$0xff]   ;;  %339 = vmatprep.subr.bf16.mxu1 %v1380_v6 }
   0x3   :  { %299 = vmatpush1.bf16.msra.mxu0 %v1357_v2  ;;  %v1375_v5 = vld [vmem:[%s1865_s2 + $0x44] ss:$16 sps:$4 sm:$0xff]   ;;  %v1391_v8 = vld [vmem:[%s1865_s2 + $0x40] ss:$16 sps:$4 sm:$0xff]   ;;  %340 = vmatpush1.bf16.msra.mxu1 %v1385_v7  ;;  %v1404_v10 = vld [vmem:[%s1865_s2 + $0x2c] ss:$16 sps:$4 sm:$0xff]  }
   0x4   :  { %300 = vmatprep.subr.bf16.mxu0 %v1363_v3  ;;  %v1398_v9 = vld [vmem:[%s1865_s2 + $0x64] ss:$16 sps:$4 sm:$0xff]   ;;  %v1409_v11 = vld [vmem:[%s1865_s2 + $0x28] ss:$16 sps:$4 sm:$0xff]   ;;  %341 = vmatprep.subr.bf16.mxu1 %v1404_v10  ;;  %v1416_v12 = vld [vmem:[%s1865_s2 + $0x60] ss:$16 sps:$4 sm:$0xff]  }
   0x5   :  { %v1421_v13 = vld [vmem:[%s1865_s2 + $0x84] ss:$16 sps:$4 sm:$0xff]   ;;  %v1426_v14 = vld [vmem:[%s1865_s2 + $0x4c] ss:$16 sps:$4 sm:$0xff]   ;;  %v1433_v15 = vld [vmem:[%s1865_s2 + $0x48] ss:$16 sps:$4 sm:$0xff]  }
   0x6   :  { %v1439_v16 = vld [vmem:[%s1865_s2 + $0x6c] ss:$16 sps:$4 sm:$0xff]   ;;  %v1445_v17 = vld [vmem:[%s1865_s2 + $0x80] ss:$16 sps:$4 sm:$0xff]   ;;  %v1451_v18 = vld [vmem:[%s1865_s2 + $0xa4] ss:$16 sps:$4 sm:$0xff]  }
   0x7   :  { %301 = vmatpush1.bf16.msra.mxu0 %v1369_v4  ;;  %342 = vmatpush1.bf16.msra.mxu1 %v1409_v11  ;;  %v1457_v19 = vld [vmem:[%s1865_s2 + $0x68] ss:$16 sps:$4 sm:$0xff]   ;;  %v1463_v20 = vld [vmem:[%s1865_s2 + $0x8c] ss:$16 sps:$4 sm:$0xff]   ;;  %v1469_v21 = vld [vmem:[%s1865_s2 + $0xa0] ss:$16 sps:$4 sm:$0xff]  }
   0x8   :  { %302 = vmatprep.subr.bf16.mxu0 %v1375_v5  ;;  %343 = vmatprep.subr.bf16.mxu1 %v1426_v14  ;;  %v1474_v22 = vld [vmem:[%s1865_s2 + $0xc4] ss:$16 sps:$4 sm:$0xff]   ;;  %v1481_v23 = vld [vmem:[%s1865_s2 + $0x88] ss:$16 sps:$4 sm:$0xff]   ;;  %v1487_v24 = vld [vmem:[%s1865_s2 + $0xac] ss:$16 sps:$4 sm:$0xff]  }
   0x9   :  { %v1493_v25 = vld [vmem:[%s1865_s2 + $0xc0] ss:$16 sps:$4 sm:$0xff]   ;;  %v1499_v26 = vld [vmem:[%s1865_s2 + $0xe4] ss:$16 sps:$4 sm:$0xff]   ;;  %v1505_v27 = vld [vmem:[%s1865_s2 + $0xa8] ss:$16 sps:$4 sm:$0xff]  }
   0xa   :  { %v1511_v28 = vld [vmem:[%s1865_s2 + $0xcc] ss:$16 sps:$4 sm:$0xff]   ;;  %v1517_v29 = vld [vmem:[%s1865_s2 + $0xe0] ss:$16 sps:$4 sm:$0xff]   ;;  %v1522_v30 = vld [vmem:[%s1865_s2 + $0x104] ss:$16 sps:$4 sm:$0xff]  }
   0xb   :  { %303 = vmatpush1.bf16.msra.mxu0 %v1391_v8  ;;  %344 = vmatpush1.bf16.msra.mxu1 %v1433_v15  ;;  %v1529_v31 = vld [vmem:[%s1865_s2 + $0xc8] ss:$16 sps:$4 sm:$0xff]   ;;  %v1535_v32 = vld [vmem:[%s1865_s2 + $0xec] ss:$16 sps:$4 sm:$0xff]   ;;  %v1541_v33 = vld [vmem:[%s1865_s2 + $0x100] ss:$16 sps:$4 sm:$0xff]  }
   0xc   :  { %304 = vmatprep.subr.bf16.mxu0 %v1398_v9  ;;  %345 = vmatprep.subr.bf16.mxu1 %v1439_v16  ;;  %v1546_v34 = vld [vmem:[%s1865_s2 + $0x124] ss:$16 sps:$4 sm:$0xff]   ;;  %v1553_v35 = vld [vmem:[%s1865_s2 + $0xe8] ss:$16 sps:$4 sm:$0xff]   ;;  %v1559_v36 = vld [vmem:[%s1865_s2 + $0x10c] ss:$16 sps:$4 sm:$0xff]  }
   0xd   :  { %v1566_v38 = vld [vmem:[%s1865_s2 + $0x120] ss:$16 sps:$4 sm:$0xff]   ;;  %v1571_v39 = vld [vmem:[%s1865_s2 + $0x144] ss:$16 sps:$4 sm:$0xff]   ;;  %v1579_v40 = vld [vmem:[%s1865_s2 + $0x108] ss:$16 sps:$4 sm:$0xff]  }
   0xe   :  { %v1585_v41 = vld [vmem:[%s1865_s2 + $0x12c] ss:$16 sps:$4 sm:$0xff]   ;;  %v1591_v42 = vld [vmem:[%s1865_s2 + $0x140] ss:$16 sps:$4 sm:$0xff]   ;;  %v1596_v43 = vld [vmem:[%s1865_s2 + $0x164] ss:$16 sps:$4 sm:$0xff]  }
   0xf   :  { %305 = vmatpush1.bf16.msra.mxu0 %v1416_v12  ;;  %346 = vmatpush1.bf16.msra.mxu1 %v1457_v19  ;;  %v1604_v44 = vld [vmem:[%s1865_s2 + $0x128] ss:$16 sps:$4 sm:$0xff]   ;;  %v1610_v45 = vld [vmem:[%s1865_s2 + $0x14c] ss:$16 sps:$4 sm:$0xff]   ;;  %v1617_v46 = vld [vmem:[%s1865_s2 + $0x160] ss:$16 sps:$4 sm:$0xff]  }
  0x10   :  { %306 = vmatprep.subr.bf16.mxu0 %v1421_v13  ;;  %347 = vmatprep.subr.bf16.mxu1 %v1463_v20  ;;  %v1623_v47 = vld [vmem:[%s1865_s2 + $0x184] ss:$16 sps:$4 sm:$0xff]   ;;  %v1629_v48 = vld [vmem:[%s1865_s2 + $0x148] ss:$16 sps:$4 sm:$0xff]   ;;  %v1635_v49 = vld [vmem:[%s1865_s2 + $0x16c] ss:$16 sps:$4 sm:$0xff]  }
  0x11   :  { %v1641_v50 = vld [vmem:[%s1865_s2 + $0x180] ss:$16 sps:$4 sm:$0xff]   ;;  %v1647_v51 = vld [vmem:[%s1865_s2 + $0x1a4] ss:$16 sps:$4 sm:$0xff]   ;;  %v1653_v52 = vld [vmem:[%s1865_s2 + $0x168] ss:$16 sps:$4 sm:$0xff]  }
  0x12   :  { %v1659_v53 = vld [vmem:[%s1865_s2 + $0x18c] ss:$16 sps:$4 sm:$0xff]   ;;  %v1665_v54 = vld [vmem:[%s1865_s2 + $0x1a0] ss:$16 sps:$4 sm:$0xff]   ;;  %v1671_v55 = vld [vmem:[%s1865_s2 + $0x1c4] ss:$16 sps:$4 sm:$0xff]  }
  0x13   :  { %307 = vmatpush1.bf16.msra.mxu0 %v1445_v17  ;;  %348 = vmatpush1.bf16.msra.mxu1 %v1481_v23  ;;  %v1677_v56 = vld [vmem:[%s1865_s2 + $0x188] ss:$16 sps:$4 sm:$0xff]   ;;  %v1683_v57 = vld [vmem:[%s1865_s2 + $0x1ac] ss:$16 sps:$4 sm:$0xff]   ;;  %v1689_v58 = vld [vmem:[%s1865_s2 + $0x1c0] ss:$16 sps:$4 sm:$0xff]  }
  0x14   :  { %308 = vmatprep.subr.bf16.mxu0 %v1451_v18  ;;  %349 = vmatprep.subr.bf16.mxu1 %v1487_v24  ;;  %1876 = vst [vmem:[#allocation6_spill] sm:$0xff] %v1689_v58  ;;  %v1695_v59 = vld [vmem:[%s1865_s2 + $0x1e4] ss:$16 sps:$4 sm:$0xff]   ;;  %v1701_v60 = vld [vmem:[%s1865_s2 + $0x1a8] ss:$16 sps:$4 sm:$0xff]  }
  0x15   :  { %1877 = vst [vmem:[#allocation7_spill] sm:$0xff] %v1695_v59  ;;  %v1707_v61 = vld [vmem:[%s1865_s2 + $0x1cc] ss:$16 sps:$4 sm:$0xff]   ;;  %v1713_v62 = vld [vmem:[%s1865_s2 + $0x1e0] ss:$16 sps:$4 sm:$0xff]  }
  0x16   :  { %v1720_v63 = vld [vmem:[%s1865_s2 + $0x1c8] ss:$16 sps:$4 sm:$0xff]  }
  0x17   :  { %309 = vmatpush1.bf16.msra.mxu0 %v1469_v21  ;;  %350 = vmatpush1.bf16.msra.mxu1 %v1505_v27 }
  0x18   :  { %310 = vmatprep.subr.bf16.mxu0 %v1474_v22  ;;  %351 = vmatprep.subr.bf16.mxu1 %v1511_v28 }
  0x1b   :  { %311 = vmatpush1.bf16.msra.mxu0 %v1493_v25  ;;  %352 = vmatpush1.bf16.msra.mxu1 %v1529_v31 }
  0x1c   :  { %312 = vmatprep.subr.bf16.mxu0 %v1499_v26  ;;  %353 = vmatprep.subr.bf16.mxu1 %v1535_v32 }
  0x1f   :  { %313 = vmatpush1.bf16.msra.mxu0 %v1517_v29  ;;  %354 = vmatpush1.bf16.msra.mxu1 %v1553_v35 }
  0x20   :  { %576 = vmatprep.subr.bf16.mxu0 %v1522_v30  ;;  %617 = vmatprep.subr.bf16.mxu1 %v1559_v36 }
  0x22   :  { %331 = vmatmul.mubr.bf16.vlgmr.msra.gmra.mrb[0].mxu0 %v1872_v37  ;;  %372 = vmatmul.mubr.bf16.vlgmr.msra.gmra.mrb[0].mxu1 %v1872_v37  ;;  %v1733_v37 = vld [vmem:[%s1865_s2 + $0x1e8] ss:$16 sps:$4 sm:$0xff]  }
  0x23   :  { %577 = vmatpush1.bf16.msra.mxu0 %v1541_v33  ;;  %608 = vmatprep.mubr.bf16.mxu0 %v1870_v1 }
  0x24   :  { %578 = vmatprep.subr.bf16.mxu0 %v1546_v34  ;;  %618 = vmatpush1.bf16.msra.mxu1 %v1579_v40 }
  0x25   :  { %619 = vmatprep.subr.bf16.mxu1 %v1585_v41  ;;  %649 = vmatprep.mubr.bf16.mxu1 %v1870_v1  ;;  %v1726_v1 = vld [vmem:[%s1865_s2 + $0x1ec] ss:$16 sps:$4 sm:$0xff]  }
  0x27   :  { %579 = vmatpush1.bf16.msra.mxu0 %v1566_v38 }
  0x28   :  { %580 = vmatprep.subr.bf16.mxu0 %v1571_v39  ;;  %620 = vmatpush1.bf16.msra.mxu1 %v1604_v44 }
  0x29   :  { %621 = vmatprep.subr.bf16.mxu1 %v1610_v45 }
  0x2b   :  { %581 = vmatpush1.bf16.msra.mxu0 %v1591_v42 }
  0x2c   :  { %582 = vmatprep.subr.bf16.mxu0 %v1596_v43  ;;  %622 = vmatpush1.bf16.msra.mxu1 %v1629_v48 }
  0x2d   :  { %623 = vmatprep.subr.bf16.mxu1 %v1635_v49 }
  0x2f   :  { %583 = vmatpush1.bf16.msra.mxu0 %v1617_v46 }
  0x30   :  { %584 = vmatprep.subr.bf16.mxu0 %v1623_v47  ;;  %624 = vmatpush1.bf16.msra.mxu1 %v1653_v52 }
  0x31   :  { %625 = vmatprep.subr.bf16.mxu1 %v1659_v53 }
  0x33   :  { %585 = vmatpush1.bf16.msra.mxu0 %v1641_v50 }
  0x34   :  { %586 = vmatprep.subr.bf16.mxu0 %v1647_v51  ;;  %626 = vmatpush1.bf16.msra.mxu1 %v1677_v56 }
  0x35   :  { %627 = vmatprep.subr.bf16.mxu1 %v1683_v57 }
  0x37   :  { %587 = vmatpush1.bf16.msra.mxu0 %v1665_v54 }
  0x38   :  { %588 = vmatprep.subr.bf16.mxu0 %v1671_v55  ;;  %628 = vmatpush1.bf16.msra.mxu1 %v1701_v60 }
  0x39   :  { %629 = vmatprep.subr.bf16.mxu1 %v1707_v61 }
  0x3b   :  { %589 = vmatpush1.bf16.msra.mxu0 %v1689_v58  ;;  %v1879_v58 = vmov 0  }
  0x3c   :  { %590 = vmatprep.subr.bf16.mxu0 %v1695_v59  ;;  %630 = vmatpush1.bf16.msra.mxu1 %v1720_v63  ;;  %v1878_v59 = vmov 0.0|0.0  }
  0x3d   :  { %631 = vmatprep.subr.bf16.mxu1 %v1726_v1 }
  0x3f   :  { %591 = vmatpush1.bf16.msra.mxu0 %v1713_v62 }
  0x40   :  { %708 = vmatprep.subr.bf16.mxu0 %v1350_v0  ;;  %632 = vmatpush1.bf16.msra.mxu1 %v1733_v37  ;;  %v131_v0 = vld [vmem:[%s1866_s0] sm:$0xff] }
  0x41   :  { %749 = vmatprep.subr.bf16.mxu1 %v1380_v6 }
  0x42   :  { %609 = vmatmul.mubr.bf16.vlgmr.msra.gmra.mrb[4].mxu0 %v1878_v59 }
  0x43   :  { %709 = vmatpush1.bf16.msra.mxu0 %v1357_v2  ;;  %740 = vmatprep.mubr.bf16.mxu0 %v1879_v58  ;;  %v133_v2 = vunpack.c.l.bf16 %v131_v0 }
  0x44   :  { %710 = vmatprep.subr.bf16.mxu0 %v1363_v3  ;;  %650 = vmatmul.mubr.bf16.vlgmr.msra.gmra.mrb[4].mxu1 %v1878_v59  ;;  %v134_v3 = vunpack.c.h.bf16 %v131_v0 }
  0x45   :  { %750 = vmatpush1.bf16.msra.mxu1 %v1385_v7  ;;  %781 = vmatprep.mubr.bf16.mxu1 %v1879_v58 }
  0x46   :  { %751 = vmatprep.subr.bf16.mxu1 %v1404_v10 }
  0x47   :  { %711 = vmatpush1.bf16.msra.mxu0 %v1369_v4 }
  0x48   :  { %712 = vmatprep.subr.bf16.mxu0 %v1375_v5  ;;  %v132_v5 = vld [vmem:[%s1866_s0 + $0x8] sm:$0xff] }
  0x49   :  { %752 = vmatpush1.bf16.msra.mxu1 %v1409_v11 }
  0x4a   :  { %753 = vmatprep.subr.bf16.mxu1 %v1426_v14 }
  0x4b   :  { %713 = vmatpush1.bf16.msra.mxu0 %v1391_v8 }
  0x4c   :  { %714 = vmatprep.subr.bf16.mxu0 %v1398_v9 }
  0x4d   :  { %754 = vmatpush1.bf16.msra.mxu1 %v1433_v15 }
  0x4e   :  { %755 = vmatprep.subr.bf16.mxu1 %v1439_v16 }
  0x4f   :  { %715 = vmatpush1.bf16.msra.mxu0 %v1416_v12  ;;  %v136_v12 = vunpack.c.h.bf16 %v132_v5 }
  0x50   :  { %716 = vmatprep.subr.bf16.mxu0 %v1421_v13 }
  0x51   :  { %756 = vmatpush1.bf16.msra.mxu1 %v1457_v19 }
  0x52   :  { %757 = vmatprep.subr.bf16.mxu1 %v1463_v20 }
  0x53   :  { %717 = vmatpush1.bf16.msra.mxu0 %v1445_v17 }
  0x54   :  { %718 = vmatprep.subr.bf16.mxu0 %v1451_v18  ;;  %v135_v18 = vunpack.c.l.bf16 %v132_v5 }
  0x55   :  { %758 = vmatpush1.bf16.msra.mxu1 %v1481_v23 }
  0x56   :  { %759 = vmatprep.subr.bf16.mxu1 %v1487_v24 }
  0x57   :  { %719 = vmatpush1.bf16.msra.mxu0 %v1469_v21 }
  0x58   :  { %720 = vmatprep.subr.bf16.mxu0 %v1474_v22 }
  0x59   :  { %760 = vmatpush1.bf16.msra.mxu1 %v1505_v27 }
  0x5a   :  { %761 = vmatprep.subr.bf16.mxu1 %v1511_v28  ;;  %v1107_v28 = vld [vmem:[%s1867_s1 + $0x10] sm:$0xff] }
  0x5b   :  { %721 = vmatpush1.bf16.msra.mxu0 %v1493_v25  ;;  %v412_v59 = vunpack.c.h.bf16 %v1107_v28 }
  0x5c   :  { %722 = vmatprep.subr.bf16.mxu0 %v1499_v26 }
  0x5d   :  { %762 = vmatpush1.bf16.msra.mxu1 %v1529_v31 }
  0x5e   :  { %763 = vmatprep.subr.bf16.mxu1 %v1535_v32 }
  0x5f   :  { %723 = vmatpush1.bf16.msra.mxu0 %v1517_v29 }
  0x60   :  { %825 = vmatprep.subr.bf16.mxu0 %v1522_v30 }
  0x61   :  { %764 = vmatpush1.bf16.msra.mxu1 %v1553_v35  ;;  %v411_v35 = vunpack.c.l.bf16 %v1107_v28 }
  0x62   :  { %866 = vmatprep.subr.bf16.mxu1 %v1559_v36 }
  0xf5   :  { %v332_v4 = vpop.f32.mrb[0].mxu0  ;;  %v373_v14 = vpop.f32.mrb[0].mxu1 }
  0xf6   :  { %v380_v6 = vadd.f32 %v332_v4, %v133_v2  ;;  %v334_v7 = vpop.f32.mrb[1].mxu0  ;;  %v375_v15 = vpop.f32.mrb[1].mxu1  ;;  %v382_v21 = vadd.f32 %v373_v14, %v135_v18 }
  0xf7   :  { %v381_v8 = vadd.f32 %v334_v7, %v134_v3  ;;  %v336_v9 = vpop.f32.mrb[2].mxu0  ;;  %v383_v16 = vadd.f32 %v375_v15, %v136_v12  ;;  %v377_v17 = vpop.f32.mrb[2].mxu1  ;;  %v1108_v3 = vld [vmem:[%s1867_s1 + $0x18] sm:$0xff] }
  0xf8   :  { %v1104_v10 = vmul.f32 -1.442695, %v380_v6  ;;  %v337_v11 = vpop.f32.mrb[3].mxu0  ;;  %v378_v19 = vpop.f32.mrb[3].mxu1 }
  0xf9   :  { %v1105_v13 = vmul.f32 -1.442695, %v381_v8  ;;  %v1106_v20 = vmul.f32 -1.442695, %v383_v16  ;;  %v413_v16 = vunpack.c.l.bf16 %v1108_v3 }
  0xfa   :  { %1255 = vpow2.f32 %v1104_v10  ;;  %v414_v10 = vunpack.c.h.bf16 %v1108_v3 }
  0xfb   :  { %1257 = vpow2.f32 %v1105_v13 }
  0xfc   :  { %1259 = vpow2.f32 %v1106_v20 }
  0xfd   :  { %1261 = vtanh.f32 %v382_v21 }
 0x104   :  { %v1256_v22 = vpop.eup %1255 }
 0x105   :  { %v1258_v23 = vpop.eup %1257  ;;  %v387_v24 = vadd.f32 1.0, %v1256_v22 }
 0x106   :  { %v393_v25 = vadd.f32 1.0, %v1258_v23  ;;  %v1260_v26 = vpop.eup %1259 }
 0x107   :  { %1263 = vrcp.f32 %v387_v24  ;;  %v1262_v27 = vpop.eup %1261  ;;  %v400_v30 = vadd.f32 1.0, %v1260_v26 }
 0x108   :  { %1265 = vrcp.f32 %v393_v25 }
 0x109   :  { %1267 = vrcp.f32 %v400_v30 }
 0x111   :  { %v1264_v29 = vpop.eup %1263 }
 0x112   :  { %v1266_v31 = vpop.eup %1265  ;;  %v404_v32 = vmul.f32 %v1264_v29, %v1262_v27 }
 0x113   :  { %v403_v36 = vmul.f32 0.0, %v1266_v31  ;;  %v1268_v18 = vpop.eup %1267 }
 0x115   :  { %v1784_v0 = vadd.f32 %v404_v32, %v403_v36  ;;  %v610_v2 = vpop.f32.mrb[4].mxu0 }
 0x116   :  { %v658_v4 = vadd.f32 %v610_v2, %v411_v35  ;;  %v612_v5 = vpop.f32.mrb[5].mxu0 }
 0x117   :  { %1269 = vtanh.f32 %v1784_v0  ;;  %v659_v6 = vadd.f32 %v612_v5, %v412_v59  ;;  %v614_v7 = vpop.f32.mrb[6].mxu0  ;;  %v651_v12 = vpop.f32.mrb[4].mxu1  ;;  %v818_v5 = vld [vmem:[%s1867_s1] sm:$0xff] }
 0x118   :  { %v1141_v8 = vmul.f32 -1.442695, %v658_v4  ;;  %v615_v9 = vpop.f32.mrb[7].mxu0  ;;  %v653_v13 = vpop.f32.mrb[5].mxu1  ;;  %v660_v21 = vadd.f32 %v651_v12, %v413_v16 }
 0x119   :  { %v1142_v11 = vmul.f32 -1.442695, %v659_v6  ;;  %v661_v14 = vadd.f32 %v653_v13, %v414_v10  ;;  %v655_v15 = vpop.f32.mrb[6].mxu1  ;;  %v821_v13 = vunpack.c.h.bf16 %v818_v5 }
 0x11a   :  { %1271 = vpow2.f32 %v1141_v8  ;;  %v656_v17 = vpop.f32.mrb[7].mxu1 }
 0x11b   :  { %1273 = vpow2.f32 %v1142_v11  ;;  %v1143_v19 = vmul.f32 -1.442695, %v661_v14  ;;  %v820_v11 = vunpack.c.l.bf16 %v818_v5 }
 0x11d   :  { %1275 = vpow2.f32 %v1143_v19 }
 0x11e   :  { %1277 = vtanh.f32 %v660_v21 }
 0x121   :  { %v1270_v20 = vpop.eup %1269 }
 0x122   :  { %v1790_v22 = vmul.f32 %v1270_v20, %v1268_v18  ;;  %v819_v18 = vld [vmem:[%s1867_s1 + $0x8] sm:$0xff] }
 0x124   :  { %v1272_v23 = vpop.eup %1271  ;;  %v707_v24 = vpack.c.bf16 %v1790_v22, %v1790_v22 }
 0x125   :  { %v1274_v25 = vpop.eup %1273  ;;  %v665_v26 = vadd.f32 1.0, %v1272_v23 }
 0x126   :  { %v671_v27 = vadd.f32 1.0, %v1274_v25  ;;  %741 = vmatmul.mubr.bf16.vlgmr.msra.gmra.mrb[8].mxu0 %v707_v24  ;;  %782 = vmatmul.mubr.bf16.vlgmr.msra.gmra.mrb[8].mxu1 %v707_v24  ;;  %v686_v25 = vrot.slane %v1790_v22, 4 }
 0x127   :  { %1279 = vrcp.f32 %v665_v26  ;;  %826 = vmatpush1.bf16.msra.mxu0 %v1541_v33  ;;  %867 = vmatpush1.bf16.msra.mxu1 %v1579_v40  ;;  %v1276_v33 = vpop.eup %1275 }
 0x128   :  { %1281 = vrcp.f32 %v671_v27  ;;  %827 = vmatprep.subr.bf16.mxu0 %v1546_v34  ;;  %868 = vmatprep.subr.bf16.mxu1 %v1585_v41  ;;  %v1278_v28 = vpop.eup %1277  ;;  %v678_v40 = vadd.f32 1.0, %v1276_v33 }
 0x129   :  { %857 = vmatprep.mubr.bf16.mxu0 %v1879_v58  ;;  %898 = vmatprep.mubr.bf16.mxu1 %v1879_v58 }
 0x12a   :  { %1283 = vrcp.f32 %v678_v40 }
 0x12b   :  { %828 = vmatpush1.bf16.msra.mxu0 %v1566_v38  ;;  %869 = vmatpush1.bf16.msra.mxu1 %v1604_v44  ;;  %v1881_v44 = vld [vmem:[#allocation7_spill] sm:$0xff] }
 0x12c   :  { %829 = vmatprep.subr.bf16.mxu0 %v1571_v39  ;;  %870 = vmatprep.subr.bf16.mxu1 %v1610_v45 }
 0x12f   :  { %830 = vmatpush1.bf16.msra.mxu0 %v1591_v42  ;;  %871 = vmatpush1.bf16.msra.mxu1 %v1629_v48  ;;  %v1144_v48 = vld [vmem:[%s1866_s0 + $0x10] sm:$0xff] }
 0x130   :  { %831 = vmatprep.subr.bf16.mxu0 %v1596_v43  ;;  %872 = vmatprep.subr.bf16.mxu1 %v1635_v49  ;;  %v1880_v43 = vld [vmem:[#allocation6_spill] sm:$0xff]  ;;  %v703_v49 = vunpack.c.l.bf16 %v1144_v48 }
 0x131   :  { %v1280_v34 = vpop.eup %1279 }
 0x132   :  { %v1282_v41 = vpop.eup %1281  ;;  %v682_v38 = vmul.f32 %v1280_v34, %v1278_v28  ;;  %v823_v28 = vunpack.c.h.bf16 %v819_v18  ;;  %v687_v34 = vadd.f32 %v686_v25, %v1790_v22  ;;  %v959_v22 = vlaneseq }
 0x133   :  { %v681_v58 = vmul.f32 0.0, %v1282_v41  ;;  %832 = vmatpush1.bf16.msra.mxu0 %v1617_v46  ;;  %873 = vmatpush1.bf16.msra.mxu1 %v1653_v52  ;;  %v822_v41 = vunpack.c.l.bf16 %v819_v18 }
 0x134   :  { %833 = vmatprep.subr.bf16.mxu0 %v1623_v47  ;;  %874 = vmatprep.subr.bf16.mxu1 %v1659_v53  ;;  %v1284_v42 = vpop.eup %1283  ;;  %v1145_v53 = vld [vmem:[%s1866_s0 + $0x18] sm:$0xff] }
 0x135   :  { %v1812_v39 = vadd.f32 %v682_v38, %v681_v58  ;;  %v706_v29 = vunpack.c.h.bf16 %v1145_v53  ;;  %v705_v31 = vunpack.c.l.bf16 %v1145_v53  ;;  %v688_v58 = vrot.slane %v687_v34, 2 }
 0x136   :  { %v1321_v53 = vmov 1966171168  }
 0x137   :  { %1285 = vtanh.f32 %v1812_v39  ;;  %834 = vmatpush1.bf16.msra.mxu0 %v1641_v50  ;;  %875 = vmatpush1.bf16.msra.mxu1 %v1677_v56  ;;  %v704_v50 = vunpack.c.h.bf16 %v1144_v48  ;;  %v689_v48 = vadd.f32 %v688_v58, %v687_v34 }
 0x138   :  { %835 = vmatprep.subr.bf16.mxu0 %v1647_v51  ;;  %876 = vmatprep.subr.bf16.mxu1 %v1683_v57 }
 0x13b   :  { %836 = vmatpush1.bf16.msra.mxu0 %v1665_v54  ;;  %877 = vmatpush1.bf16.msra.mxu1 %v1701_v60 }
 0x13c   :  { %837 = vmatprep.subr.bf16.mxu0 %v1671_v55  ;;  %878 = vmatprep.subr.bf16.mxu1 %v1707_v61 }
 0x13f   :  { %838 = vmatpush1.bf16.msra.mxu0 %v1880_v43  ;;  %879 = vmatpush1.bf16.msra.mxu1 %v1720_v63 }
 0x140   :  { %839 = vmatprep.subr.bf16.mxu0 %v1881_v44  ;;  %880 = vmatprep.subr.bf16.mxu1 %v1726_v1 }
 0x141   :  { %v1286_v45 = vpop.eup %1285 }
 0x142   :  { %v1827_v46 = vmul.f32 %v1286_v45, %v1284_v42 }
 0x143   :  { %840 = vmatpush1.bf16.msra.mxu0 %v1713_v62  ;;  %881 = vmatpush1.bf16.msra.mxu1 %v1733_v37 }
 0x144   :  { %v824_v47 = vpack.c.bf16 %v1827_v46, %v1827_v46 }
 0x146   :  { %858 = vmatmul.mubr.bf16.vlgmr.msra.gmra.mrb[12].mxu0 %v824_v47  ;;  %899 = vmatmul.mubr.bf16.vlgmr.msra.gmra.mrb[12].mxu1 %v824_v47 }
 0x1f9   :  { %v742_v51 = vpop.f32.mrb[8].mxu0  ;;  %v783_v1 = vpop.f32.mrb[8].mxu1 }
 0x1fa   :  { %v790_v52 = vadd.f32 %v742_v51, %v703_v49  ;;  %v744_v54 = vpop.f32.mrb[9].mxu0  ;;  %v785_v37 = vpop.f32.mrb[9].mxu1  ;;  %v792_v35 = vadd.f32 %v783_v1, %v705_v31 }
 0x1fb   :  { %v791_v55 = vadd.f32 %v744_v54, %v704_v50  ;;  %v746_v56 = vpop.f32.mrb[10].mxu0  ;;  %v787_v57 = vpop.f32.mrb[10].mxu1  ;;  %v793_v30 = vadd.f32 %v785_v37, %v706_v29  ;;  %v957_v54 = vunpack.c.l.s4 %v1321_v53  ;;  %v690_v37 = vrot.slane %v689_v48, 1 }
 0x1fc   :  { %v1146_v60 = vmul.f32 -1.442695, %v790_v52  ;;  %v747_v61 = vpop.f32.mrb[11].mxu0  ;;  %v788_v62 = vpop.f32.mrb[11].mxu1 }
 0x1fd   :  { %v1147_v63 = vmul.f32 -1.442695, %v791_v55  ;;  %v1148_v32 = vmul.f32 -1.442695, %v793_v30  ;;  %v958_v57 = vunpack.c.0.s8 %v957_v54  ;;  %v691_v61 = vadd.f32 %v690_v37, %v689_v48 }
 0x1fe   :  { %1287 = vpow2.f32 %v1146_v60  ;;  %v960_v60 = vshrl.u32 %v959_v22, 7 }
 0x1ff   :  { %1289 = vpow2.f32 %v1147_v63 }
 0x200   :  { %1291 = vpow2.f32 %v1148_v32  ;;  %v961_v30 = vsub.s32 %v958_v57, %v960_v60  ;;  %v692_v32 = vmul.f32 0.125, %v691_v61 }
 0x201   :  { %1293 = vtanh.f32 %v792_v35 }
 0x208   :  { %v1288_v36 = vpop.eup %1287 }
 0x209   :  { %v1290_v59 = vpop.eup %1289  ;;  %v797_v2 = vadd.f32 1.0, %v1288_v36 }
 0x20a   :  { %v803_v3 = vadd.f32 1.0, %v1290_v59  ;;  %v1292_v4 = vpop.eup %1291 }
 0x20b   :  { %1295 = vrcp.f32 %v797_v2  ;;  %v1294_v6 = vpop.eup %1293  ;;  %v810_v10 = vadd.f32 1.0, %v1292_v4 }
 0x20c   :  { %1297 = vrcp.f32 %v803_v3 }
 0x20d   :  { %1299 = vrcp.f32 %v810_v10 }
 0x215   :  { %v1296_v7 = vpop.eup %1295 }
 0x216   :  { %v1298_v8 = vpop.eup %1297  ;;  %v814_v9 = vmul.f32 %v1296_v7, %v1294_v6 }
 0x217   :  { %v813_v12 = vmul.f32 %v1298_v8, %v1784_v0  ;;  %v1300_v38 = vpop.eup %1299 }
 0x219   :  { %v815_v14 = vadd.f32 %v814_v9, %v813_v12  ;;  %v859_v15 = vpop.f32.mrb[12].mxu0  ;;  %v900_v16 = vpop.f32.mrb[12].mxu1  ;;  %v693_v9 = vrot.slane %v1827_v46, 4 }
 0x21a   :  { %v907_v17 = vadd.f32 %v859_v15, %v820_v11  ;;  %v861_v19 = vpop.f32.mrb[13].mxu0  ;;  %v902_v20 = vpop.f32.mrb[13].mxu1  ;;  %v909_v45 = vadd.f32 %v900_v16, %v822_v41 }
 0x21b   :  { %1301 = vtanh.f32 %v815_v14  ;;  %v908_v21 = vadd.f32 %v861_v19, %v821_v13  ;;  %v863_v23 = vpop.f32.mrb[14].mxu0  ;;  %v904_v24 = vpop.f32.mrb[14].mxu1  ;;  %v910_v40 = vadd.f32 %v902_v20, %v823_v28  ;;  %v694_v10 = vadd.f32 %v693_v9, %v1827_v46 }
 0x21c   :  { %v1149_v26 = vmul.f32 -1.442695, %v907_v17  ;;  %v864_v0 = vpop.f32.mrb[15].mxu0  ;;  %v905_v27 = vpop.f32.mrb[15].mxu1 }
 0x21d   :  { %v1150_v33 = vmul.f32 -1.442695, %v908_v21  ;;  %v1151_v43 = vmul.f32 -1.442695, %v910_v40  ;;  %v695_v12 = vrot.slane %v694_v10, 2 }
 0x21e   :  { %1303 = vpow2.f32 %v1149_v26 }
 0x21f   :  { %1305 = vpow2.f32 %v1150_v33  ;;  %v696_v14 = vadd.f32 %v695_v12, %v694_v10 }
 0x220   :  { %1307 = vpow2.f32 %v1151_v43 }
 0x221   :  { %1309 = vtanh.f32 %v909_v45  ;;  %v697_v17 = vrot.slane %v696_v14, 1 }
 0x223   :  { %v698_v20 = vadd.f32 %v697_v17, %v696_v14 }
 0x225   :  { %v1302_v42 = vpop.eup %1301  ;;  %v699_v24 = vmul.f32 0.125, %v698_v20 }
 0x226   :  { %v817_v44 = vmul.f32 %v1302_v42, %v1300_v38 }
 0x228   :  { %v1304_v47 = vpop.eup %1303  ;;  %v935_v49 = vrot.slane %v817_v44, 4 }
 0x229   :  { %v1306_v50 = vpop.eup %1305  ;;  %v914_v51 = vadd.f32 1.0, %v1304_v47 }
 0x22a   :  { %v936_v1 = vadd.f32 %v935_v49, %v817_v44  ;;  %v920_v52 = vadd.f32 1.0, %v1306_v50  ;;  %v1308_v29 = vpop.eup %1307 }
 0x22b   :  { %1311 = vrcp.f32 %v914_v51  ;;  %v1310_v31 = vpop.eup %1309  ;;  %v927_v4 = vadd.f32 1.0, %v1308_v29 }
 0x22c   :  { %v937_v55 = vrot.slane %v936_v1, 2  ;;  %1313 = vrcp.f32 %v920_v52 }
 0x22d   :  { %1315 = vrcp.f32 %v927_v4 }
 0x22e   :  { %v938_v56 = vadd.f32 %v937_v55, %v936_v1 }
 0x230   :  { %v939_v62 = vrot.slane %v938_v56, 1 }
 0x232   :  { %v940_v63 = vadd.f32 %v939_v62, %v938_v56 }
 0x234   :  { %v941_v35 = vmul.f32 0.125, %v940_v63 }
 0x235   :  { %v1312_v36 = vpop.eup %1311 }
 0x236   :  { %v1314_v59 = vpop.eup %1313  ;;  %v954_v2 = vsel %vm953_vm0, %v692_v32, %v941_v35  ;;  %v931_v3 = vmul.f32 %v1312_v36, %v1310_v31 }
 0x237   :  { %v962_v5 = vrot.slane %v954_v2, %v961_v30  ;;  %v930_v6 = vmul.f32 %v1314_v59, %v1812_v39  ;;  %v1316_v11 = vpop.eup %1315 }
 0x239   :  { %v963_v7 = vcombine.high %v962_v5, %v962_v5  ;;  %1152 = vst.sshfl [vmem:[%s1868_s3] sm:$0x1 pattern:$0x73625140] %v962_v5  ;;  %v932_v8 = vadd.f32 %v931_v3, %v930_v6 }
 0x23b   :  { %1153 = vst.sshfl [vmem:[%s1868_s3 + $0x1] sm:$0x1 pattern:$0x73625140] %v963_v7  ;;  %1317 = vtanh.f32 %v932_v8 }
 0x245   :  { %v1318_v13 = vpop.eup %1317 }
 0x246   :  { %v934_v39 = vmul.f32 %v1318_v13, %v1316_v11 }
 0x248   :  { %v942_v15 = vrot.slane %v934_v39, 4 }
 0x24a   :  { %v943_v16 = vadd.f32 %v942_v15, %v934_v39 }
 0x24c   :  { %v944_v18 = vrot.slane %v943_v16, 2 }
 0x24e   :  { %v945_v19 = vadd.f32 %v944_v18, %v943_v16 }
 0x250   :  { %v946_v21 = vrot.slane %v945_v19, 1 }
 0x252   :  { %v947_v23 = vadd.f32 %v946_v21, %v945_v19 }
 0x254   :  { %v948_v25 = vmul.f32 0.125, %v947_v23 }
 0x256   :  { %v982_v26 = vsel %vm953_vm0, %v948_v25, %v699_v24 }
 0x257   :  { %v990_v0 = vrot.slane %v982_v26, %v961_v30 }
 0x259   :  { %v991_v27 = vcombine.high %v990_v0, %v990_v0  ;;  %1154 = vst.sshfl [vmem:[%s1869_s4] sm:$0x1 pattern:$0x73625140] %v990_v0 }
 0x25b   :  { %1155 = vst.sshfl [vmem:[%s1869_s4 + $0x1] sm:$0x1 pattern:$0x73625140] %v991_v27 }

// kernel: ts_prediction_forward.11
= control target key start
LH: loop header
LB: loop body
LE: loop exit
PB: predicated region body
PF: predicated region fallthrough
CT: control target
= control target key end

     0   :  { %v1613_v2 = vmov 0   ;;  %vm79_vm0 = vcmask 1041409   ;;  %s2100_s0 = inlined_call_operand.vmem [shape: f32[2,1,128], index: 0, kind: input, shape index: {}]   ;;  %s2101_s1 = inlined_call_operand.vmem [shape: f32[2,1,128], index: 1, kind: input, shape index: {}]   ;;  %s2102_s2 = inlined_call_operand.vmem [shape: bf16[128,256], index: 2, kind: input, shape index: {}]   ;;  %s2103_s3 = inlined_call_operand.vmem [shape: bf16[128,256], index: 3, kind: input, shape index: {}]   ;;  %s2104_s4 = inlined_call_operand.vmem [shape: f32[1,256], index: 4, kind: input, shape index: {}]   ;;  %s2105_s5 = inlined_call_operand.vmem [shape: bf16[256,512], index: 5, kind: input, shape index: {}]   ;;  %s2106_s6 = inlined_call_operand.vmem [shape: f32[1,512], index: 6, kind: input, shape index: {}]   ;;  %s2107_s7 = inlined_call_operand.vmem [shape: bf16[512,128], index: 7, kind: input, shape index: {}]   ;;  %s2108_s8 = inlined_call_operand.vmem [shape: f32[1,128], index: 8, kind: input, shape index: {}]   ;;  %s2109_s9 = inlined_call_operand.hbm [shape: f32[2,1,128], index: 9, kind: output, shape index: {}]  }
   0x1   :  { %v1413_v0 = vld [vmem:[%s2103_s3 + $0x4] ss:$8 sps:$4 sm:$0xff]   ;;  %195 = vmatprep.mubr.bf16.mxu0 %v1613_v2  ;;  %324 = vmatprep.mubr.bf16.mxu1 %v1613_v2  ;;  %v1417_v3 = vld [vmem:[%s2103_s3] ss:$8 sps:$4 sm:$0xff]   ;;  %v1419_v5 = vld [vmem:[%s2103_s3 + $0x14] ss:$8 sps:$4 sm:$0xff]  }
   0x2   :  { %v1415_v1 = vld [vmem:[%s2102_s2 + $0x4] ss:$8 sps:$4 sm:$0xff]   ;;  %163 = vmatprep.subr.bf16.mxu0 %v1413_v0  ;;  %v1418_v4 = vld [vmem:[%s2102_s2] ss:$8 sps:$4 sm:$0xff]   ;;  %v1421_v6 = vld [vmem:[%s2102_s2 + $0x14] ss:$8 sps:$4 sm:$0xff]  }
   0x3   :  { %292 = vmatprep.subr.bf16.mxu1 %v1415_v1  ;;  %164 = vmatpush1.bf16.msra.mxu0 %v1417_v3  ;;  %v1423_v7 = vld [vmem:[%s2103_s3 + $0x10] ss:$8 sps:$4 sm:$0xff]   ;;  %v1425_v9 = vld [vmem:[%s2103_s3 + $0x24] ss:$8 sps:$4 sm:$0xff]   ;;  %v1429_v11 = vld [vmem:[%s2103_s3 + $0x20] ss:$8 sps:$4 sm:$0xff]  }
   0x4   :  { %293 = vmatpush1.bf16.msra.mxu1 %v1418_v4  ;;  %165 = vmatprep.subr.bf16.mxu0 %v1419_v5  ;;  %v1424_v8 = vld [vmem:[%s2102_s2 + $0x10] ss:$8 sps:$4 sm:$0xff]   ;;  %v1427_v10 = vld [vmem:[%s2102_s2 + $0x24] ss:$8 sps:$4 sm:$0xff]   ;;  %v1430_v12 = vld [vmem:[%s2102_s2 + $0x20] ss:$8 sps:$4 sm:$0xff]  }
   0x5   :  { %294 = vmatprep.subr.bf16.mxu1 %v1421_v6  ;;  %v1431_v13 = vld [vmem:[%s2103_s3 + $0x34] ss:$8 sps:$4 sm:$0xff]   ;;  %v1435_v15 = vld [vmem:[%s2103_s3 + $0x30] ss:$8 sps:$4 sm:$0xff]   ;;  %v1437_v17 = vld [vmem:[%s2103_s3 + $0x44] ss:$8 sps:$4 sm:$0xff]  }
   0x6   :  { %v1433_v14 = vld [vmem:[%s2102_s2 + $0x34] ss:$8 sps:$4 sm:$0xff]   ;;  %v1436_v16 = vld [vmem:[%s2102_s2 + $0x30] ss:$8 sps:$4 sm:$0xff]   ;;  %v1439_v18 = vld [vmem:[%s2102_s2 + $0x44] ss:$8 sps:$4 sm:$0xff]  }
   0x7   :  { %166 = vmatpush1.bf16.msra.mxu0 %v1423_v7  ;;  %v1441_v19 = vld [vmem:[%s2103_s3 + $0x40] ss:$8 sps:$4 sm:$0xff]   ;;  %v1443_v21 = vld [vmem:[%s2103_s3 + $0x54] ss:$8 sps:$4 sm:$0xff]   ;;  %v1447_v23 = vld [vmem:[%s2103_s3 + $0x50] ss:$8 sps:$4 sm:$0xff]  }
   0x8   :  { %295 = vmatpush1.bf16.msra.mxu1 %v1424_v8  ;;  %167 = vmatprep.subr.bf16.mxu0 %v1425_v9  ;;  %v1442_v20 = vld [vmem:[%s2102_s2 + $0x40] ss:$8 sps:$4 sm:$0xff]   ;;  %v1445_v22 = vld [vmem:[%s2102_s2 + $0x54] ss:$8 sps:$4 sm:$0xff]   ;;  %v1448_v24 = vld [vmem:[%s2102_s2 + $0x50] ss:$8 sps:$4 sm:$0xff]  }
   0x9   :  { %296 = vmatprep.subr.bf16.mxu1 %v1427_v10  ;;  %v1449_v25 = vld [vmem:[%s2103_s3 + $0x64] ss:$8 sps:$4 sm:$0xff]   ;;  %v38_v27 = vld [vmem:[%s2101_s1] sm:$0x1]  ;;  %v39_v28 = vld [vmem:[%s2101_s1 + $0x1] sm:$0x1] }
   0xa   :  { %v1451_v26 = vld [vmem:[%s2102_s2 + $0x64] ss:$8 sps:$4 sm:$0xff]   ;;  %v40_v29 = vpack.c.bf16 %v38_v27, %v38_v27  ;;  %v41_v30 = vpack.c.bf16 %v39_v28, %v39_v28  ;;  %v34_v31 = vld [vmem:[%s2100_s0] sm:$0x1]  ;;  %v35_v32 = vld [vmem:[%s2100_s0 + $0x1] sm:$0x1] }
   0xb   :  { %168 = vmatpush1.bf16.msra.mxu0 %v1429_v11  ;;  %v1453_v33 = vld [vmem:[%s2103_s3 + $0x60] ss:$8 sps:$4 sm:$0xff]   ;;  %v36_v35 = vpack.c.bf16 %v34_v31, %v34_v31  ;;  %v37_v36 = vpack.c.bf16 %v35_v32, %v35_v32  ;;  %v1455_v37 = vld [vmem:[%s2103_s3 + $0x74] ss:$8 sps:$4 sm:$0xff]   ;;  %v1459_v44 = vld [vmem:[%s2103_s3 + $0x70] ss:$8 sps:$4 sm:$0xff]  }
   0xc   :  { %297 = vmatpush1.bf16.msra.mxu1 %v1430_v12  ;;  %169 = vmatprep.subr.bf16.mxu0 %v1431_v13  ;;  %v1454_v34 = vld [vmem:[%s2102_s2 + $0x60] ss:$8 sps:$4 sm:$0xff]   ;;  %v76_v38 = vunpack.c.l.b16 %v40_v29  ;;  %v77_v39 = vunpack.c.l.b16 %v41_v30  ;;  %v1457_v40 = vld [vmem:[%s2102_s2 + $0x74] ss:$8 sps:$4 sm:$0xff]   ;;  %v1460_v45 = vld [vmem:[%s2102_s2 + $0x70] ss:$8 sps:$4 sm:$0xff]  }
   0xd   :  { %298 = vmatprep.subr.bf16.mxu1 %v1433_v14  ;;  %v206_v41 = vunpack.c.l.b16 %v36_v35  ;;  %v207_v42 = vunpack.c.l.b16 %v37_v36  ;;  %v1463_v48 = vld [vmem:[%s2105_s5 + $0x4] ss:$16 sps:$4 sm:$0xff]   ;;  %v1466_v50 = vld [vmem:[%s2105_s5 + $0xc] ss:$16 sps:$4 sm:$0xff]   ;;  %v1461_v53 = vld [vmem:[%s2105_s5] ss:$16 sps:$4 sm:$0xff]  }
   0xe   :  { %v78_v43 = vrot.slane %v77_v39, 7  ;;  %v1464_v54 = vld [vmem:[%s2105_s5 + $0x8] ss:$16 sps:$4 sm:$0xff]   ;;  %v1469_v55 = vld [vmem:[%s2105_s5 + $0x24] ss:$16 sps:$4 sm:$0xff]  }
   0xf   :  { %170 = vmatpush1.bf16.msra.mxu0 %v1435_v15  ;;  %v208_v46 = vrot.slane %v207_v42, 7  ;;  %v1472_v56 = vld [vmem:[%s2105_s5 + $0x2c] ss:$16 sps:$4 sm:$0xff]   ;;  %v1467_v57 = vld [vmem:[%s2105_s5 + $0x20] ss:$16 sps:$4 sm:$0xff]  }
  0x10   :  { %299 = vmatpush1.bf16.msra.mxu1 %v1436_v16  ;;  %171 = vmatprep.subr.bf16.mxu0 %v1437_v17  ;;  %v80_v47 = vsel %vm79_vm0, %v78_v43, %v76_v38  ;;  %v1470_v58 = vld [vmem:[%s2105_s5 + $0x28] ss:$16 sps:$4 sm:$0xff]   ;;  %v1475_v59 = vld [vmem:[%s2105_s5 + $0x44] ss:$16 sps:$4 sm:$0xff]   ;;  %v1478_v60 = vld [vmem:[%s2105_s5 + $0x4c] ss:$16 sps:$4 sm:$0xff]  }
  0x11   :  { %300 = vmatprep.subr.bf16.mxu1 %v1439_v18  ;;  %v209_v49 = vsel %vm79_vm0, %v208_v46, %v206_v41  ;;  %v81_v51 = vpack.c.b16 %v80_v47, %v80_v47  ;;  %v1473_v61 = vld [vmem:[%s2105_s5 + $0x40] ss:$16 sps:$4 sm:$0xff]   ;;  %v1476_v62 = vld [vmem:[%s2105_s5 + $0x48] ss:$16 sps:$4 sm:$0xff]   ;;  %v1481_v63 = vld [vmem:[%s2105_s5 + $0x64] ss:$16 sps:$4 sm:$0xff]  }
  0x12   :  { %v210_v52 = vpack.c.b16 %v209_v49, %v209_v49  ;;  %v1484_v0 = vld [vmem:[%s2105_s5 + $0x6c] ss:$16 sps:$4 sm:$0xff]   ;;  %v1479_v1 = vld [vmem:[%s2105_s5 + $0x60] ss:$16 sps:$4 sm:$0xff]   ;;  %v1482_v2 = vld [vmem:[%s2105_s5 + $0x68] ss:$16 sps:$4 sm:$0xff]  }
  0x13   :  { %172 = vmatpush1.bf16.msra.mxu0 %v1441_v19  ;;  %v1487_v3 = vld [vmem:[%s2105_s5 + $0x84] ss:$16 sps:$4 sm:$0xff]   ;;  %v1490_v4 = vld [vmem:[%s2105_s5 + $0x8c] ss:$16 sps:$4 sm:$0xff]   ;;  %v1485_v5 = vld [vmem:[%s2105_s5 + $0x80] ss:$16 sps:$4 sm:$0xff]  }
  0x14   :  { %301 = vmatpush1.bf16.msra.mxu1 %v1442_v20  ;;  %173 = vmatprep.subr.bf16.mxu0 %v1443_v21  ;;  %v1488_v6 = vld [vmem:[%s2105_s5 + $0x88] ss:$16 sps:$4 sm:$0xff]   ;;  %v1493_v7 = vld [vmem:[%s2105_s5 + $0xa4] ss:$16 sps:$4 sm:$0xff]   ;;  %v1496_v8 = vld [vmem:[%s2105_s5 + $0xac] ss:$16 sps:$4 sm:$0xff]  }
  0x15   :  { %302 = vmatprep.subr.bf16.mxu1 %v1445_v22  ;;  %v1491_v9 = vld [vmem:[%s2105_s5 + $0xa0] ss:$16 sps:$4 sm:$0xff]   ;;  %v1494_v10 = vld [vmem:[%s2105_s5 + $0xa8] ss:$16 sps:$4 sm:$0xff]   ;;  %v1499_v11 = vld [vmem:[%s2105_s5 + $0xc4] ss:$16 sps:$4 sm:$0xff]  }
  0x16   :  { %v1502_v12 = vld [vmem:[%s2105_s5 + $0xcc] ss:$16 sps:$4 sm:$0xff]   ;;  %v1497_v13 = vld [vmem:[%s2105_s5 + $0xc0] ss:$16 sps:$4 sm:$0xff]   ;;  %v1500_v14 = vld [vmem:[%s2105_s5 + $0xc8] ss:$16 sps:$4 sm:$0xff]  }
  0x17   :  { %174 = vmatpush1.bf16.msra.mxu0 %v1447_v23  ;;  %v1505_v15 = vld [vmem:[%s2105_s5 + $0xe4] ss:$16 sps:$4 sm:$0xff]   ;;  %v1508_v16 = vld [vmem:[%s2105_s5 + $0xec] ss:$16 sps:$4 sm:$0xff]   ;;  %v1503_v17 = vld [vmem:[%s2105_s5 + $0xe0] ss:$16 sps:$4 sm:$0xff]  }
  0x18   :  { %303 = vmatpush1.bf16.msra.mxu1 %v1448_v24  ;;  %175 = vmatprep.subr.bf16.mxu0 %v1449_v25  ;;  %v1506_v18 = vld [vmem:[%s2105_s5 + $0xe8] ss:$16 sps:$4 sm:$0xff]   ;;  %v1511_v19 = vld [vmem:[%s2105_s5 + $0x104] ss:$16 sps:$4 sm:$0xff]   ;;  %v1514_v20 = vld [vmem:[%s2105_s5 + $0x10c] ss:$16 sps:$4 sm:$0xff]  }
  0x19   :  { %304 = vmatprep.subr.bf16.mxu1 %v1451_v26  ;;  %v1509_v21 = vld [vmem:[%s2105_s5 + $0x100] ss:$16 sps:$4 sm:$0xff]   ;;  %v1512_v22 = vld [vmem:[%s2105_s5 + $0x108] ss:$16 sps:$4 sm:$0xff]   ;;  %v1517_v23 = vld [vmem:[%s2105_s5 + $0x124] ss:$16 sps:$4 sm:$0xff]  }
  0x1a   :  { %v1520_v24 = vld [vmem:[%s2105_s5 + $0x12c] ss:$16 sps:$4 sm:$0xff]   ;;  %v1515_v25 = vld [vmem:[%s2105_s5 + $0x120] ss:$16 sps:$4 sm:$0xff]   ;;  %v1518_v26 = vld [vmem:[%s2105_s5 + $0x128] ss:$16 sps:$4 sm:$0xff]  }
  0x1b   :  { %176 = vmatpush1.bf16.msra.mxu0 %v1453_v33  ;;  %v1523_v27 = vld [vmem:[%s2105_s5 + $0x144] ss:$16 sps:$4 sm:$0xff]   ;;  %v1526_v28 = vld [vmem:[%s2105_s5 + $0x14c] ss:$16 sps:$4 sm:$0xff]   ;;  %v1521_v29 = vld [vmem:[%s2105_s5 + $0x140] ss:$16 sps:$4 sm:$0xff]  }
  0x1c   :  { %305 = vmatpush1.bf16.msra.mxu1 %v1454_v34  ;;  %177 = vmatprep.subr.bf16.mxu0 %v1455_v37  ;;  %v1524_v30 = vld [vmem:[%s2105_s5 + $0x148] ss:$16 sps:$4 sm:$0xff]   ;;  %v1529_v31 = vld [vmem:[%s2105_s5 + $0x164] ss:$16 sps:$4 sm:$0xff]   ;;  %v1532_v32 = vld [vmem:[%s2105_s5 + $0x16c] ss:$16 sps:$4 sm:$0xff]  }
  0x1d   :  { %306 = vmatprep.subr.bf16.mxu1 %v1457_v40  ;;  %v1527_v33 = vld [vmem:[%s2105_s5 + $0x160] ss:$16 sps:$4 sm:$0xff]   ;;  %v1530_v34 = vld [vmem:[%s2105_s5 + $0x168] ss:$16 sps:$4 sm:$0xff]   ;;  %v1535_v35 = vld [vmem:[%s2105_s5 + $0x184] ss:$16 sps:$4 sm:$0xff]  }
  0x1e   :  { %v1538_v36 = vld [vmem:[%s2105_s5 + $0x18c] ss:$16 sps:$4 sm:$0xff]   ;;  %v1533_v37 = vld [vmem:[%s2105_s5 + $0x180] ss:$16 sps:$4 sm:$0xff]   ;;  %v1536_v38 = vld [vmem:[%s2105_s5 + $0x188] ss:$16 sps:$4 sm:$0xff]  }
  0x1f   :  { %178 = vmatpush1.bf16.msra.mxu0 %v1459_v44  ;;  %v1541_v39 = vld [vmem:[%s2105_s5 + $0x1a4] ss:$16 sps:$4 sm:$0xff]   ;;  %v1544_v40 = vld [vmem:[%s2105_s5 + $0x1ac] ss:$16 sps:$4 sm:$0xff]   ;;  %v1539_v41 = vld [vmem:[%s2105_s5 + $0x1a0] ss:$16 sps:$4 sm:$0xff]  }
  0x20   :  { %307 = vmatpush1.bf16.msra.mxu1 %v1460_v45  ;;  %757 = vmatprep.subr.bf16.mxu0 %v1463_v48  ;;  %v1542_v42 = vld [vmem:[%s2105_s5 + $0x1a8] ss:$16 sps:$4 sm:$0xff]  }
  0x21   :  { %798 = vmatprep.subr.bf16.mxu1 %v1466_v50 }
  0x22   :  { %196 = vmatmul.mubr.bf16.vlgmr.msra.gmra.mrb[0].mxu0 %v81_v51 }
  0x23   :  { %325 = vmatmul.mubr.bf16.vlgmr.msra.gmra.mrb[0].mxu1 %v210_v52  ;;  %758 = vmatpush1.bf16.msra.mxu0 %v1461_v53 }
  0x24   :  { %799 = vmatpush1.bf16.msra.mxu1 %v1464_v54  ;;  %759 = vmatprep.subr.bf16.mxu0 %v1469_v55 }
  0x25   :  { %800 = vmatprep.subr.bf16.mxu1 %v1472_v56 }
  0x27   :  { %760 = vmatpush1.bf16.msra.mxu0 %v1467_v57 }
  0x28   :  { %801 = vmatpush1.bf16.msra.mxu1 %v1470_v58  ;;  %761 = vmatprep.subr.bf16.mxu0 %v1475_v59 }
  0x29   :  { %802 = vmatprep.subr.bf16.mxu1 %v1478_v60 }
  0x2b   :  { %762 = vmatpush1.bf16.msra.mxu0 %v1473_v61 }
  0x2c   :  { %803 = vmatpush1.bf16.msra.mxu1 %v1476_v62  ;;  %763 = vmatprep.subr.bf16.mxu0 %v1481_v63 }
  0x2d   :  { %804 = vmatprep.subr.bf16.mxu1 %v1484_v0 }
  0x2f   :  { %764 = vmatpush1.bf16.msra.mxu0 %v1479_v1 }
  0x30   :  { %805 = vmatpush1.bf16.msra.mxu1 %v1482_v2  ;;  %765 = vmatprep.subr.bf16.mxu0 %v1487_v3 }
  0x31   :  { %806 = vmatprep.subr.bf16.mxu1 %v1490_v4 }
  0x33   :  { %766 = vmatpush1.bf16.msra.mxu0 %v1485_v5 }
  0x34   :  { %807 = vmatpush1.bf16.msra.mxu1 %v1488_v6  ;;  %767 = vmatprep.subr.bf16.mxu0 %v1493_v7 }
  0x35   :  { %808 = vmatprep.subr.bf16.mxu1 %v1496_v8 }
  0x37   :  { %768 = vmatpush1.bf16.msra.mxu0 %v1491_v9 }
  0x38   :  { %809 = vmatpush1.bf16.msra.mxu1 %v1494_v10  ;;  %769 = vmatprep.subr.bf16.mxu0 %v1499_v11 }
  0x39   :  { %810 = vmatprep.subr.bf16.mxu1 %v1502_v12 }
  0x3b   :  { %770 = vmatpush1.bf16.msra.mxu0 %v1497_v13 }
  0x3c   :  { %811 = vmatpush1.bf16.msra.mxu1 %v1500_v14  ;;  %771 = vmatprep.subr.bf16.mxu0 %v1505_v15 }
  0x3d   :  { %812 = vmatprep.subr.bf16.mxu1 %v1508_v16 }
  0x3f   :  { %772 = vmatpush1.bf16.msra.mxu0 %v1503_v17 }
  0x40   :  { %813 = vmatpush1.bf16.msra.mxu1 %v1506_v18  ;;  %773 = vmatprep.subr.bf16.mxu0 %v1511_v19 }
  0x41   :  { %814 = vmatprep.subr.bf16.mxu1 %v1514_v20 }
  0x43   :  { %774 = vmatpush1.bf16.msra.mxu0 %v1509_v21 }
  0x44   :  { %815 = vmatpush1.bf16.msra.mxu1 %v1512_v22  ;;  %775 = vmatprep.subr.bf16.mxu0 %v1517_v23 }
  0x45   :  { %816 = vmatprep.subr.bf16.mxu1 %v1520_v24 }
  0x47   :  { %776 = vmatpush1.bf16.msra.mxu0 %v1515_v25 }
  0x48   :  { %817 = vmatpush1.bf16.msra.mxu1 %v1518_v26  ;;  %777 = vmatprep.subr.bf16.mxu0 %v1523_v27 }
  0x49   :  { %818 = vmatprep.subr.bf16.mxu1 %v1526_v28 }
  0x4b   :  { %778 = vmatpush1.bf16.msra.mxu0 %v1521_v29 }
  0x4c   :  { %819 = vmatpush1.bf16.msra.mxu1 %v1524_v30  ;;  %779 = vmatprep.subr.bf16.mxu0 %v1529_v31 }
  0x4d   :  { %820 = vmatprep.subr.bf16.mxu1 %v1532_v32 }
  0x4f   :  { %780 = vmatpush1.bf16.msra.mxu0 %v1527_v33 }
  0x50   :  { %821 = vmatpush1.bf16.msra.mxu1 %v1530_v34  ;;  %781 = vmatprep.subr.bf16.mxu0 %v1535_v35 }
  0x51   :  { %822 = vmatprep.subr.bf16.mxu1 %v1538_v36 }
  0x53   :  { %782 = vmatpush1.bf16.msra.mxu0 %v1533_v37 }
  0x54   :  { %823 = vmatpush1.bf16.msra.mxu1 %v1536_v38 }
  0x55   :  { %14 = vsyncpa [#allocation3], 0  ;;  %783 = vmatprep.subr.bf16.mxu0 %v1541_v39  ;;  %824 = vmatprep.subr.bf16.mxu1 %v1544_v40  ;;  %v1547_v43 = vld [vmem:[%s2105_s5 + $0x1c4] ss:$16 sps:$4 sm:$0xff]   ;;  %v1550_v44 = vld [vmem:[%s2105_s5 + $0x1cc] ss:$16 sps:$4 sm:$0xff]   ;;  %v335_v53 = vlaneseq }
  0x56   :  { %v1545_v45 = vld [vmem:[%s2105_s5 + $0x1c0] ss:$16 sps:$4 sm:$0xff]   ;;  %v1548_v46 = vld [vmem:[%s2105_s5 + $0x1c8] ss:$16 sps:$4 sm:$0xff]   ;;  %v1553_v47 = vld [vmem:[%s2105_s5 + $0x1e4] ss:$16 sps:$4 sm:$0xff]  }
  0x57   :  { %784 = vmatpush1.bf16.msra.mxu0 %v1539_v41  ;;  %v1556_v48 = vld [vmem:[%s2105_s5 + $0x1ec] ss:$16 sps:$4 sm:$0xff]   ;;  %v1551_v49 = vld [vmem:[%s2105_s5 + $0x1e0] ss:$16 sps:$4 sm:$0xff]   ;;  %v1554_v50 = vld [vmem:[%s2105_s5 + $0x1e8] ss:$16 sps:$4 sm:$0xff]  }
  0x58   :  { %825 = vmatpush1.bf16.msra.mxu1 %v1542_v42  ;;  %785 = vmatprep.subr.bf16.mxu0 %v1547_v43  ;;  %v1557_v51 = vld [vmem:[%s2107_s7 + $0x40] sm:$0xff]   ;;  %v1974_v54 = vshrl.u32 %v335_v53, 7  ;;  %v1561_v14 = vld [vmem:[%s2107_s7 + $0x48] sm:$0xff]   ;;  %v1565_v18 = vld [vmem:[%s2107_s7 + $0x50] sm:$0xff]   ;;  %s1615_s29 = smov [#allocation2]  }
  0x59   :  { %826 = vmatprep.subr.bf16.mxu1 %v1550_v44  ;;  %v1558_v52 = vld [vmem:[%s2107_s7 + $0xc0] sm:$0xff]   ;;  %v1562_v15 = vld [vmem:[%s2107_s7 + $0xc8] sm:$0xff]   ;;  %v1566_v19 = vld [vmem:[%s2107_s7 + $0xd0] sm:$0xff]   ;;  %s1222_s30 = sshll.u32 %s1615_s29, 4  ;;  %s1223_s30 = int_to_ptr.vmem [resolvable:$true] %s1222_s30 }
  0x5a   :  { %v337_v55 = vsub.s32 0, %v1974_v54  ;;  %v333_v56 = vld [vmem:[%s2104_s4] sm:$0x3]  ;;  %v341_v57 = vsub.s32 1, %v1974_v54  ;;  %v1563_v16 = vld [vmem:[%s2107_s7 + $0x8] sm:$0xff]   ;;  %v1567_v20 = vld [vmem:[%s2107_s7 + $0x10] sm:$0xff]   ;;  %p1594_p1 = scmp.lt.s32.totalorder %s1223_s30, %s1223_s30 }
  0x5b   :  { %786 = vmatpush1.bf16.msra.mxu0 %v1545_v45  ;;  %v1559_v11 = vld [vmem:[%s2107_s7] sm:$0xff]   ;;  %v1564_v17 = vld [vmem:[%s2107_s7 + $0x88] sm:$0xff]   ;;  %v1568_v21 = vld [vmem:[%s2107_s7 + $0x90] sm:$0xff]   ;;  %v427_v42 = vsub.s32 2, %v1974_v54  ;;  %v431_v44 = vsub.s32 3, %v1974_v54 }
  0x5c   :  { %827 = vmatpush1.bf16.msra.mxu1 %v1548_v46  ;;  %787 = vmatprep.subr.bf16.mxu0 %v1553_v47  ;;  %v338_v58 = vrot.slane %v333_v56, %v337_v55  ;;  %v342_v61 = vrot.slane %v333_v56, %v341_v57  ;;  %v1560_v12 = vld [vmem:[%s2107_s7 + $0x80] sm:$0xff]   ;;  %v1569_v22 = vld [vmem:[%s2107_s7 + $0x58] sm:$0xff]   ;;  %v1577_v30 = vld [vmem:[%s2107_s7 + $0x68] sm:$0xff]  }
  0x5d   :  { %828 = vmatprep.subr.bf16.mxu1 %v1556_v48  ;;  %v1570_v23 = vld [vmem:[%s2107_s7 + $0xd8] sm:$0xff]   ;;  %v1573_v26 = vld [vmem:[%s2107_s7 + $0x60] sm:$0xff]   ;;  %v1578_v31 = vld [vmem:[%s2107_s7 + $0xe8] sm:$0xff]  }
  0x5e   :  { %v1571_v24 = vld [vmem:[%s2107_s7 + $0x18] sm:$0xff]   ;;  %v1574_v27 = vld [vmem:[%s2107_s7 + $0xe0] sm:$0xff]   ;;  %v1579_v32 = vld [vmem:[%s2107_s7 + $0x28] sm:$0xff]  }
  0x5f   :  { %788 = vmatpush1.bf16.msra.mxu0 %v1551_v49  ;;  %v1572_v25 = vld [vmem:[%s2107_s7 + $0x98] sm:$0xff]   ;;  %v1575_v28 = vld [vmem:[%s2107_s7 + $0x20] sm:$0xff]   ;;  %v1580_v33 = vld [vmem:[%s2107_s7 + $0xa8] sm:$0xff]  }
  0x60   :  { %829 = vmatpush1.bf16.msra.mxu1 %v1554_v50  ;;  %1364 = vmatprep.subr.bf16.mxu0 %v1557_v51  ;;  %v1576_v29 = vld [vmem:[%s2107_s7 + $0xa0] sm:$0xff]   ;;  %v1581_v34 = vld [vmem:[%s2107_s7 + $0x70] sm:$0xff]   ;;  %v1585_v38 = vld [vmem:[%s2107_s7 + $0x78] sm:$0xff]  }
  0x61   :  { %1386 = vmatprep.subr.bf16.mxu1 %v1558_v52  ;;  %v1582_v35 = vld [vmem:[%s2107_s7 + $0xf0] sm:$0xff]   ;;  %v1586_v39 = vld [vmem:[%s2107_s7 + $0xf8] sm:$0xff]   ;;  %v415_v43 = vld [vmem:[%s2106_s6] sm:$0xf] }
  0x62   :  { %v1583_v36 = vld [vmem:[%s2107_s7 + $0x30] sm:$0xff]   ;;  %v1587_v40 = vld [vmem:[%s2107_s7 + $0x38] sm:$0xff]   ;;  %v420_v45 = vrot.slane %v415_v43, %v337_v55  ;;  %v428_v46 = vrot.slane %v415_v43, %v427_v42  ;;  %v424_v47 = vrot.slane %v415_v43, %v341_v57  ;;  %v432_v48 = vrot.slane %v415_v43, %v431_v44 }
  0x63   :  { %v1584_v37 = vld [vmem:[%s2107_s7 + $0xb0] sm:$0xff]   ;;  %v1588_v41 = vld [vmem:[%s2107_s7 + $0xb8] sm:$0xff]  }
  0xf5   :  { %v197_v59 = vpop.f32.mrb[0].mxu0 }
  0xf6   :  { %v326_v60 = vpop.f32.mrb[0].mxu1  ;;  %v199_v63 = vpop.f32.mrb[1].mxu0 }
  0xf7   :  { %v327_v62 = vadd.f32 %v326_v60, %v197_v59  ;;  %v328_v0 = vpop.f32.mrb[1].mxu1  ;;  %v201_v2 = vpop.f32.mrb[2].mxu0 }
  0xf8   :  { %v329_v1 = vadd.f32 %v328_v0, %v199_v63  ;;  %v330_v3 = vpop.f32.mrb[2].mxu1  ;;  %v202_v5 = vpop.f32.mrb[3].mxu0 }
  0xf9   :  { %v345_v4 = vadd.f32 %v338_v58, %v327_v62  ;;  %v331_v6 = vpop.f32.mrb[3].mxu1 }
  0xfa   :  { %v346_v7 = vadd.f32 %v342_v61, %v329_v1  ;;  %v1614_v6 = vmov 1966171168  }
  0xfb   :  { %v347_v8 = vmax.f32 %v345_v4, 0.0 }
  0xfc   :  { %v348_v9 = vmax.f32 %v346_v7, 0.0  ;;  %v1192_v7 = vunpack.c.l.s4 %v1614_v6 }
  0xfd   :  { %v349_v13 = vpack.c.bf16 %v347_v8, %v347_v8 }
  0xfe   :  { %v350_v10 = vpack.c.bf16 %v348_v9, %v348_v9 }
 0x100   :  { %789 = vmatprep.mubr.bf16.mxu0 %v350_v10  ;;  %830 = vmatprep.mubr.bf16.mxu1 %v350_v10  ;;  %v1193_v10 = vunpack.c.0.s8 %v1192_v7 }
 0x101   :  { %790 = vmatmul.mubr.bf16.vlgmr.msra.gmra.mrb[4].mxu0 %v349_v13  ;;  %831 = vmatmul.mubr.bf16.vlgmr.msra.gmra.mrb[4].mxu1 %v349_v13 }
 0x102   :  { %1365 = vmatpush3.bf16.msra.mxu0 %v1559_v11  ;;  %1387 = vmatpush3.bf16.msra.mxu1 %v1560_v12  ;;  %v1329_v11 = vld [vmem:[%s2108_s8] ss:$0 sm:$0xff]  ;;  %s1589_s8 = scalar_lea.vmem %s1223_s30, 32 }
 0x103   :  { %1366 = vmatprep.subr.bf16.mxu0 %v1561_v14  ;;  %1388 = vmatprep.subr.bf16.mxu1 %v1562_v15  ;;  %p1590_p0 = scmp.ne.s32.totalorder %s1223_s30, %s1589_s8  ;;  %p1595_p2 = scmp.lt.s32.totalorder %s1589_s8, %s1589_s8 }
 0x105   :  { %p1596_p3 = por %p1595_p2, %p1594_p1 }
 0x106   :  { %1367 = vmatpush3.bf16.msra.mxu0 %v1563_v16  ;;  %1389 = vmatpush3.bf16.msra.mxu1 %v1564_v17 }
 0x107   :  { %1368 = vmatprep.subr.bf16.mxu0 %v1565_v18  ;;  %1390 = vmatprep.subr.bf16.mxu1 %v1566_v19  ;;  %p1597_p4 = pnand %p1596_p3, %p1590_p0 }
 0x10a   :  { %1369 = vmatpush3.bf16.msra.mxu0 %v1567_v20  ;;  %1391 = vmatpush3.bf16.msra.mxu1 %v1568_v21  ;;  %v1196_v21 = vsub.s32 %v1193_v10, %v1974_v54 }
 0x10b   :  { %1370 = vmatprep.subr.bf16.mxu0 %v1569_v22  ;;  %1392 = vmatprep.subr.bf16.mxu1 %v1570_v23 }
 0x10e   :  { %1371 = vmatpush3.bf16.msra.mxu0 %v1571_v24  ;;  %1393 = vmatpush3.bf16.msra.mxu1 %v1572_v25 }
 0x10f   :  { %1372 = vmatprep.subr.bf16.mxu0 %v1573_v26  ;;  %1394 = vmatprep.subr.bf16.mxu1 %v1574_v27 }
 0x112   :  { %1373 = vmatpush3.bf16.msra.mxu0 %v1575_v28  ;;  %1395 = vmatpush3.bf16.msra.mxu1 %v1576_v29 }
 0x113   :  { %1374 = vmatprep.subr.bf16.mxu0 %v1577_v30  ;;  %1396 = vmatprep.subr.bf16.mxu1 %v1578_v31 }
 0x116   :  { %1375 = vmatpush3.bf16.msra.mxu0 %v1579_v32  ;;  %1397 = vmatpush3.bf16.msra.mxu1 %v1580_v33 }
 0x117   :  { %1376 = vmatprep.subr.bf16.mxu0 %v1581_v34  ;;  %1398 = vmatprep.subr.bf16.mxu1 %v1582_v35 }
 0x11a   :  { %1377 = vmatpush3.bf16.msra.mxu0 %v1583_v36  ;;  %1399 = vmatpush3.bf16.msra.mxu1 %v1584_v37 }
 0x11b   :  { %1378 = vmatprep.subr.bf16.mxu0 %v1585_v38  ;;  %1400 = vmatprep.subr.bf16.mxu1 %v1586_v39 }
 0x11e   :  { %1379 = vmatpush3.bf16.msra.mxu0 %v1587_v40  ;;  %1401 = vmatpush3.bf16.msra.mxu1 %v1588_v41 }
 0x1d4   :  { %v791_v49 = vpop.f32.mrb[4].mxu0  ;;  %v832_v50 = vpop.f32.mrb[4].mxu1 }
 0x1d5   :  { %v792_v51 = vadd.f32 %v791_v49, %v420_v45  ;;  %v833_v52 = vadd.f32 %v832_v50, %v428_v46  ;;  %v793_v53 = vpop.f32.mrb[5].mxu0  ;;  %v834_v56 = vpop.f32.mrb[5].mxu1 }
 0x1d6   :  { %v794_v58 = vadd.f32 %v793_v53, %v424_v47  ;;  %v835_v59 = vadd.f32 %v834_v56, %v432_v48  ;;  %v795_v60 = vpop.f32.mrb[6].mxu0  ;;  %v836_v61 = vpop.f32.mrb[6].mxu1 }
 0x1d7   :  { %v839_v62 = vmax.f32 %v792_v51, 0.0  ;;  %v841_v63 = vmax.f32 %v833_v52, 0.0  ;;  %v796_v0 = vpop.f32.mrb[7].mxu0  ;;  %v837_v1 = vpop.f32.mrb[7].mxu1 }
 0x1d8   :  { %v840_v55 = vmax.f32 %v794_v58, 0.0  ;;  %v842_v2 = vmax.f32 %v835_v59, 0.0 }
 0x1d9   :  { %v843_v57 = vpack.c.bf16 %v839_v62, %v839_v62  ;;  %v845_v5 = vpack.c.bf16 %v841_v63, %v841_v63 }
 0x1da   :  { %v844_v3 = vpack.c.bf16 %v840_v55, %v840_v55  ;;  %v846_v4 = vpack.c.bf16 %v842_v2, %v842_v2 }
 0x1dc   :  { %1142 = vmatprep.mubr.bf16.mxu0 %v844_v3  ;;  %1182 = vmatprep.mubr.bf16.mxu1 %v846_v4 }
 0x1dd   :  { %1143 = vmatmul.mubr.bf16.vlgmr.msra.gmra.mrb[8].mxu0 %v843_v57  ;;  %1183 = vmatmul.mubr.bf16.vlgmr.msra.gmra.mrb[8].mxu1 %v845_v5 }
 0x2b0   :  { %v1380_v8 = vpop.f32.mrb[8].mxu0  ;;  %v1402_v9 = vpop.f32.mrb[8].mxu1 }
 0x2b1   :  { %v1381_v12 = vpop.f32.mrb[9].mxu0  ;;  %v1403_v13 = vpop.f32.mrb[9].mxu1 }
 0x2b2   :  { %v1382_v14 = vadd.f32 %v1381_v12, %v1380_v8  ;;  %v1404_v15 = vadd.f32 %v1403_v13, %v1402_v9  ;;  %v1383_v16 = vpop.f32.mrb[10].mxu0  ;;  %v1405_v17 = vpop.f32.mrb[10].mxu1 }
 0x2b3   :  { %v1384_v18 = vpop.f32.mrb[11].mxu0  ;;  %v1406_v19 = vpop.f32.mrb[11].mxu1 }
 0x2b4   :  { %v1145_v20 = vadd.f32 %v1382_v14, %v1329_v11 }
 0x2b6   :  { %v1185_v22 = vadd.f32 %v1404_v15, %v1145_v20 }
 0x2b8   :  { %v1197_v23 = vrot.slane %v1185_v22, %v1196_v21 }
 0x2ba   :  { %v1198_v24 = vcombine.high %v1197_v23, %v1197_v23  ;;  %1362 = vst.sshfl [vmem:[#allocation2] sm:$0x1 pattern:$0x73625140] %v1197_v23 }
 0x2bc   :  { %1363 = vst.sshfl [vmem:[#allocation2 + $0x1] sm:$0x1 pattern:$0x73625140] %v1198_v24 }
 0x2bd   :  { %1600 = shalt.err (!%p1597_p4)
}
 0x2be   :  { %s1601_s0 = scalar_lea.hbm %s2109_s9, 32 }
 0x2bf   :  { %p1602_p5 = scmp.ne.s32.totalorder %s2109_s9, %s1601_s0  ;;  %p1605_p6 = scmp.lt.u32.totalorder %s1601_s0, %s2109_s9 }
 0x2c1   :  { %p1607_p7 = pnand %p1605_p6, %p1602_p5 }
 0x2c3   :  { %1610 = shalt.err (!%p1607_p7)
}
 0x2c4   :  { %s1616_s15 = smov 16   ;;  %s1617_s16 = smov 1  }
 0x2c5   :  { %1228 = dma.vmem_to_hbm [thread:$0]  %s1223_s30, 32, %s2109_s9, [#allocation3], %s1616_s15, %s1616_s15, %s1617_s16  }
 0x2c6   :  { %1611 = dma.done.wait [#allocation3], 32  }
 0x2c7   :  { %1612 = vsyncadd [#allocation3], 4294967264 }
 0x2c8   :  { %1232 = vsyncpa [#allocation3], 1 }

</bundles_post_ra>
